<compile_context>
chip_gen: v7x
topology: tpu7x:2x2x1
jax: 0.10.0
libtpu: 0.0.40
codegen_flags: <defaults>
</compile_context>

<pallas_src>
import functools

import jax
import jax.numpy as jnp
from jax.experimental import pallas as pl
from jax.experimental.pallas import tpu as pltpu


def _residual_block_kernel(x_ref, w1_ref, w2_ref, g1_ref, b1_ref, g2_ref, b2_ref,
                           o_ref, pad_ref, *, H, W, CP, eps=1e-5, neg_slope=0.2):
    """One grid step = one lane-packed group of samples (CP = G*C channels).

    x_ref  : (1, H, W, CP) f32   unpadded lane-packed input (also the residual)
    w*_ref : (3, 3*CP, CP) bf16  block-diagonal im2col weights, split along kw
    g*/b*  : (1, CP) f32         per packed-channel InstanceNorm affine params
    o_ref  : (1, H, W, CP) f32
    pad_ref: (H+2, W+2, CP) bf16 zero-bordered conv-input scratch
    """
    f32, bf16 = jnp.float32, jnp.bfloat16

    def pad_store(y_hw_bf16):
        # Write the conv input into rows 1..H of the zero-bordered scratch:
        # a cheap W-axis pad + contiguous row store.  Border rows 0 / H+1 are
        # zeroed once per step below and never overwritten.
        zcol = jnp.zeros((H, 1, CP), bf16)
        pad_ref[1:H + 1, :, :] = jnp.concatenate([zcol, y_hw_bf16, zcol], axis=1)

    def conv3x3(w_ref):
        # Split-K im2col: loop kw (the only sublane-shifting slice), build a
        # (H*W, 3*CP) bf16 sub-patch from the 3 kh shifts (outer-dim slices),
        # and accumulate 3 bf16 MXU matmuls into an f32 accumulator.
        xp = pad_ref[...]                                        # (H+2, W+2, CP) bf16
        acc = None
        for kx in range(3):
            xk = xp[:, kx:kx + W, :]                             # 1 sublane shift
            patch = jnp.concatenate(
                [xk[ky:ky + H].reshape(H * W, CP) for ky in range(3)], axis=1)
            p = jnp.dot(patch, w_ref[kx], preferred_element_type=f32)
            acc = p if acc is None else acc + p
        return acc                                               # (H*W, CP) f32

    def instance_norm(y, g_ref, b_ref):
        # One-pass stats (mean & mean-of-squares) in f32, no (y-mean)**2 temp.
        # Packed channels belong to exactly one sample -> per-sample stats.
        mean = jnp.mean(y, axis=0, keepdims=True)                # (1, CP)
        msq = jnp.mean(y * y, axis=0, keepdims=True)
        var = jnp.maximum(msq - mean * mean, 0.0)
        return (y - mean) * (jax.lax.rsqrt(var + eps) * g_ref[...]) + b_ref[...]

    # Border-only zero fill of the pad scratch (re-done every step so it stays
    # correct if the "parallel" grid axis is split across cores).
    zrow = jnp.zeros((1, W + 2, CP), bf16)
    pad_ref[0:1, :, :] = zrow
    pad_ref[H + 1:H + 2, :, :] = zrow

    x = x_ref[0]                                                 # (H, W, CP) f32 residual

    pad_store(x.astype(bf16))                                    # conv1 input (in-kernel pad)
    y = conv3x3(w1_ref)                                          # conv1
    y = jnp.where(y > 0, y, neg_slope * y)                       # LeakyReLU(0.2), f32 VPU
    y = instance_norm(y, g1_ref, b1_ref)                         # in1

    pad_store(y.reshape(H, W, CP).astype(bf16))                  # conv2 input
    y = conv3x3(w2_ref)                                          # conv2
    y = instance_norm(y, g2_ref, b2_ref)                         # in2

    o_ref[0] = (y.reshape(H, W, CP) + x).astype(o_ref.dtype)     # + identity (exact f32)


def residual_block(x_nchw, w1, w2, g1, b1, g2, b2, *, pack_pairs=True):
    N, C, H, W = x_nchw.shape
    # G=2 packs two samples along the channel/lane axis -> CP=128 lane-dense
    # activations (unmasked vst) on single-TC v5e/v6e.  For tiny batches on v7x
    # set pack_pairs=False so the grid has >=2 parallel steps (both TCs busy).
    G = 2 if (pack_pairs and N >= 2) else 1
    CP = G * C

    Np = -(-N // G) * G
    x = x_nchw.astype(jnp.float32)
    if Np != N:
        x = jnp.concatenate([x, jnp.zeros((Np - N, C, H, W), x.dtype)], axis=0)
    # Single fused relayout NCHW -> lane-packed NHWC (one HBM pass); spatial
    # padding is done in-kernel, so no jnp.pad round trip.
    xp = (x.reshape(Np // G, G, C, H, W)
            .transpose(0, 3, 4, 1, 2)
            .reshape(Np // G, H, W, CP))

    def fuse_w(w):
        # (Cout,Cin,kh,kw) -> (kw, kh*G*Cin, G*Cout) block-diagonal bf16 weight,
        # split along kw to match the kernel's split-K accumulation.
        wt = jnp.transpose(w, (3, 2, 1, 0)).astype(jnp.float32)   # (kw,kh,ci,co)
        eye = jnp.eye(G, dtype=jnp.float32)
        bd = jnp.einsum('xyio,gh->xygiho', wt, eye)               # (kw,kh,G,ci,G,co)
        return bd.reshape(3, 3 * CP, CP).astype(jnp.bfloat16)

    w1f, w2f = fuse_w(w1), fuse_w(w2)
    packp = lambda v: jnp.tile(v.reshape(1, C).astype(jnp.float32), (1, G))  # (1, CP)
    g1p, b1p, g2p, b2p = packp(g1), packp(b1), packp(g2), packp(b2)

    kernel = functools.partial(_residual_block_kernel, H=H, W=W, CP=CP)
    out = pl.pallas_call(
        kernel,
        out_shape=jax.ShapeDtypeStruct((Np // G, H, W, CP), jnp.float32),
        grid_spec=pltpu.PrefetchScalarGridSpec(
            num_scalar_prefetch=0,
            grid=(Np // G,),
            in_specs=[
                pl.BlockSpec((1, H, W, CP), lambda n: (n, 0, 0, 0)),   # x (unpadded)
                pl.BlockSpec((3, 3 * CP, CP), lambda n: (0, 0, 0)),    # conv1 W (bf16)
                pl.BlockSpec((3, 3 * CP, CP), lambda n: (0, 0, 0)),    # conv2 W (bf16)
                pl.BlockSpec((1, CP), lambda n: (0, 0)),               # in1 gamma
                pl.BlockSpec((1, CP), lambda n: (0, 0)),               # in1 beta
                pl.BlockSpec((1, CP), lambda n: (0, 0)),               # in2 gamma
                pl.BlockSpec((1, CP), lambda n: (0, 0)),               # in2 beta
            ],
            out_specs=pl.BlockSpec((1, H, W, CP), lambda n: (n, 0, 0, 0)),
            scratch_shapes=[pltpu.VMEM((H + 2, W + 2, CP), jnp.bfloat16)],
        ),
        compiler_params=pltpu.CompilerParams(dimension_semantics=("parallel",)),
    )(xp, w1f, w2f, g1p, b1p, g2p, b2p)

    # Single fused unpack: lane-packed NHWC -> NCHW (one HBM pass).
    out = (out.reshape(Np // G, H, W, G, C)
              .transpose(0, 3, 4, 1, 2)
              .reshape(Np, C, H, W))[:N]
    return out


def residual_block_ref(x, w1, w2, g1, b1, g2, b2, eps=1e-5):
    """Pure-JAX f32 reference in NCHW, matching PyTorch semantics."""
    dn = ('NCHW', 'OIHW', 'NCHW')

    def conv(a, w):
        return jax.lax.conv_general_dilated(a, w, (1, 1), ((1, 1), (1, 1)),
                                            dimension_numbers=dn,
                                            precision=jax.lax.Precision.HIGHEST)

    def inorm(a, g, b):
        m = a.mean(axis=(2, 3), keepdims=True)
        v = ((a - m) ** 2).mean(axis=(2, 3), keepdims=True)
        return (a - m) / jnp.sqrt(v + eps) * g.reshape(1, -1, 1, 1) + b.reshape(1, -1, 1, 1)

    y = conv(x, w1)
    y = jnp.where(y > 0, y, 0.2 * y)
    y = inorm(y, g1, b1)
    y = conv(y, w2)
    y = inorm(y, g2, b2)
    return y + x


if __name__ == "__main__":
    key = jax.random.PRNGKey(0)
    kx_, k1, k2, kg1, kb1, kg2, kb2 = jax.random.split(key, 7)

    # Channels are fixed at 64 by the module definition; keep batch/spatial small.
    N, C, H, W = 2, 64, 16, 16
    x = jax.random.normal(kx_, (N, C, H, W), jnp.float32)

    # Deterministic synthetic parameters (Conv2d: (Cout, Cin, 3, 3), no bias).
    fan_in = C * 3 * 3
    bound = 1.0 / (fan_in ** 0.5)
    w1 = jax.random.uniform(k1, (C, C, 3, 3), jnp.float32, -bound, bound)
    w2 = jax.random.uniform(k2, (C, C, 3, 3), jnp.float32, -bound, bound)
    g1 = 1.0 + 0.1 * jax.random.normal(kg1, (C,), jnp.float32)
    b1 = 0.1 * jax.random.normal(kb1, (C,), jnp.float32)
    g2 = 1.0 + 0.1 * jax.random.normal(kg2, (C,), jnp.float32)
    b2 = 0.1 * jax.random.normal(kb2, (C,), jnp.float32)

    out = jax.block_until_ready(residual_block(x, w1, w2, g1, b1, g2, b2))
    ref = residual_block_ref(x, w1, w2, g1, b1, g2, b2)

    assert out.shape == (N, C, H, W)
    err = jnp.abs(out - ref)
    max_err, mean_err = float(err.max()), float(err.mean())
    # Single-pass bf16 MXU (per perf review) leaves ~3e-3-sigma rounding noise
    # after the two InstanceNorms (max ~1e-2 over 32K elements); anything
    # structurally wrong would be O(1) off, so these tolerances stay meaningful.
    assert jnp.allclose(out, ref, atol=3e-2, rtol=3e-2), \
        f"max abs err {max_err}, mean abs err {mean_err}"
    assert mean_err < 5e-3, f"mean abs err {mean_err}"

    print("KERNEL_OK")
</pallas_src>

<mosaic_0001>
module attributes {stable_mosaic.version = 11 : i64} {
  func.func @_residual_block_kernel(%arg0: i32, %arg1: memref<1x16x16x128xf32, #tpu.memory_space<vmem>>, %arg2: memref<3x384x128xbf16, #tpu.memory_space<vmem>>, %arg3: memref<3x384x128xbf16, #tpu.memory_space<vmem>>, %arg4: memref<1x128xf32, #tpu.memory_space<vmem>>, %arg5: memref<1x128xf32, #tpu.memory_space<vmem>>, %arg6: memref<1x128xf32, #tpu.memory_space<vmem>>, %arg7: memref<1x128xf32, #tpu.memory_space<vmem>>, %arg8: memref<1x16x16x128xf32, #tpu.memory_space<vmem>>, %arg9: memref<18x18x128xbf16, #tpu.memory_space<vmem>>) attributes {dimension_semantics = [#tpu.dimension_semantics<parallel>], iteration_bounds = array<i64: 1>, scalar_prefetch = 0 : i64, scratch_operands = 1 : i64, tpu.core_type = #tpu.core_type<tc>, window_params = [{transform_indices = @transform_0, window_bounds = array<i64: 1, 16, 16, 128>}, {pipeline_mode = #tpu.pipeline_mode<synchronous>, transform_indices = @transform_1, window_bounds = array<i64: 3, 384, 128>}, {pipeline_mode = #tpu.pipeline_mode<synchronous>, transform_indices = @transform_2, window_bounds = array<i64: 3, 384, 128>}, {pipeline_mode = #tpu.pipeline_mode<synchronous>, transform_indices = @transform_3, window_bounds = array<i64: 1, 128>}, {pipeline_mode = #tpu.pipeline_mode<synchronous>, transform_indices = @transform_4, window_bounds = array<i64: 1, 128>}, {pipeline_mode = #tpu.pipeline_mode<synchronous>, transform_indices = @transform_5, window_bounds = array<i64: 1, 128>}, {pipeline_mode = #tpu.pipeline_mode<synchronous>, transform_indices = @transform_6, window_bounds = array<i64: 1, 128>}, {transform_indices = @transform_7, window_bounds = array<i64: 1, 16, 16, 128>}]} {
    %cst = arith.constant 0.000000e+00 : bf16
    %0 = vector.broadcast %cst : bf16 to vector<1x18x128xbf16>
    %c0 = arith.constant 0 : index
    %c0_0 = arith.constant 0 : index
    %c0_1 = arith.constant 0 : index
    %1 = vector.load %arg9[%c0, %c0_0, %c0_1] : memref<18x18x128xbf16, #tpu.memory_space<vmem>>, vector<1x18x128xbf16>
    tpu.vector_store %arg9[%c0, %c0_0, %c0_1], %0 {strides = array<i32>} : memref<18x18x128xbf16, #tpu.memory_space<vmem>>, vector<1x18x128xbf16>,
    %c17 = arith.constant 17 : index
    %c0_2 = arith.constant 0 : index
    %c0_3 = arith.constant 0 : index
    %2 = vector.load %arg9[%c17, %c0_2, %c0_3] : memref<18x18x128xbf16, #tpu.memory_space<vmem>>, vector<1x18x128xbf16>
    tpu.vector_store %arg9[%c17, %c0_2, %c0_3], %0 {strides = array<i32>} : memref<18x18x128xbf16, #tpu.memory_space<vmem>>, vector<1x18x128xbf16>,
    %c0_4 = arith.constant 0 : index
    %c0_5 = arith.constant 0 : index
    %c0_6 = arith.constant 0 : index
    %c0_7 = arith.constant 0 : index
    %3 = vector.load %arg1[%c0_4, %c0_5, %c0_6, %c0_7] : memref<1x16x16x128xf32, #tpu.memory_space<vmem>>, vector<1x16x16x128xf32>
    %4 = vector.shape_cast %3 : vector<1x16x16x128xf32> to vector<16x16x128xf32>
    %5 = arith.truncf %4 : vector<16x16x128xf32> to vector<16x16x128xbf16>
    %cst_8 = arith.constant 0.000000e+00 : bf16
    %6 = vector.broadcast %cst_8 : bf16 to vector<16x1x128xbf16>
    %7 = tpu.concatenate %6, %5, %6 in 1 : vector<16x1x128xbf16>, vector<16x16x128xbf16>, vector<16x1x128xbf16> -> vector<16x18x128xbf16>
    %c1 = arith.constant 1 : index
    %c0_9 = arith.constant 0 : index
    %c0_10 = arith.constant 0 : index
    %8 = vector.load %arg9[%c1, %c0_9, %c0_10] : memref<18x18x128xbf16, #tpu.memory_space<vmem>>, vector<16x18x128xbf16>
    tpu.vector_store %arg9[%c1, %c0_9, %c0_10], %7 {strides = array<i32>} : memref<18x18x128xbf16, #tpu.memory_space<vmem>>, vector<16x18x128xbf16>,
    %c0_11 = arith.constant 0 : index
    %c0_12 = arith.constant 0 : index
    %c0_13 = arith.constant 0 : index
    %9 = vector.load %arg9[%c0_11, %c0_12, %c0_13] : memref<18x18x128xbf16, #tpu.memory_space<vmem>>, vector<18x18x128xbf16>
    %10 = vector.extract_strided_slice %9 {offsets = [0, 0, 0], sizes = [18, 16, 128], strides = [1, 1, 1]} : vector<18x18x128xbf16> to vector<18x16x128xbf16>
    %11 = vector.extract_strided_slice %10 {offsets = [0, 0, 0], sizes = [16, 16, 128], strides = [1, 1, 1]} : vector<18x16x128xbf16> to vector<16x16x128xbf16>
    %12 = vector.shape_cast %11 : vector<16x16x128xbf16> to vector<256x128xbf16>
    %13 = vector.extract_strided_slice %10 {offsets = [1, 0, 0], sizes = [16, 16, 128], strides = [1, 1, 1]} : vector<18x16x128xbf16> to vector<16x16x128xbf16>
    %14 = vector.shape_cast %13 : vector<16x16x128xbf16> to vector<256x128xbf16>
    %15 = vector.extract_strided_slice %10 {offsets = [2, 0, 0], sizes = [16, 16, 128], strides = [1, 1, 1]} : vector<18x16x128xbf16> to vector<16x16x128xbf16>
    %16 = vector.shape_cast %15 : vector<16x16x128xbf16> to vector<256x128xbf16>
    %17 = tpu.concatenate %12, %14, %16 in 1 : vector<256x128xbf16>, vector<256x128xbf16>, vector<256x128xbf16> -> vector<256x384xbf16>
    %c0_14 = arith.constant 0 : index
    %c0_15 = arith.constant 0 : index
    %c0_16 = arith.constant 0 : index
    %18 = vector.load %arg2[%c0_14, %c0_15, %c0_16] : memref<3x384x128xbf16, #tpu.memory_space<vmem>>, vector<1x384x128xbf16>
    %19 = vector.shape_cast %18 : vector<1x384x128xbf16> to vector<384x128xbf16>
    %cst_17 = arith.constant dense<0.000000e+00> : vector<256x128xf32>
    %20 = tpu.matmul %17, %19, %cst_17 {dimension_numbers = #tpu.dot_dimension_numbers<[1], [0], [0], [1], [0, 0, 1, 1], [], []>} : vector<256x384xbf16>, vector<384x128xbf16>, vector<256x128xf32> -> vector<256x128xf32>
    %21 = vector.extract_strided_slice %9 {offsets = [0, 1, 0], sizes = [18, 16, 128], strides = [1, 1, 1]} : vector<18x18x128xbf16> to vector<18x16x128xbf16>
    %22 = vector.extract_strided_slice %21 {offsets = [0, 0, 0], sizes = [16, 16, 128], strides = [1, 1, 1]} : vector<18x16x128xbf16> to vector<16x16x128xbf16>
    %23 = vector.shape_cast %22 : vector<16x16x128xbf16> to vector<256x128xbf16>
    %24 = vector.extract_strided_slice %21 {offsets = [1, 0, 0], sizes = [16, 16, 128], strides = [1, 1, 1]} : vector<18x16x128xbf16> to vector<16x16x128xbf16>
    %25 = vector.shape_cast %24 : vector<16x16x128xbf16> to vector<256x128xbf16>
    %26 = vector.extract_strided_slice %21 {offsets = [2, 0, 0], sizes = [16, 16, 128], strides = [1, 1, 1]} : vector<18x16x128xbf16> to vector<16x16x128xbf16>
    %27 = vector.shape_cast %26 : vector<16x16x128xbf16> to vector<256x128xbf16>
    %28 = tpu.concatenate %23, %25, %27 in 1 : vector<256x128xbf16>, vector<256x128xbf16>, vector<256x128xbf16> -> vector<256x384xbf16>
    %c1_18 = arith.constant 1 : index
    %c0_19 = arith.constant 0 : index
    %c0_20 = arith.constant 0 : index
    %29 = vector.load %arg2[%c1_18, %c0_19, %c0_20] : memref<3x384x128xbf16, #tpu.memory_space<vmem>>, vector<1x384x128xbf16>
    %30 = vector.shape_cast %29 : vector<1x384x128xbf16> to vector<384x128xbf16>
    %cst_21 = arith.constant dense<0.000000e+00> : vector<256x128xf32>
    %31 = tpu.matmul %28, %30, %cst_21 {dimension_numbers = #tpu.dot_dimension_numbers<[1], [0], [0], [1], [0, 0, 1, 1], [], []>} : vector<256x384xbf16>, vector<384x128xbf16>, vector<256x128xf32> -> vector<256x128xf32>
    %32 = arith.addf %20, %31 : vector<256x128xf32>
    %33 = vector.extract_strided_slice %9 {offsets = [0, 2, 0], sizes = [18, 16, 128], strides = [1, 1, 1]} : vector<18x18x128xbf16> to vector<18x16x128xbf16>
    %34 = vector.extract_strided_slice %33 {offsets = [0, 0, 0], sizes = [16, 16, 128], strides = [1, 1, 1]} : vector<18x16x128xbf16> to vector<16x16x128xbf16>
    %35 = vector.shape_cast %34 : vector<16x16x128xbf16> to vector<256x128xbf16>
    %36 = vector.extract_strided_slice %33 {offsets = [1, 0, 0], sizes = [16, 16, 128], strides = [1, 1, 1]} : vector<18x16x128xbf16> to vector<16x16x128xbf16>
    %37 = vector.shape_cast %36 : vector<16x16x128xbf16> to vector<256x128xbf16>
    %38 = vector.extract_strided_slice %33 {offsets = [2, 0, 0], sizes = [16, 16, 128], strides = [1, 1, 1]} : vector<18x16x128xbf16> to vector<16x16x128xbf16>
    %39 = vector.shape_cast %38 : vector<16x16x128xbf16> to vector<256x128xbf16>
    %40 = tpu.concatenate %35, %37, %39 in 1 : vector<256x128xbf16>, vector<256x128xbf16>, vector<256x128xbf16> -> vector<256x384xbf16>
    %c2 = arith.constant 2 : index
    %c0_22 = arith.constant 0 : index
    %c0_23 = arith.constant 0 : index
    %41 = vector.load %arg2[%c2, %c0_22, %c0_23] : memref<3x384x128xbf16, #tpu.memory_space<vmem>>, vector<1x384x128xbf16>
    %42 = vector.shape_cast %41 : vector<1x384x128xbf16> to vector<384x128xbf16>
    %cst_24 = arith.constant dense<0.000000e+00> : vector<256x128xf32>
    %43 = tpu.matmul %40, %42, %cst_24 {dimension_numbers = #tpu.dot_dimension_numbers<[1], [0], [0], [1], [0, 0, 1, 1], [], []>} : vector<256x384xbf16>, vector<384x128xbf16>, vector<256x128xf32> -> vector<256x128xf32>
    %44 = arith.addf %32, %43 : vector<256x128xf32>
    %cst_25 = arith.constant 0.000000e+00 : f32
    %45 = vector.broadcast %cst_25 : f32 to vector<256x128xf32>
    %46 = arith.cmpf ogt, %44, %45 : vector<256x128xf32>
    %cst_26 = arith.constant 2.000000e-01 : f32
    %47 = vector.broadcast %cst_26 : f32 to vector<256x128xf32>
    %48 = arith.mulf %47, %44 : vector<256x128xf32>
    %49 = arith.select %46, %44, %48 : vector<256x128xi1>, vector<256x128xf32>
    %cst_27 = arith.constant dense<0.000000e+00> : vector<128xf32>
    %50 = vector.multi_reduction <add>, %49, %cst_27 [0] : vector<256x128xf32> to vector<128xf32>
    %51 = vector.shape_cast %50 : vector<128xf32> to vector<1x128xf32>
    %cst_28 = arith.constant 2.560000e+02 : f32
    %52 = vector.broadcast %cst_28 : f32 to vector<1x128xf32>
    %53 = arith.divf %51, %52 : vector<1x128xf32>
    %54 = arith.mulf %49, %49 : vector<256x128xf32>
    %cst_29 = arith.constant dense<0.000000e+00> : vector<128xf32>
    %55 = vector.multi_reduction <add>, %54, %cst_29 [0] : vector<256x128xf32> to vector<128xf32>
    %56 = vector.shape_cast %55 : vector<128xf32> to vector<1x128xf32>
    %cst_30 = arith.constant 2.560000e+02 : f32
    %57 = vector.broadcast %cst_30 : f32 to vector<1x128xf32>
    %58 = arith.divf %56, %57 : vector<1x128xf32>
    %59 = arith.mulf %53, %53 : vector<1x128xf32>
    %60 = arith.subf %58, %59 : vector<1x128xf32>
    %cst_31 = arith.constant 0.000000e+00 : f32
    %61 = vector.broadcast %cst_31 : f32 to vector<1x128xf32>
    %62 = arith.maximumf %60, %61 : vector<1x128xf32>
    %63 = vector.broadcast %53 : vector<1x128xf32> to vector<256x128xf32>
    %64 = arith.subf %49, %63 : vector<256x128xf32>
    %cst_32 = arith.constant 9.99999974E-6 : f32
    %65 = vector.broadcast %cst_32 : f32 to vector<1x128xf32>
    %66 = arith.addf %62, %65 : vector<1x128xf32>
    %67 = math.rsqrt %66 : vector<1x128xf32>
    %c0_33 = arith.constant 0 : index
    %c0_34 = arith.constant 0 : index
    %68 = vector.load %arg4[%c0_33, %c0_34] : memref<1x128xf32, #tpu.memory_space<vmem>>, vector<1x128xf32>
    %69 = arith.mulf %67, %68 : vector<1x128xf32>
    %70 = vector.broadcast %69 : vector<1x128xf32> to vector<256x128xf32>
    %71 = arith.mulf %64, %70 : vector<256x128xf32>
    %c0_35 = arith.constant 0 : index
    %c0_36 = arith.constant 0 : index
    %72 = vector.load %arg5[%c0_35, %c0_36] : memref<1x128xf32, #tpu.memory_space<vmem>>, vector<1x128xf32>
    %73 = vector.broadcast %72 : vector<1x128xf32> to vector<256x128xf32>
    %74 = arith.addf %71, %73 : vector<256x128xf32>
    %75 = vector.shape_cast %74 : vector<256x128xf32> to vector<16x16x128xf32>
    %76 = arith.truncf %75 : vector<16x16x128xf32> to vector<16x16x128xbf16>
    %cst_37 = arith.constant 0.000000e+00 : bf16
    %77 = vector.broadcast %cst_37 : bf16 to vector<16x1x128xbf16>
    %78 = tpu.concatenate %77, %76, %77 in 1 : vector<16x1x128xbf16>, vector<16x16x128xbf16>, vector<16x1x128xbf16> -> vector<16x18x128xbf16>
    %c1_38 = arith.constant 1 : index
    %c0_39 = arith.constant 0 : index
    %c0_40 = arith.constant 0 : index
    %79 = vector.load %arg9[%c1_38, %c0_39, %c0_40] : memref<18x18x128xbf16, #tpu.memory_space<vmem>>, vector<16x18x128xbf16>
    tpu.vector_store %arg9[%c1_38, %c0_39, %c0_40], %78 {strides = array<i32>} : memref<18x18x128xbf16, #tpu.memory_space<vmem>>, vector<16x18x128xbf16>,
    %c0_41 = arith.constant 0 : index
    %c0_42 = arith.constant 0 : index
    %c0_43 = arith.constant 0 : index
    %80 = vector.load %arg9[%c0_41, %c0_42, %c0_43] : memref<18x18x128xbf16, #tpu.memory_space<vmem>>, vector<18x18x128xbf16>
    %81 = vector.extract_strided_slice %80 {offsets = [0, 0, 0], sizes = [18, 16, 128], strides = [1, 1, 1]} : vector<18x18x128xbf16> to vector<18x16x128xbf16>
    %82 = vector.extract_strided_slice %81 {offsets = [0, 0, 0], sizes = [16, 16, 128], strides = [1, 1, 1]} : vector<18x16x128xbf16> to vector<16x16x128xbf16>
    %83 = vector.shape_cast %82 : vector<16x16x128xbf16> to vector<256x128xbf16>
    %84 = vector.extract_strided_slice %81 {offsets = [1, 0, 0], sizes = [16, 16, 128], strides = [1, 1, 1]} : vector<18x16x128xbf16> to vector<16x16x128xbf16>
    %85 = vector.shape_cast %84 : vector<16x16x128xbf16> to vector<256x128xbf16>
    %86 = vector.extract_strided_slice %81 {offsets = [2, 0, 0], sizes = [16, 16, 128], strides = [1, 1, 1]} : vector<18x16x128xbf16> to vector<16x16x128xbf16>
    %87 = vector.shape_cast %86 : vector<16x16x128xbf16> to vector<256x128xbf16>
    %88 = tpu.concatenate %83, %85, %87 in 1 : vector<256x128xbf16>, vector<256x128xbf16>, vector<256x128xbf16> -> vector<256x384xbf16>
    %c0_44 = arith.constant 0 : index
    %c0_45 = arith.constant 0 : index
    %c0_46 = arith.constant 0 : index
    %89 = vector.load %arg3[%c0_44, %c0_45, %c0_46] : memref<3x384x128xbf16, #tpu.memory_space<vmem>>, vector<1x384x128xbf16>
    %90 = vector.shape_cast %89 : vector<1x384x128xbf16> to vector<384x128xbf16>
    %cst_47 = arith.constant dense<0.000000e+00> : vector<256x128xf32>
    %91 = tpu.matmul %88, %90, %cst_47 {dimension_numbers = #tpu.dot_dimension_numbers<[1], [0], [0], [1], [0, 0, 1, 1], [], []>} : vector<256x384xbf16>, vector<384x128xbf16>, vector<256x128xf32> -> vector<256x128xf32>
    %92 = vector.extract_strided_slice %80 {offsets = [0, 1, 0], sizes = [18, 16, 128], strides = [1, 1, 1]} : vector<18x18x128xbf16> to vector<18x16x128xbf16>
    %93 = vector.extract_strided_slice %92 {offsets = [0, 0, 0], sizes = [16, 16, 128], strides = [1, 1, 1]} : vector<18x16x128xbf16> to vector<16x16x128xbf16>
    %94 = vector.shape_cast %93 : vector<16x16x128xbf16> to vector<256x128xbf16>
    %95 = vector.extract_strided_slice %92 {offsets = [1, 0, 0], sizes = [16, 16, 128], strides = [1, 1, 1]} : vector<18x16x128xbf16> to vector<16x16x128xbf16>
    %96 = vector.shape_cast %95 : vector<16x16x128xbf16> to vector<256x128xbf16>
    %97 = vector.extract_strided_slice %92 {offsets = [2, 0, 0], sizes = [16, 16, 128], strides = [1, 1, 1]} : vector<18x16x128xbf16> to vector<16x16x128xbf16>
    %98 = vector.shape_cast %97 : vector<16x16x128xbf16> to vector<256x128xbf16>
    %99 = tpu.concatenate %94, %96, %98 in 1 : vector<256x128xbf16>, vector<256x128xbf16>, vector<256x128xbf16> -> vector<256x384xbf16>
    %c1_48 = arith.constant 1 : index
    %c0_49 = arith.constant 0 : index
    %c0_50 = arith.constant 0 : index
    %100 = vector.load %arg3[%c1_48, %c0_49, %c0_50] : memref<3x384x128xbf16, #tpu.memory_space<vmem>>, vector<1x384x128xbf16>
    %101 = vector.shape_cast %100 : vector<1x384x128xbf16> to vector<384x128xbf16>
    %cst_51 = arith.constant dense<0.000000e+00> : vector<256x128xf32>
    %102 = tpu.matmul %99, %101, %cst_51 {dimension_numbers = #tpu.dot_dimension_numbers<[1], [0], [0], [1], [0, 0, 1, 1], [], []>} : vector<256x384xbf16>, vector<384x128xbf16>, vector<256x128xf32> -> vector<256x128xf32>
    %103 = arith.addf %91, %102 : vector<256x128xf32>
    %104 = vector.extract_strided_slice %80 {offsets = [0, 2, 0], sizes = [18, 16, 128], strides = [1, 1, 1]} : vector<18x18x128xbf16> to vector<18x16x128xbf16>
    %105 = vector.extract_strided_slice %104 {offsets = [0, 0, 0], sizes = [16, 16, 128], strides = [1, 1, 1]} : vector<18x16x128xbf16> to vector<16x16x128xbf16>
    %106 = vector.shape_cast %105 : vector<16x16x128xbf16> to vector<256x128xbf16>
    %107 = vector.extract_strided_slice %104 {offsets = [1, 0, 0], sizes = [16, 16, 128], strides = [1, 1, 1]} : vector<18x16x128xbf16> to vector<16x16x128xbf16>
    %108 = vector.shape_cast %107 : vector<16x16x128xbf16> to vector<256x128xbf16>
    %109 = vector.extract_strided_slice %104 {offsets = [2, 0, 0], sizes = [16, 16, 128], strides = [1, 1, 1]} : vector<18x16x128xbf16> to vector<16x16x128xbf16>
    %110 = vector.shape_cast %109 : vector<16x16x128xbf16> to vector<256x128xbf16>
    %111 = tpu.concatenate %106, %108, %110 in 1 : vector<256x128xbf16>, vector<256x128xbf16>, vector<256x128xbf16> -> vector<256x384xbf16>
    %c2_52 = arith.constant 2 : index
    %c0_53 = arith.constant 0 : index
    %c0_54 = arith.constant 0 : index
    %112 = vector.load %arg3[%c2_52, %c0_53, %c0_54] : memref<3x384x128xbf16, #tpu.memory_space<vmem>>, vector<1x384x128xbf16>
    %113 = vector.shape_cast %112 : vector<1x384x128xbf16> to vector<384x128xbf16>
    %cst_55 = arith.constant dense<0.000000e+00> : vector<256x128xf32>
    %114 = tpu.matmul %111, %113, %cst_55 {dimension_numbers = #tpu.dot_dimension_numbers<[1], [0], [0], [1], [0, 0, 1, 1], [], []>} : vector<256x384xbf16>, vector<384x128xbf16>, vector<256x128xf32> -> vector<256x128xf32>
    %115 = arith.addf %103, %114 : vector<256x128xf32>
    %cst_56 = arith.constant dense<0.000000e+00> : vector<128xf32>
    %116 = vector.multi_reduction <add>, %115, %cst_56 [0] : vector<256x128xf32> to vector<128xf32>
    %117 = vector.shape_cast %116 : vector<128xf32> to vector<1x128xf32>
    %cst_57 = arith.constant 2.560000e+02 : f32
    %118 = vector.broadcast %cst_57 : f32 to vector<1x128xf32>
    %119 = arith.divf %117, %118 : vector<1x128xf32>
    %120 = arith.mulf %115, %115 : vector<256x128xf32>
    %cst_58 = arith.constant dense<0.000000e+00> : vector<128xf32>
    %121 = vector.multi_reduction <add>, %120, %cst_58 [0] : vector<256x128xf32> to vector<128xf32>
    %122 = vector.shape_cast %121 : vector<128xf32> to vector<1x128xf32>
    %cst_59 = arith.constant 2.560000e+02 : f32
    %123 = vector.broadcast %cst_59 : f32 to vector<1x128xf32>
    %124 = arith.divf %122, %123 : vector<1x128xf32>
    %125 = arith.mulf %119, %119 : vector<1x128xf32>
    %126 = arith.subf %124, %125 : vector<1x128xf32>
    %cst_60 = arith.constant 0.000000e+00 : f32
    %127 = vector.broadcast %cst_60 : f32 to vector<1x128xf32>
    %128 = arith.maximumf %126, %127 : vector<1x128xf32>
    %129 = vector.broadcast %119 : vector<1x128xf32> to vector<256x128xf32>
    %130 = arith.subf %115, %129 : vector<256x128xf32>
    %cst_61 = arith.constant 9.99999974E-6 : f32
    %131 = vector.broadcast %cst_61 : f32 to vector<1x128xf32>
    %132 = arith.addf %128, %131 : vector<1x128xf32>
    %133 = math.rsqrt %132 : vector<1x128xf32>
    %c0_62 = arith.constant 0 : index
    %c0_63 = arith.constant 0 : index
    %134 = vector.load %arg6[%c0_62, %c0_63] : memref<1x128xf32, #tpu.memory_space<vmem>>, vector<1x128xf32>
    %135 = arith.mulf %133, %134 : vector<1x128xf32>
    %136 = vector.broadcast %135 : vector<1x128xf32> to vector<256x128xf32>
    %137 = arith.mulf %130, %136 : vector<256x128xf32>
    %c0_64 = arith.constant 0 : index
    %c0_65 = arith.constant 0 : index
    %138 = vector.load %arg7[%c0_64, %c0_65] : memref<1x128xf32, #tpu.memory_space<vmem>>, vector<1x128xf32>
    %139 = vector.broadcast %138 : vector<1x128xf32> to vector<256x128xf32>
    %140 = arith.addf %137, %139 : vector<256x128xf32>
    %141 = vector.shape_cast %140 : vector<256x128xf32> to vector<16x16x128xf32>
    %142 = arith.addf %141, %4 : vector<16x16x128xf32>
    %c0_66 = arith.constant 0 : index
    %c0_67 = arith.constant 0 : index
    %c0_68 = arith.constant 0 : index
    %c0_69 = arith.constant 0 : index
    %143 = vector.load %arg8[%c0_66, %c0_67, %c0_68, %c0_69] : memref<1x16x16x128xf32, #tpu.memory_space<vmem>>, vector<1x16x16x128xf32>
    %144 = vector.shape_cast %143 : vector<1x16x16x128xf32> to vector<16x16x128xf32>
    %145 = vector.shape_cast %142 : vector<16x16x128xf32> to vector<1x16x16x128xf32>
    tpu.vector_store %arg8[%c0_66, %c0_67, %c0_68, %c0_69], %145 {strides = array<i32>} : memref<1x16x16x128xf32, #tpu.memory_space<vmem>>, vector<1x16x16x128xf32>,
    return
  }
  func.func @transform_0(%arg0: i32) -> (i32, i32, i32, i32) {
    %c0_i32 = arith.constant 0 : i32
    %c0_i32_0 = arith.constant 0 : i32
    %c0_i32_1 = arith.constant 0 : i32
    %c0_i32_2 = arith.constant 0 : i32
    return %arg0, %c0_i32, %c0_i32_0, %c0_i32_1 : i32, i32, i32, i32
  }
  func.func @transform_1(%arg0: i32) -> (i32, i32, i32) {
    %c0_i32 = arith.constant 0 : i32
    %c0_i32_0 = arith.constant 0 : i32
    %c0_i32_1 = arith.constant 0 : i32
    %c0_i32_2 = arith.constant 0 : i32
    return %c0_i32, %c0_i32_0, %c0_i32_1 : i32, i32, i32
  }
  func.func @transform_2(%arg0: i32) -> (i32, i32, i32) {
    %c0_i32 = arith.constant 0 : i32
    %c0_i32_0 = arith.constant 0 : i32
    %c0_i32_1 = arith.constant 0 : i32
    %c0_i32_2 = arith.constant 0 : i32
    return %c0_i32, %c0_i32_0, %c0_i32_1 : i32, i32, i32
  }
  func.func @transform_3(%arg0: i32) -> (i32, i32) {
    %c0_i32 = arith.constant 0 : i32
    %c0_i32_0 = arith.constant 0 : i32
    %c0_i32_1 = arith.constant 0 : i32
    return %c0_i32, %c0_i32_0 : i32, i32
  }
  func.func @transform_4(%arg0: i32) -> (i32, i32) {
    %c0_i32 = arith.constant 0 : i32
    %c0_i32_0 = arith.constant 0 : i32
    %c0_i32_1 = arith.constant 0 : i32
    return %c0_i32, %c0_i32_0 : i32, i32
  }
  func.func @transform_5(%arg0: i32) -> (i32, i32) {
    %c0_i32 = arith.constant 0 : i32
    %c0_i32_0 = arith.constant 0 : i32
    %c0_i32_1 = arith.constant 0 : i32
    return %c0_i32, %c0_i32_0 : i32, i32
  }
  func.func @transform_6(%arg0: i32) -> (i32, i32) {
    %c0_i32 = arith.constant 0 : i32
    %c0_i32_0 = arith.constant 0 : i32
    %c0_i32_1 = arith.constant 0 : i32
    return %c0_i32, %c0_i32_0 : i32, i32
  }
  func.func @transform_7(%arg0: i32) -> (i32, i32, i32, i32) {
    %c0_i32 = arith.constant 0 : i32
    %c0_i32_0 = arith.constant 0 : i32
    %c0_i32_1 = arith.constant 0 : i32
    %c0_i32_2 = arith.constant 0 : i32
    return %arg0, %c0_i32, %c0_i32_0, %c0_i32_1 : i32, i32, i32, i32
  }
}

</mosaic_0001>

<bundles_post_ra>
// kernel: tpu_custom_call.1
= control target key start
LH: loop header
LB: loop body
LE: loop exit
PB: predicated region body
PF: predicated region fallthrough
CT: control target
= control target key end

     0   :  { %12 = vsyncpa [#allocation4], 0  ;;  %s11388_s0 = inlined_call_operand.hbm [shape: f32[1,16,16,128], index: 0, kind: input, shape index: {}]   ;;  %s11389_s1 = inlined_call_operand.hbm [shape: bf16[3,384,128], index: 1, kind: input, shape index: {}]   ;;  %s11390_s2 = inlined_call_operand.hbm [shape: bf16[3,384,128], index: 2, kind: input, shape index: {}]   ;;  %s11391_s3 = inlined_call_operand.vmem [shape: f32[1,128], index: 3, kind: input, shape index: {}]   ;;  %s11392_s4 = inlined_call_operand.vmem [shape: f32[1,128], index: 4, kind: input, shape index: {}]   ;;  %s11393_s5 = inlined_call_operand.vmem [shape: f32[1,128], index: 5, kind: input, shape index: {}]   ;;  %s11394_s6 = inlined_call_operand.vmem [shape: f32[1,128], index: 6, kind: input, shape index: {}]   ;;  %s11395_s7 = inlined_call_operand.hbm [shape: f32[1,16,16,128], index: 7, kind: output, shape index: {}]  }
   0x1   :  { %13 = vsyncpa [#allocation7], 0 }
   0x2   :  { %14 = vsyncpa [#allocation5], 0  ;;  %s8680_s24 = smov [#allocation6]   ;;  %s8586_s28 = scalar_lea.hbm %s11389_s1, 9216 }
   0x3   :  { %s32_s25 = sshll.u32 %s8680_s24, 4  ;;  %p8587_p0 = scmp.ne.s32.totalorder %s11389_s1, %s8586_s28  ;;  %s33_s25 = int_to_ptr.vmem [resolvable:$true] %s32_s25 }
   0x4   :  { %p8590_p1 = scmp.lt.u32.totalorder %s8586_s28, %s11389_s1 }
   0x6   :  { %p8592_p2 = pnand %p8590_p1, %p8587_p0 }
   0x8   :  { %8595 = shalt.err (!%p8592_p2)
}
   0x9   :  { %s8596_s10 = scalar_lea.vmem %s33_s25, 9216  ;;  %p8601_p4 = scmp.lt.s32.totalorder %s33_s25, %s33_s25 }
   0xa   :  { %p8597_p3 = scmp.ne.s32.totalorder %s33_s25, %s8596_s10  ;;  %p8602_p5 = scmp.lt.s32.totalorder %s8596_s10, %s8596_s10 }
   0xc   :  { %p8603_p6 = por %p8602_p5, %p8601_p4 }
   0xe   :  { %p8604_p7 = pnand %p8603_p6, %p8597_p3 }
  0x10   :  { %8607 = shalt.err (!%p8604_p7)
}
  0x11   :  { %s8681_s11 = smov 64   ;;  %s8682_s12 = smov 4  }
  0x12   :  { %38 = dma.hbm_to_vmem [thread:$0]  %s11389_s1, 9216, %s33_s25, [#allocation7], %s8681_s11, %s8681_s11, %s8682_s12  }
  0x13   :  { %s8683_s15 = smov [#allocation3]   ;;  %s8608_s19 = scalar_lea.hbm %s11388_s0, 4096 }
  0x14   :  { %s20_s16 = sshll.u32 %s8683_s15, 4  ;;  %p8609_p8 = scmp.ne.s32.totalorder %s11388_s0, %s8608_s19  ;;  %s21_s16 = int_to_ptr.vmem [resolvable:$true] %s20_s16 }
  0x15   :  { %p8612_p9 = scmp.lt.u32.totalorder %s8608_s19, %s11388_s0 }
  0x17   :  { %p8614_p10 = pnand %p8612_p9, %p8609_p8 }
  0x19   :  { %8617 = shalt.err (!%p8614_p10)
}
  0x1a   :  { %s8618_s24 = scalar_lea.vmem %s21_s16, 4096  ;;  %p8623_p12 = scmp.lt.s32.totalorder %s21_s16, %s21_s16 }
  0x1b   :  { %p8619_p11 = scmp.ne.s32.totalorder %s21_s16, %s8618_s24  ;;  %p8624_p13 = scmp.lt.s32.totalorder %s8618_s24, %s8618_s24 }
  0x1d   :  { %p8625_p0 = por %p8624_p13, %p8623_p12 }
  0x1f   :  { %p8626_p1 = pnand %p8625_p0, %p8619_p11 }
  0x21   :  { %8629 = shalt.err (!%p8626_p1)
}
  0x22   :  { %s8684_s1 = smov 128   ;;  %s8685_s25 = smov 8  }
  0x23   :  { %26 = dma.hbm_to_vmem [thread:$0]  %s11388_s0, 4096, %s21_s16, [#allocation4], %s8684_s1, %s8684_s1, %s8685_s25  }
  0x24   :  { %s8686_s28 = smov [#allocation8]   ;;  %s8630_s9 = scalar_lea.hbm %s11390_s2, 9216 }
  0x25   :  { %s44_s29 = sshll.u32 %s8686_s28, 4  ;;  %p8631_p2 = scmp.ne.s32.totalorder %s11390_s2, %s8630_s9  ;;  %s45_s29 = int_to_ptr.vmem [resolvable:$true] %s44_s29 }
  0x26   :  { %p8634_p3 = scmp.lt.u32.totalorder %s8630_s9, %s11390_s2 }
  0x28   :  { %p8636_p4 = pnand %p8634_p3, %p8631_p2 }
  0x2a   :  { %8639 = shalt.err (!%p8636_p4)
}
  0x2b   :  { %s8640_s17 = scalar_lea.vmem %s45_s29, 9216  ;;  %p8645_p6 = scmp.lt.s32.totalorder %s45_s29, %s45_s29 }
  0x2c   :  { %p8641_p5 = scmp.ne.s32.totalorder %s45_s29, %s8640_s17  ;;  %p8646_p7 = scmp.lt.s32.totalorder %s8640_s17, %s8640_s17 }
  0x2e   :  { %p8647_p8 = por %p8646_p7, %p8645_p6 }
  0x30   :  { %p8648_p9 = pnand %p8647_p8, %p8641_p5 }
  0x32   :  { %8651 = shalt.err (!%p8648_p9)
}
  0x33   :  { %50 = dma.hbm_to_vmem [thread:$0]  %s11390_s2, 9216, %s45_s29, [#allocation7], %s8681_s11, %s8681_s11, %s8682_s12  }
  0x34   :  { %8674 = dma.done.wait [#allocation4], 4096  }
  0x35   :  { %8675 = vsyncadd [#allocation4], 4294963200 }
  0x36   :  { %8676 = dma.done.wait [#allocation7], 18432  }
  0x37   :  { %8677 = vsyncadd [#allocation7], 4294948864  ;;  %v8687_v0 = vmov 0   ;;  %v8308_v1 = vld [vmem:[#allocation6 + $0x100] sm:$0xff]   ;;  %v8312_v5 = vld [vmem:[#allocation6 + $0x108] sm:$0xff]   ;;  %vm268_vm3 = vcmask 1040384  }
  0x38   :  { %69 = vst [vmem:[#allocation2] sm:$0xf] %v8687_v0  ;;  %70 = vst [vmem:[#allocation2 + $0x4] sm:$0xf] %v8687_v0  ;;  %v8309_v2 = vld [vmem:[#allocation6 + $0x40] sm:$0xff]   ;;  %6875 = vmatprep.subr.bf16.mxu0 %v8308_v1  ;;  %v8313_v6 = vld [vmem:[#allocation6 + $0x48] sm:$0xff]  }
  0x39   :  { %71 = vst [vmem:[#allocation2 + $0x8] sm:$0x1] %v8687_v0  ;;  %73 = vst [vmem:[#allocation2 + $0xcc] sm:$0xf] %v8687_v0  ;;  %v8310_v3 = vld [vmem:[#allocation6 + $0xc0] sm:$0xff]   ;;  %7011 = vmatprep.subr.bf16.mxu1 %v8309_v2  ;;  %v8314_v7 = vld [vmem:[#allocation6 + $0xc8] sm:$0xff]  }
  0x3a   :  { %74 = vst [vmem:[#allocation2 + $0xd0] sm:$0xf] %v8687_v0  ;;  %75 = vst [vmem:[#allocation2 + $0xd4] sm:$0x1] %v8687_v0  ;;  %v8311_v4 = vld [vmem:[#allocation6] sm:$0xff]   ;;  %6876 = vmatpush3.bf16.msra.mxu0 %v8310_v3  ;;  %v8315_v8 = vld [vmem:[#allocation6 + $0x8] sm:$0xff]  }
  0x3b   :  { %7012 = vmatpush3.bf16.msra.mxu1 %v8311_v4  ;;  %6877 = vmatprep.subr.bf16.mxu0 %v8312_v5  ;;  %v8316_v9 = vld [vmem:[#allocation6 + $0x110] sm:$0xff]   ;;  %v8320_v13 = vld [vmem:[#allocation6 + $0x118] sm:$0xff]   ;;  %v8324_v17 = vld [vmem:[#allocation6 + $0x120] sm:$0xff]   ;;  %vm269_vm0 = vsmask.f32 256  ;;  %v11420_v58 = vmov 0 }
  0x3c   :  { %7013 = vmatprep.subr.bf16.mxu1 %v8313_v6  ;;  %v8317_v10 = vld [vmem:[#allocation6 + $0x50] sm:$0xff]   ;;  %v8321_v14 = vld [vmem:[#allocation6 + $0x58] sm:$0xff]   ;;  %v8325_v18 = vld [vmem:[#allocation6 + $0x60] sm:$0xff]   ;;  %vm738_vm1 = vsmask.f32 3328  ;;  %v11423_v0 = vmov 0 }
  0x3d   :  { %v8318_v11 = vld [vmem:[#allocation6 + $0xd0] sm:$0xff]   ;;  %v8322_v15 = vld [vmem:[#allocation6 + $0xd8] sm:$0xff]   ;;  %v8326_v19 = vld [vmem:[#allocation6 + $0xe0] sm:$0xff]   ;;  %vm739_vm2 = vsmask.f32 7440  ;;  %vm2242_vm6 = vcmask 1042432  }
  0x3e   :  { %6878 = vmatpush3.bf16.msra.mxu0 %v8314_v7  ;;  %v8319_v12 = vld [vmem:[#allocation6 + $0x10] sm:$0xff]   ;;  %v8323_v16 = vld [vmem:[#allocation6 + $0x18] sm:$0xff]   ;;  %v8327_v20 = vld [vmem:[#allocation6 + $0x20] sm:$0xff]   ;;  %vm2243_vm7 = vcmask 1046532  }
  0x3f   :  { %7014 = vmatpush3.bf16.msra.mxu1 %v8315_v8  ;;  %6879 = vmatprep.subr.bf16.mxu0 %v8316_v9  ;;  %v8328_v21 = vld [vmem:[#allocation6 + $0x128] sm:$0xff]   ;;  %v8332_v25 = vld [vmem:[#allocation6 + $0x130] sm:$0xff]   ;;  %v8336_v29 = vld [vmem:[#allocation6 + $0x138] sm:$0xff]  }
  0x40   :  { %7015 = vmatprep.subr.bf16.mxu1 %v8317_v10  ;;  %v8329_v22 = vld [vmem:[#allocation6 + $0x68] sm:$0xff]   ;;  %v8333_v26 = vld [vmem:[#allocation6 + $0x70] sm:$0xff]   ;;  %v8337_v30 = vld [vmem:[#allocation6 + $0x78] sm:$0xff]  }
  0x41   :  { %v8330_v23 = vld [vmem:[#allocation6 + $0xe8] sm:$0xff]   ;;  %v8334_v27 = vld [vmem:[#allocation6 + $0xf0] sm:$0xff]   ;;  %v8338_v31 = vld [vmem:[#allocation6 + $0xf8] sm:$0xff]  }
  0x42   :  { %6880 = vmatpush3.bf16.msra.mxu0 %v8318_v11  ;;  %v8331_v24 = vld [vmem:[#allocation6 + $0x28] sm:$0xff]   ;;  %v8335_v28 = vld [vmem:[#allocation6 + $0x30] sm:$0xff]   ;;  %v8339_v32 = vld [vmem:[#allocation6 + $0x38] sm:$0xff]  }
  0x43   :  { %7016 = vmatpush3.bf16.msra.mxu1 %v8319_v12  ;;  %6881 = vmatprep.subr.bf16.mxu0 %v8320_v13  ;;  %v76_v33 = vld [vmem:[#allocation3] sm:$0xff]  ;;  %v77_v34 = vld [vmem:[#allocation3 + $0x8] sm:$0xff]  ;;  %v530_v38 = vld [vmem:[#allocation2 + $0x8] sm:$0x1] }
  0x44   :  { %7017 = vmatprep.subr.bf16.mxu1 %v8321_v14  ;;  %v8774_v35 = vld [vmem:[#allocation2] sm:$0xf]  ;;  %v108_v36 = vpack.c.bf16 %v77_v34, %v76_v33  ;;  %v8776_v37 = vld [vmem:[#allocation2 + $0x4] sm:$0xf]  ;;  %v761_v43 = vshll.u32 %v530_v38, 16  ;;  %v8784_v50 = vld [vmem:[#allocation6 + $0x140] sm:$0xff]  }
  0x45   :  { %v742_v39 = vshrl.u32 %v8774_v35, 16  ;;  %v745_v40 = vshll.u32 %v8774_v35, 16  ;;  %v751_v41 = vshll.u32 %v8776_v37, 16  ;;  %v755_v42 = vshrl.u32 %v8776_v37, 16  ;;  %v78_v51 = vld [vmem:[#allocation3 + $0x10] sm:$0xff]  ;;  %v79_v52 = vld [vmem:[#allocation3 + $0x18] sm:$0xff]  ;;  %vm8788_vm4 = vmand %vm268_vm3, %vm269_vm0 }
  0x46   :  { %6882 = vmatpush3.bf16.msra.mxu0 %v8322_v15  ;;  %v125_v44 = vshrl.u32 %v108_v36, 16  ;;  %v128_v45 = vshll.u32 %v108_v36, 16  ;;  %v109_v55 = vpack.c.bf16 %v79_v52, %v78_v51  ;;  %v80_v56 = vld [vmem:[#allocation3 + $0x20] sm:$0xff]  ;;  %v81_v57 = vld [vmem:[#allocation3 + $0x28] sm:$0xff]  ;;  %v11421_v58 = vsel %vm8788_vm4, 4294967295, %v11420_v58  ;;  %vm8798_vm5 = vmor %vm738_vm1, %vm739_vm2 }
  0x47   :  { %7018 = vmatpush3.bf16.msra.mxu1 %v8323_v16  ;;  %6883 = vmatprep.subr.bf16.mxu0 %v8324_v17  ;;  %v744_v46 = vrot.slane %v742_v39, 4  ;;  %v747_v47 = vrot.slane %v745_v40, 5  ;;  %v8782_v48 = vrot.slane %v751_v41, 5  ;;  %v757_v49 = vrot.slane %v755_v42, 4  ;;  %11422 = vst [vmem:[#allocation13_spill] sm:$0xff] %v11421_v58  ;;  %v82_v3 = vld [vmem:[#allocation3 + $0x30] sm:$0xff]  ;;  %vm9225_vm8 = vmor %vm2242_vm6, %vm2243_vm7 }
  0x48   :  { %7019 = vmatprep.subr.bf16.mxu1 %v8325_v18  ;;  %v127_v53 = vrot.slane %v125_v44, 7  ;;  %v763_v60 = vrot.slane %v761_v43, 5  ;;  %v110_v61 = vpack.c.bf16 %v81_v57, %v80_v56  ;;  %v11424_v0 = vsel %vm8798_vm5, 4294967295, %v11423_v0  ;;  %v83_v4 = vld [vmem:[#allocation3 + $0x38] sm:$0xff]  ;;  %v84_v9 = vld [vmem:[#allocation3 + $0x40] sm:$0xff]  ;;  %v85_v13 = vld [vmem:[#allocation3 + $0x48] sm:$0xff] }
  0x49   :  { %v748_v54 = vor.u32 %v747_v47, %v744_v46  ;;  %v758_v59 = vor.u32 %v757_v49, %v8782_v48  ;;  %11425 = vst [vmem:[#allocation14_spill] sm:$0xff] %v11424_v0  ;;  %v132_v2 = vshrl.u32 %v109_v55, 16  ;;  %v135_v7 = vshll.u32 %v109_v55, 16  ;;  %v89_v33 = vld [vmem:[#allocation3 + $0x68] sm:$0xff]  ;;  %v90_v40 = vld [vmem:[#allocation3 + $0x70] sm:$0xff]  ;;  %v8820_v41 = vld [vmem:[#allocation6 + $0x80] sm:$0xff]  }
  0x4a   :  { %6884 = vmatpush3.bf16.msra.mxu0 %v8326_v19  ;;  %v130_v62 = vor.u32 %v128_v45, %v127_v53  ;;  %v287_v63 = vsel %vm8788_vm4, %v127_v53, 0  ;;  %v139_v8 = vshrl.u32 %v110_v61, 16  ;;  %v142_v12 = vshll.u32 %v110_v61, 16  ;;  %v91_v45 = vld [vmem:[#allocation3 + $0x78] sm:$0xff]  ;;  %v92_v51 = vld [vmem:[#allocation3 + $0x80] sm:$0xff]  ;;  %v93_v52 = vld [vmem:[#allocation3 + $0x88] sm:$0xff] }
  0x4b   :  { %7020 = vmatpush3.bf16.msra.mxu1 %v8327_v20  ;;  %6885 = vmatprep.subr.bf16.mxu0 %v8328_v21  ;;  %v749_v1 = vrot.slane %v748_v54, 4  ;;  %v6491_v5 = vcombine.low %v287_v63, %v287_v63  ;;  %v759_v6 = vrot.slane %v758_v59, 4  ;;  %v134_v11 = vrot.slane %v132_v2, 7  ;;  %v94_v61 = vld [vmem:[#allocation3 + $0x90] sm:$0xff] }
  0x4c   :  { %7021 = vmatprep.subr.bf16.mxu1 %v8329_v22  ;;  %v271_v10 = vsel %vm8788_vm4, 0, %v130_v62  ;;  %v141_v17 = vrot.slane %v139_v8, 7  ;;  %v111_v21 = vpack.c.bf16 %v83_v4, %v82_v3  ;;  %v6537_v47 = vcombine.low %v8774_v35, %v8776_v37  ;;  %v95_v62 = vld [vmem:[#allocation3 + $0x98] sm:$0xff] }
  0x4d   :  { %v6489_v14 = vcombine.low %v271_v10, %v271_v10  ;;  %v6490_v15 = vcombine.high %v271_v10, %v271_v10  ;;  %482 = vst [vmem:[#allocation2 + $0x14] sm:$0x1] %v6491_v5  ;;  %v754_v16 = vsel %vm8798_vm5, %v749_v1, %v8782_v48  ;;  %v764_v18 = vsel %vm8798_vm5, %v759_v6, %v763_v60 }
  0x4e   :  { %6886 = vmatpush3.bf16.msra.mxu0 %v8330_v23  ;;  %v137_v19 = vor.u32 %v135_v7, %v134_v11  ;;  %v288_v20 = vsel %vm8788_vm4, %v134_v11, 0  ;;  %v144_v23 = vor.u32 %v142_v12, %v141_v17  ;;  %v8822_v46 = vcombine.low %v754_v16, %v764_v18 }
  0x4f   :  { %7022 = vmatpush3.bf16.msra.mxu1 %v8331_v24  ;;  %6887 = vmatprep.subr.bf16.mxu0 %v8332_v25  ;;  %480 = vst [vmem:[#allocation2 + $0xc] sm:$0xf] %v6489_v14  ;;  %481 = vst [vmem:[#allocation2 + $0x10] sm:$0xf] %v6490_v15  ;;  %v6494_v22 = vcombine.low %v288_v20, %v288_v20  ;;  %v289_v24 = vsel %vm8788_vm4, %v141_v17, 0  ;;  %v8813_v25 = vpack.c.bf16 %v85_v13, %v84_v9  ;;  %v8359_v15 = vld [vmem:[#allocation6 + $0x88] sm:$0xff]  }
  0x50   :  { %7023 = vmatprep.subr.bf16.mxu1 %v8333_v26  ;;  %v86_v26 = vld [vmem:[#allocation3 + $0x50] sm:$0xff]  ;;  %v273_v38 = vsel %vm8788_vm4, 0, %v144_v23  ;;  %v8836_v60 = vpack.c.bf16 %v91_v45, %v90_v40  ;;  %v8841_v5 = vpack.c.bf16 %v93_v52, %v92_v51  ;;  %v96_v51 = vld [vmem:[#allocation3 + $0xa0] sm:$0xff]  ;;  %v97_v52 = vld [vmem:[#allocation3 + $0xa8] sm:$0xff] }
  0x51   :  { %485 = vst [vmem:[#allocation2 + $0x20] sm:$0x1] %v6494_v22  ;;  %v153_v39 = vshrl.u32 %v8813_v25, 16  ;;  %v6495_v42 = vcombine.low %v273_v38, %v273_v38  ;;  %v6496_v43 = vcombine.high %v273_v38, %v273_v38  ;;  %v156_v56 = vshll.u32 %v8813_v25, 16 }
  0x52   :  { %6888 = vmatpush3.bf16.msra.mxu0 %v8334_v27  ;;  %v87_v27 = vld [vmem:[#allocation3 + $0x58] sm:$0xff] }
  0x53   :  { %7024 = vmatpush3.bf16.msra.mxu1 %v8335_v28  ;;  %6889 = vmatprep.subr.bf16.mxu0 %v8336_v29  ;;  %v88_v28 = vld [vmem:[#allocation3 + $0x60] sm:$0xff]  ;;  %v272_v29 = vsel %vm8788_vm4, 0, %v137_v19  ;;  %v155_v48 = vrot.slane %v153_v39, 7  ;;  %v8826_v49 = vpack.c.bf16 %v87_v27, %v86_v26  ;;  %486 = vst [vmem:[#allocation2 + $0x24] sm:$0xf] %v6495_v42  ;;  %v8848_v26 = vpack.c.bf16 %v95_v62, %v94_v61 }
  0x54   :  { %7025 = vmatprep.subr.bf16.mxu1 %v8337_v30  ;;  %v6497_v30 = vcombine.low %v289_v24, %v289_v24  ;;  %v6492_v34 = vcombine.low %v272_v29, %v272_v29  ;;  %v6493_v36 = vcombine.high %v272_v29, %v272_v29  ;;  %v533_v53 = vld [vmem:[#allocation2 + $0x14] sm:$0x1]  ;;  %487 = vst [vmem:[#allocation2 + $0x28] sm:$0xf] %v6496_v43 }
  0x55   :  { %v8832_v57 = vpack.c.bf16 %v89_v33, %v88_v28  ;;  %v785_v35 = vshll.u32 %v533_v53, 16  ;;  %v291_v59 = vsel %vm8788_vm4, %v155_v48, 0  ;;  %v160_v4 = vshrl.u32 %v8826_v49, 16 }
  0x56   :  { %6890 = vmatpush3.bf16.msra.mxu0 %v8338_v31  ;;  %v146_v31 = vshrl.u32 %v111_v21, 16  ;;  %488 = vst [vmem:[#allocation2 + $0x2c] sm:$0x1] %v6497_v30  ;;  %483 = vst [vmem:[#allocation2 + $0x18] sm:$0xf] %v6492_v34  ;;  %v6503_v3 = vcombine.low %v291_v59, %v291_v59  ;;  %v8846_v25 = vor.u32 %v156_v56, %v155_v48 }
  0x57   :  { %7026 = vmatpush3.bf16.msra.mxu1 %v8339_v32  ;;  %7691 = vmatprep.subr.bf16.mxu0 %v8784_v50  ;;  %v149_v32 = vshll.u32 %v111_v21, 16  ;;  %484 = vst [vmem:[#allocation2 + $0x1c] sm:$0xf] %v6493_v36  ;;  %v531_v63 = vld [vmem:[#allocation2 + $0xc] sm:$0xf]  ;;  %v787_v10 = vrot.slane %v785_v35, 5 }
  0x58   :  { %v148_v44 = vrot.slane %v146_v31, 7  ;;  %7739 = vmatprep.subr.bf16.mxu1 %v8820_v41  ;;  %v532_v1 = vld [vmem:[#allocation2 + $0x10] sm:$0xf]  ;;  %v766_v6 = vshrl.u32 %v531_v63, 16  ;;  %v769_v7 = vshll.u32 %v531_v63, 16 }
  0x59   :  { %v775_v8 = vshll.u32 %v532_v1, 16  ;;  %v779_v9 = vshrl.u32 %v532_v1, 16  ;;  %v8843_v11 = vcombine.low %v531_v63, %v532_v1  ;;  %v536_v12 = vld [vmem:[#allocation2 + $0x20] sm:$0x1]  ;;  %494 = vst [vmem:[#allocation2 + $0x44] sm:$0x1] %v6503_v3 }
  0x5a   :  { %v151_v54 = vor.u32 %v149_v32, %v148_v44  ;;  %v290_v55 = vsel %vm8788_vm4, %v148_v44, 0  ;;  %v768_v16 = vrot.slane %v766_v6, 4  ;;  %v771_v17 = vrot.slane %v769_v7, 5  ;;  %v537_v31 = vld [vmem:[#allocation2 + $0x24] sm:$0xf] }
  0x5b   :  { %v6500_v37 = vcombine.low %v290_v55, %v290_v55  ;;  %v777_v18 = vrot.slane %v775_v8, 5  ;;  %v781_v19 = vrot.slane %v779_v9, 4  ;;  %1936 = vmatprep.mubr.bf16.mxu1 %v8843_v11  ;;  %v809_v23 = vshll.u32 %v536_v12, 16  ;;  %v538_v38 = vld [vmem:[#allocation2 + $0x28] sm:$0xf]  ;;  %v8345_v1 = vld [vmem:[#allocation6 + $0x148] sm:$0xff]  }
  0x5c   :  { %v274_v2 = vsel %vm8788_vm4, 0, %v151_v54  ;;  %v772_v27 = vor.u32 %v771_v17, %v768_v16  ;;  %1937 = vmatmul.mubr.bf16.vlgmr.msra.gmra.mrb[0].mxu1 %v6537_v47  ;;  %v814_v47 = vshrl.u32 %v537_v31, 16  ;;  %v817_v48 = vshll.u32 %v537_v31, 16 }
  0x5d   :  { %491 = vst [vmem:[#allocation2 + $0x38] sm:$0x1] %v6500_v37  ;;  %v6498_v13 = vcombine.low %v274_v2, %v274_v2  ;;  %v6499_v14 = vcombine.high %v274_v2, %v274_v2  ;;  %v539_v20 = vld [vmem:[#allocation2 + $0x2c] sm:$0x1]  ;;  %v534_v21 = vld [vmem:[#allocation2 + $0x18] sm:$0xf]  ;;  %v782_v28 = vor.u32 %v781_v19, %v777_v18  ;;  %7740 = vmatpush3.bf16.msra.mxu1 %v8820_v41 }
  0x5e   :  { %v535_v22 = vld [vmem:[#allocation2 + $0x1c] sm:$0xf]  ;;  %v833_v24 = vshll.u32 %v539_v20, 16  ;;  %v790_v29 = vshrl.u32 %v534_v21, 16  ;;  %v793_v30 = vshll.u32 %v534_v21, 16  ;;  %v811_v34 = vrot.slane %v809_v23, 5  ;;  %7741 = vmatprep.subr.bf16.mxu1 %v8359_v15 }
  0x5f   :  { %489 = vst [vmem:[#allocation2 + $0x30] sm:$0xf] %v6498_v13  ;;  %490 = vst [vmem:[#allocation2 + $0x34] sm:$0xf] %v6499_v14  ;;  %v799_v32 = vshll.u32 %v535_v22, 16  ;;  %v803_v33 = vshrl.u32 %v535_v22, 16  ;;  %v8850_v36 = vcombine.low %v534_v21, %v535_v22  ;;  %v8860_v6 = vpack.c.bf16 %v97_v52, %v96_v51 }
  0x60   :  { %v773_v39 = vrot.slane %v772_v27, 4  ;;  %v783_v40 = vrot.slane %v782_v28, 4  ;;  %v792_v42 = vrot.slane %v790_v29, 4  ;;  %v795_v43 = vrot.slane %v793_v30, 5  ;;  %v8363_v13 = vld [vmem:[#allocation6 + $0x90] sm:$0xff]   ;;  %v8368_v51 = vld [vmem:[#allocation6 + $0xa0] sm:$0xff]  }
  0x61   :  { %v801_v44 = vrot.slane %v799_v32, 5  ;;  %v805_v45 = vrot.slane %v803_v33, 4  ;;  %1944 = vmatprep.mubr.bf16.mxu1 %v8850_v36  ;;  %v823_v55 = vshll.u32 %v538_v38, 16  ;;  %v816_v37 = vrot.slane %v814_v47, 4  ;;  %7742 = vmatpush3.bf16.msra.mxu1 %v8359_v15  ;;  %v545_v28 = vld [vmem:[#allocation2 + $0x44] sm:$0x1] }
  0x62   :  { %v778_v53 = vsel %vm8798_vm5, %v773_v39, %v777_v18  ;;  %v788_v54 = vsel %vm8798_vm5, %v783_v40, %v787_v10  ;;  %v796_v41 = vor.u32 %v795_v43, %v792_v42  ;;  %v819_v59 = vrot.slane %v817_v48, 5  ;;  %v8348_v18 = vld [vmem:[#allocation6 + $0x150] sm:$0xff]   ;;  %7743 = vmatprep.subr.bf16.mxu1 %v8363_v13 }
  0x63   :  { %v8858_v56 = vcombine.low %v778_v53, %v788_v54  ;;  %v806_v35 = vor.u32 %v805_v45, %v801_v44  ;;  %v825_v62 = vrot.slane %v823_v55, 5  ;;  %v827_v63 = vshrl.u32 %v538_v38, 16 }
  0x64   :  { %v797_v61 = vrot.slane %v796_v41, 4  ;;  %v542_v3 = vld [vmem:[#allocation2 + $0x38] sm:$0x1]  ;;  %v820_v8 = vor.u32 %v819_v59, %v816_v37  ;;  %v835_v9 = vrot.slane %v833_v24, 5  ;;  %v8863_v10 = vcombine.low %v537_v31, %v538_v38  ;;  %1945 = vmatmul.mubr.bf16.gmra.mrb[4].mxu1 %v8843_v11  ;;  %v8351_v41 = vld [vmem:[#allocation6 + $0x158] sm:$0xff]   ;;  %v8369_v59 = vld [vmem:[#allocation6 + $0xa8] sm:$0xff]  }
  0x65   :  { %1470 = vmatprep.mubr.bf16.mxu0 %v8858_v56  ;;  %v807_v7 = vrot.slane %v806_v35, 4  ;;  %v829_v15 = vrot.slane %v827_v63, 4  ;;  %v857_v31 = vshll.u32 %v542_v3, 16  ;;  %7744 = vmatpush3.bf16.msra.mxu1 %v8363_v13  ;;  %v275_v38 = vsel %vm8788_vm4, 0, %v8846_v25 }
  0x66   :  { %v540_v2 = vld [vmem:[#allocation2 + $0x30] sm:$0xf]  ;;  %v541_v12 = vld [vmem:[#allocation2 + $0x34] sm:$0xf]  ;;  %1471 = vmatmul.mubr.bf16.vlgmr.msra.gmra.mrb[0].mxu0 %v8822_v46  ;;  %v802_v14 = vsel %vm8798_vm5, %v797_v61, %v801_v44  ;;  %v821_v20 = vrot.slane %v820_v8, 4  ;;  %1952 = vmatprep.mubr.bf16.mxu1 %v8863_v10  ;;  %v6501_v42 = vcombine.low %v275_v38, %v275_v38  ;;  %v6502_v43 = vcombine.high %v275_v38, %v275_v38 }
  0x67   :  { %v838_v16 = vshrl.u32 %v540_v2, 16  ;;  %v841_v17 = vshll.u32 %v540_v2, 16  ;;  %7692 = vmatpush3.bf16.msra.mxu0 %v8784_v50  ;;  %v812_v19 = vsel %vm8798_vm5, %v807_v7, %v811_v34  ;;  %v847_v21 = vshll.u32 %v541_v12, 16  ;;  %v8365_v46 = vld [vmem:[#allocation6 + $0x98] sm:$0xff]  }
  0x68   :  { %v851_v22 = vshrl.u32 %v541_v12, 16  ;;  %v8873_v23 = vcombine.low %v802_v14, %v812_v19  ;;  %v830_v24 = vor.u32 %v829_v15, %v825_v62  ;;  %7693 = vmatprep.subr.bf16.mxu0 %v8345_v1  ;;  %v826_v50 = vsel %vm8798_vm5, %v821_v20, %v825_v62  ;;  %7745 = vmatprep.subr.bf16.mxu1 %v8365_v46 }
  0x69   :  { %v840_v11 = vrot.slane %v838_v16, 4  ;;  %v843_v27 = vrot.slane %v841_v17, 5  ;;  %v849_v29 = vrot.slane %v847_v21, 5  ;;  %v8878_v34 = vcombine.low %v540_v2, %v541_v12  ;;  %492 = vst [vmem:[#allocation2 + $0x3c] sm:$0xf] %v6501_v42  ;;  %7746 = vmatpush3.bf16.msra.mxu1 %v8365_v46  ;;  %v8354_v12 = vld [vmem:[#allocation6 + $0x160] sm:$0xff]  }
  0x6a   :  { %v853_v30 = vrot.slane %v851_v22, 4  ;;  %1478 = vmatprep.mubr.bf16.mxu0 %v8873_v23  ;;  %v831_v32 = vrot.slane %v830_v24, 4  ;;  %v859_v40 = vrot.slane %v857_v31, 5  ;;  %v881_v47 = vshll.u32 %v545_v28, 16  ;;  %493 = vst [vmem:[#allocation2 + $0x40] sm:$0xf] %v6502_v43  ;;  %7747 = vmatprep.subr.bf16.mxu1 %v8368_v51 }
  0x6b   :  { %v844_v33 = vor.u32 %v843_v27, %v840_v11  ;;  %7694 = vmatpush3.bf16.msra.mxu0 %v8345_v1  ;;  %v162_v48 = vrot.slane %v160_v4, 7  ;;  %v163_v25 = vshll.u32 %v8826_v49, 16  ;;  %v167_v54 = vshrl.u32 %v8832_v57, 16  ;;  %v8371_v16 = vld [vmem:[#allocation6 + $0xb0] sm:$0xff]   ;;  %v8358_v27 = vld [vmem:[#allocation6 + $0x168] sm:$0xff]  }
  0x6c   :  { %v854_v39 = vor.u32 %v853_v30, %v849_v29  ;;  %v836_v44 = vsel %vm8798_vm5, %v831_v32, %v835_v9  ;;  %7695 = vmatprep.subr.bf16.mxu0 %v8348_v18  ;;  %1953 = vmatmul.mubr.bf16.gmra.mrb[8].mxu1 %v8850_v36  ;;  %v8895_v4 = vrot.slane %v881_v47, 5  ;;  %v170_v37 = vshll.u32 %v8832_v57, 16 }
  0x6d   :  { %v845_v45 = vrot.slane %v844_v33, 4  ;;  %v8887_v52 = vcombine.low %v826_v50, %v836_v44  ;;  %v292_v35 = vsel %vm8788_vm4, %v162_v48, 0  ;;  %1960 = vmatprep.mubr.bf16.mxu1 %v8878_v34  ;;  %v169_v62 = vrot.slane %v167_v54, 7  ;;  %7748 = vmatpush3.bf16.msra.mxu1 %v8368_v51 }
  0x6e   :  { %v855_v53 = vrot.slane %v854_v39, 4  ;;  %1479 = vmatmul.mubr.bf16.gmra.mrb[4].mxu0 %v8858_v56  ;;  %v165_v56 = vor.u32 %v163_v25, %v162_v48  ;;  %v6506_v61 = vcombine.low %v292_v35, %v292_v35  ;;  %v174_v1 = vshrl.u32 %v8836_v60, 16  ;;  %7749 = vmatprep.subr.bf16.mxu1 %v8369_v59  ;;  %v8372_v39 = vld [vmem:[#allocation6 + $0xb8] sm:$0xff]   ;;  %v8362_v35 = vld [vmem:[#allocation6 + $0x170] sm:$0xff]  }
  0x6f   :  { %v850_v55 = vsel %vm8798_vm5, %v845_v45, %v849_v29  ;;  %1486 = vmatprep.mubr.bf16.mxu0 %v8887_v52  ;;  %7696 = vmatpush3.bf16.msra.mxu0 %v8348_v18  ;;  %v177_v2 = vshll.u32 %v8836_v60, 16  ;;  %v181_v57 = vshrl.u32 %v8841_v5, 16  ;;  %v172_v7 = vor.u32 %v170_v37, %v169_v62 }
  0x70   :  { %v860_v49 = vsel %vm8798_vm5, %v855_v53, %v859_v40  ;;  %v276_v3 = vsel %vm8788_vm4, 0, %v165_v56  ;;  %497 = vst [vmem:[#allocation2 + $0x50] sm:$0x1] %v6506_v61  ;;  %v293_v8 = vsel %vm8788_vm4, %v169_v62, 0  ;;  %7697 = vmatprep.subr.bf16.mxu0 %v8351_v41  ;;  %v184_v9 = vshll.u32 %v8841_v5, 16 }
  0x71   :  { %v8904_v63 = vcombine.low %v850_v55, %v860_v49  ;;  %v6504_v13 = vcombine.low %v276_v3, %v276_v3  ;;  %v6505_v14 = vcombine.high %v276_v3, %v276_v3  ;;  %v6509_v15 = vcombine.low %v293_v8, %v293_v8  ;;  %v543_v21 = vld [vmem:[#allocation2 + $0x3c] sm:$0xf]  ;;  %v544_v22 = vld [vmem:[#allocation2 + $0x40] sm:$0xf]  ;;  %7750 = vmatpush3.bf16.msra.mxu1 %v8369_v59 }
  0x72   :  { %v176_v60 = vrot.slane %v174_v1, 7  ;;  %v277_v17 = vsel %vm8788_vm4, 0, %v172_v7  ;;  %v183_v18 = vrot.slane %v181_v57, 7  ;;  %v188_v19 = vshrl.u32 %v8848_v26, 16  ;;  %7751 = vmatprep.subr.bf16.mxu1 %v8371_v16 }
  0x73   :  { %v191_v20 = vshll.u32 %v8848_v26, 16  ;;  %495 = vst [vmem:[#allocation2 + $0x48] sm:$0xf] %v6504_v13  ;;  %496 = vst [vmem:[#allocation2 + $0x4c] sm:$0xf] %v6505_v14  ;;  %v6507_v5 = vcombine.low %v277_v17, %v277_v17  ;;  %v6508_v46 = vcombine.high %v277_v17, %v277_v17  ;;  %7698 = vmatpush3.bf16.msra.mxu0 %v8351_v41  ;;  %v862_v28 = vshrl.u32 %v543_v21, 16 }
  0x74   :  { %500 = vst [vmem:[#allocation2 + $0x5c] sm:$0x1] %v6509_v15  ;;  %v179_v24 = vor.u32 %v177_v2, %v176_v60  ;;  %v294_v11 = vsel %vm8788_vm4, %v176_v60, 0  ;;  %v865_v50 = vshll.u32 %v543_v21, 16  ;;  %v871_v29 = vshll.u32 %v544_v22, 16  ;;  %7699 = vmatprep.subr.bf16.mxu0 %v8354_v12  ;;  %1961 = vmatmul.mubr.bf16.gmra.mrb[12].mxu1 %v8863_v10  ;;  %v8367_v17 = vld [vmem:[#allocation6 + $0x178] sm:$0xff]  }
  0x75   :  { %v875_v30 = vshrl.u32 %v544_v22, 16  ;;  %v8922_v31 = vcombine.low %v543_v21, %v544_v22  ;;  %498 = vst [vmem:[#allocation2 + $0x54] sm:$0xf] %v6507_v5  ;;  %499 = vst [vmem:[#allocation2 + $0x58] sm:$0xf] %v6508_v46  ;;  %v6512_v33 = vcombine.low %v294_v11, %v294_v11  ;;  %v186_v38 = vor.u32 %v184_v9, %v183_v18 }
  0x76   :  { %1487 = vmatmul.mubr.bf16.gmra.mrb[8].mxu0 %v8873_v23  ;;  %v278_v32 = vsel %vm8788_vm4, 0, %v179_v24  ;;  %v864_v40 = vrot.slane %v862_v28, 4  ;;  %v867_v42 = vrot.slane %v865_v50, 5  ;;  %v873_v43 = vrot.slane %v871_v29, 5  ;;  %7752 = vmatpush3.bf16.msra.mxu1 %v8371_v16 }
  0x77   :  { %1494 = vmatprep.mubr.bf16.mxu0 %v8904_v63  ;;  %v877_v44 = vrot.slane %v875_v30, 4  ;;  %1968 = vmatprep.mubr.bf16.mxu1 %v8922_v31  ;;  %v548_v45 = vld [vmem:[#allocation2 + $0x50] sm:$0x1]  ;;  %v6510_v47 = vcombine.low %v278_v32, %v278_v32  ;;  %v6511_v48 = vcombine.high %v278_v32, %v278_v32  ;;  %503 = vst [vmem:[#allocation2 + $0x68] sm:$0x1] %v6512_v33  ;;  %v279_v51 = vsel %vm8788_vm4, 0, %v186_v38 }
  0x78   :  { %v295_v53 = vsel %vm8788_vm4, %v183_v18, 0  ;;  %7700 = vmatpush3.bf16.msra.mxu0 %v8354_v12  ;;  %v868_v25 = vor.u32 %v867_v42, %v864_v40  ;;  %v905_v41 = vshll.u32 %v548_v45, 16  ;;  %v6513_v55 = vcombine.low %v279_v51, %v279_v51  ;;  %7753 = vmatprep.subr.bf16.mxu1 %v8372_v39 }
  0x79   :  { %v878_v54 = vor.u32 %v877_v44, %v873_v43  ;;  %7701 = vmatprep.subr.bf16.mxu0 %v8358_v27  ;;  %501 = vst [vmem:[#allocation2 + $0x60] sm:$0xf] %v6510_v47  ;;  %502 = vst [vmem:[#allocation2 + $0x64] sm:$0xf] %v6511_v48  ;;  %v6514_v37 = vcombine.high %v279_v51, %v279_v51  ;;  %v6515_v59 = vcombine.low %v295_v53, %v295_v53  ;;  %v98_v47 = vld [vmem:[#allocation3 + $0xb0] sm:$0xff] }
  0x7a   :  { %v8932_v49 = vrot.slane %v188_v19, 7  ;;  %v195_v56 = vshrl.u32 %v8860_v6, 16  ;;  %v869_v61 = vrot.slane %v868_v25, 4  ;;  %v546_v1 = vld [vmem:[#allocation2 + $0x48] sm:$0xf]  ;;  %v907_v14 = vrot.slane %v905_v41, 5  ;;  %7754 = vmatpush3.bf16.msra.mxu1 %v8372_v39 }
  0x7b   :  { %v879_v62 = vrot.slane %v878_v54, 4  ;;  %v547_v2 = vld [vmem:[#allocation2 + $0x4c] sm:$0xf]  ;;  %504 = vst [vmem:[#allocation2 + $0x6c] sm:$0xf] %v6513_v55  ;;  %v886_v57 = vshrl.u32 %v546_v1, 16 }
  0x7c   :  { %v889_v3 = vshll.u32 %v546_v1, 16  ;;  %v895_v7 = vshll.u32 %v547_v2, 16  ;;  %v899_v8 = vshrl.u32 %v547_v2, 16  ;;  %v551_v9 = vld [vmem:[#allocation2 + $0x5c] sm:$0x1]  ;;  %7702 = vmatpush3.bf16.msra.mxu0 %v8358_v27  ;;  %v874_v12 = vsel %vm8798_vm5, %v869_v61, %v873_v43  ;;  %1969 = vmatmul.mubr.bf16.gmra.mrb[16].mxu1 %v8878_v34  ;;  %v99_v41 = vld [vmem:[#allocation3 + $0xb8] sm:$0xff] }
  0x7d   :  { %505 = vst [vmem:[#allocation2 + $0x70] sm:$0xf] %v6514_v37  ;;  %506 = vst [vmem:[#allocation2 + $0x74] sm:$0x1] %v6515_v59  ;;  %v884_v13 = vsel %vm8798_vm5, %v879_v62, %v8895_v4  ;;  %v8940_v15 = vcombine.low %v546_v1, %v547_v2  ;;  %v549_v60 = vld [vmem:[#allocation2 + $0x54] sm:$0xf]  ;;  %7703 = vmatprep.subr.bf16.mxu0 %v8362_v35 }
  0x7e   :  { %v550_v16 = vld [vmem:[#allocation2 + $0x58] sm:$0xf]  ;;  %1495 = vmatmul.mubr.bf16.gmra.mrb[12].mxu0 %v8887_v52  ;;  %v8943_v18 = vcombine.low %v874_v12, %v884_v13  ;;  %v888_v19 = vrot.slane %v886_v57, 4  ;;  %v891_v21 = vrot.slane %v889_v3, 5  ;;  %v897_v22 = vrot.slane %v895_v7, 5 }
  0x7f   :  { %v901_v5 = vrot.slane %v899_v8, 4  ;;  %1976 = vmatprep.mubr.bf16.mxu1 %v8940_v15  ;;  %v910_v4 = vshrl.u32 %v549_v60, 16  ;;  %v913_v46 = vshll.u32 %v549_v60, 16  ;;  %v919_v24 = vshll.u32 %v550_v16, 16  ;;  %v8373_v39 = vld [vmem:[#allocation6 + $0x1c0] sm:$0xff]  }
  0x80   :  { %1502 = vmatprep.mubr.bf16.mxu0 %v8943_v18  ;;  %v892_v11 = vor.u32 %v891_v21, %v888_v19  ;;  %v923_v27 = vshrl.u32 %v550_v16, 16  ;;  %v929_v28 = vshll.u32 %v551_v9, 16  ;;  %v8948_v50 = vcombine.low %v549_v60, %v550_v16  ;;  %7704 = vmatpush3.bf16.msra.mxu0 %v8362_v35  ;;  %v552_v38 = vld [vmem:[#allocation2 + $0x60] sm:$0xf]  ;;  %v553_v44 = vld [vmem:[#allocation2 + $0x64] sm:$0xf] }
  0x81   :  { %v902_v29 = vor.u32 %v901_v5, %v897_v22  ;;  %v912_v30 = vrot.slane %v910_v4, 4  ;;  %v915_v32 = vrot.slane %v913_v46, 5  ;;  %v921_v33 = vrot.slane %v919_v24, 5  ;;  %7705 = vmatprep.subr.bf16.mxu0 %v8367_v17  ;;  %v554_v53 = vld [vmem:[#allocation2 + $0x68] sm:$0x1]  ;;  %v100_v1 = vld [vmem:[#allocation3 + $0xc0] sm:$0xff] }
  0x82   :  { %v893_v40 = vrot.slane %v892_v11, 4  ;;  %v925_v42 = vrot.slane %v923_v27, 4  ;;  %v931_v43 = vrot.slane %v929_v28, 5  ;;  %v934_v45 = vshrl.u32 %v552_v38, 16  ;;  %v8952_v61 = vld [vmem:[#allocation2 + $0x6c] sm:$0xf] }
  0x83   :  { %v903_v48 = vrot.slane %v902_v29, 4  ;;  %v916_v51 = vor.u32 %v915_v32, %v912_v30  ;;  %v937_v25 = vshll.u32 %v552_v38, 16  ;;  %v943_v54 = vshll.u32 %v553_v44, 16  ;;  %v8960_v9 = vld [vmem:[#allocation6 + $0x200] sm:$0xff]  }
  0x84   :  { %v898_v55 = vsel %vm8798_vm5, %v893_v40, %v897_v22  ;;  %v926_v35 = vor.u32 %v925_v42, %v921_v33  ;;  %v936_v37 = vrot.slane %v934_v45, 4  ;;  %v947_v59 = vshrl.u32 %v553_v44, 16  ;;  %v8954_v62 = vld [vmem:[#allocation2 + $0x70] sm:$0xf]  ;;  %7706 = vmatpush3.bf16.msra.mxu0 %v8367_v17  ;;  %v557_v8 = vld [vmem:[#allocation2 + $0x74] sm:$0x1]  ;;  %1977 = vmatmul.mubr.bf16.gmra.mrb[20].mxu1 %v8922_v31 }
  0x85   :  { %v908_v2 = vsel %vm8798_vm5, %v903_v48, %v907_v14  ;;  %v917_v57 = vrot.slane %v916_v51, 4  ;;  %v939_v3 = vrot.slane %v937_v25, 5  ;;  %v8958_v7 = vrot.slane %v943_v54, 5  ;;  %7147 = vmatprep.subr.bf16.mxu0 %v8373_v39  ;;  %v101_v17 = vld [vmem:[#allocation3 + $0xc8] sm:$0xff]  ;;  %1984 = vmatprep.mubr.bf16.mxu1 %v8948_v50 }
  0x86   :  { %1503 = vmatmul.mubr.bf16.gmra.mrb[16].mxu0 %v8904_v63  ;;  %v8963_v12 = vcombine.low %v898_v55, %v908_v2  ;;  %v927_v13 = vrot.slane %v926_v35, 4  ;;  %v949_v60 = vrot.slane %v947_v59, 4  ;;  %v953_v16 = vshll.u32 %v554_v53, 16  ;;  %7787 = vmatprep.subr.bf16.mxu1 %v8960_v9  ;;  %v102_v35 = vld [vmem:[#allocation3 + $0xd0] sm:$0xff] }
  0x87   :  { %v922_v14 = vsel %vm8798_vm5, %v917_v57, %v921_v33  ;;  %v940_v19 = vor.u32 %v939_v3, %v936_v37  ;;  %v958_v21 = vshrl.u32 %v8952_v61, 16  ;;  %v119_v22 = vpack.c.bf16 %v99_v41, %v98_v47 }
  0x88   :  { %1510 = vmatprep.mubr.bf16.mxu0 %v8963_v12  ;;  %v932_v5 = vsel %vm8798_vm5, %v927_v13, %v931_v43  ;;  %v950_v4 = vor.u32 %v949_v60, %v8958_v7  ;;  %v955_v46 = vrot.slane %v953_v16, 5  ;;  %v961_v24 = vshll.u32 %v8952_v61, 16 }
  0x89   :  { %v941_v11 = vrot.slane %v940_v19, 4  ;;  %v960_v27 = vrot.slane %v958_v21, 4  ;;  %v967_v28 = vshll.u32 %v8954_v62, 16  ;;  %v8977_v29 = vpack.c.bf16 %v101_v17, %v100_v1  ;;  %v103_v1 = vld [vmem:[#allocation3 + $0xd8] sm:$0xff] }
  0x8a   :  { %v951_v30 = vrot.slane %v950_v4, 4  ;;  %v963_v32 = vrot.slane %v961_v24, 5  ;;  %v971_v33 = vshrl.u32 %v8954_v62, 16  ;;  %v977_v39 = vshll.u32 %v557_v8, 16 }
  0x8b   :  { %v8980_v40 = vcombine.low %v922_v14, %v932_v5  ;;  %v8982_v42 = vcombine.low %v552_v38, %v553_v44  ;;  %v969_v43 = vrot.slane %v967_v28, 5  ;;  %v193_v45 = vor.u32 %v191_v20, %v8932_v49 }
  0x8c   :  { %v946_v47 = vsel %vm8798_vm5, %v941_v11, %v8958_v7  ;;  %v956_v48 = vsel %vm8798_vm5, %v951_v30, %v955_v46  ;;  %v964_v51 = vor.u32 %v963_v32, %v960_v27  ;;  %v973_v53 = vrot.slane %v971_v33, 4  ;;  %1985 = vmatmul.mubr.bf16.gmra.mrb[24].mxu1 %v8940_v15 }
  0x8d   :  { %v979_v25 = vrot.slane %v977_v39, 5  ;;  %v280_v54 = vsel %vm8788_vm4, 0, %v193_v45  ;;  %v296_v38 = vsel %vm8788_vm4, %v8932_v49, 0  ;;  %v197_v26 = vrot.slane %v195_v56, 7  ;;  %1992 = vmatprep.mubr.bf16.mxu1 %v8982_v42 }
  0x8e   :  { %1511 = vmatmul.mubr.bf16.gmra.mrb[20].mxu0 %v8943_v18  ;;  %v965_v20 = vrot.slane %v964_v51, 4  ;;  %v974_v44 = vor.u32 %v973_v53, %v969_v43  ;;  %v6516_v41 = vcombine.low %v280_v54, %v280_v54  ;;  %v6517_v55 = vcombine.high %v280_v54, %v280_v54 }
  0x8f   :  { %1518 = vmatprep.mubr.bf16.mxu0 %v8980_v40  ;;  %v6518_v37 = vcombine.low %v296_v38, %v296_v38  ;;  %v198_v59 = vshll.u32 %v8860_v6, 16  ;;  %v297_v49 = vsel %vm8788_vm4, %v197_v26, 0  ;;  %v202_v56 = vshrl.u32 %v119_v22, 16 }
  0x90   :  { %v975_v2 = vrot.slane %v974_v44, 4  ;;  %507 = vst [vmem:[#allocation2 + $0x78] sm:$0xf] %v6516_v41  ;;  %508 = vst [vmem:[#allocation2 + $0x7c] sm:$0xf] %v6517_v55  ;;  %v6521_v57 = vcombine.low %v297_v49, %v297_v49  ;;  %v205_v3 = vshll.u32 %v119_v22, 16  ;;  %v9008_v16 = vcombine.low %v946_v47, %v956_v48 }
  0x91   :  { %509 = vst [vmem:[#allocation2 + $0x80] sm:$0x1] %v6518_v37  ;;  %v200_v7 = vor.u32 %v198_v59, %v197_v26  ;;  %v204_v8 = vrot.slane %v202_v56, 7  ;;  %v209_v13 = vshrl.u32 %v8977_v29, 16  ;;  %v212_v60 = vshll.u32 %v8977_v29, 16 }
  0x92   :  { %v970_v6 = vsel %vm8798_vm5, %v965_v20, %v969_v43  ;;  %v9014_v17 = vcombine.low %v8952_v61, %v8954_v62  ;;  %512 = vst [vmem:[#allocation2 + $0x8c] sm:$0x1] %v6521_v57  ;;  %v121_v14 = vpack.c.bf16 %v103_v1, %v102_v35  ;;  %v980_v19 = vsel %vm8798_vm5, %v975_v2, %v979_v25 }
  0x93   :  { %v281_v21 = vsel %vm8788_vm4, 0, %v200_v7  ;;  %v207_v22 = vor.u32 %v205_v3, %v204_v8  ;;  %v298_v5 = vsel %vm8788_vm4, %v204_v8, 0  ;;  %v211_v11 = vrot.slane %v209_v13, 7  ;;  %v104_v13 = vld [vmem:[#allocation3 + $0xe0] sm:$0xff] }
  0x94   :  { %v6519_v4 = vcombine.low %v281_v21, %v281_v21  ;;  %v6520_v46 = vcombine.high %v281_v21, %v281_v21  ;;  %v6524_v24 = vcombine.low %v298_v5, %v298_v5  ;;  %v216_v62 = vshrl.u32 %v121_v14, 16  ;;  %1993 = vmatmul.mubr.bf16.gmra.mrb[28].mxu1 %v8948_v50 }
  0x95   :  { %v282_v61 = vsel %vm8788_vm4, 0, %v207_v22  ;;  %v219_v27 = vshll.u32 %v121_v14, 16  ;;  %v214_v30 = vor.u32 %v212_v60, %v211_v11  ;;  %v299_v32 = vsel %vm8788_vm4, %v211_v11, 0  ;;  %2000 = vmatprep.mubr.bf16.mxu1 %v9014_v17  ;;  %v105_v60 = vld [vmem:[#allocation3 + $0xe8] sm:$0xff] }
  0x96   :  { %1519 = vmatmul.mubr.bf16.gmra.mrb[24].mxu0 %v8963_v12  ;;  %510 = vst [vmem:[#allocation2 + $0x84] sm:$0xf] %v6519_v4  ;;  %511 = vst [vmem:[#allocation2 + $0x88] sm:$0xf] %v6520_v46  ;;  %v6522_v28 = vcombine.low %v282_v61, %v282_v61  ;;  %v6523_v29 = vcombine.high %v282_v61, %v282_v61  ;;  %v9029_v33 = vcombine.low %v970_v6, %v980_v19 }
  0x97   :  { %515 = vst [vmem:[#allocation2 + $0x98] sm:$0x1] %v6524_v24  ;;  %1526 = vmatprep.mubr.bf16.mxu0 %v9008_v16  ;;  %v558_v39 = vld [vmem:[#allocation2 + $0x78] sm:$0xf]  ;;  %v559_v43 = vld [vmem:[#allocation2 + $0x7c] sm:$0xf]  ;;  %v6527_v45 = vcombine.low %v299_v32, %v299_v32 }
  0x98   :  { %v218_v47 = vrot.slane %v216_v62, 7  ;;  %v560_v48 = vld [vmem:[#allocation2 + $0x80] sm:$0x1]  ;;  %v982_v51 = vshrl.u32 %v558_v39, 16  ;;  %v985_v53 = vshll.u32 %v558_v39, 16  ;;  %v991_v25 = vshll.u32 %v559_v43, 16 }
  0x99   :  { %v995_v54 = vshrl.u32 %v559_v43, 16  ;;  %513 = vst [vmem:[#allocation2 + $0x90] sm:$0xf] %v6522_v28  ;;  %514 = vst [vmem:[#allocation2 + $0x94] sm:$0xf] %v6523_v29  ;;  %v1001_v38 = vshll.u32 %v560_v48, 16  ;;  %v9032_v26 = vcombine.low %v558_v39, %v559_v43  ;;  %v9046_v29 = vpack.c.bf16 %v105_v60, %v104_v13 }
  0x9a   :  { %v563_v20 = vld [vmem:[#allocation2 + $0x8c] sm:$0x1]  ;;  %v283_v44 = vsel %vm8788_vm4, 0, %v214_v30  ;;  %518 = vst [vmem:[#allocation2 + $0xa4] sm:$0x1] %v6527_v45  ;;  %v221_v41 = vor.u32 %v219_v27, %v218_v47  ;;  %v984_v55 = vrot.slane %v982_v51, 4 }
  0x9b   :  { %v987_v35 = vrot.slane %v985_v53, 5  ;;  %v993_v37 = vrot.slane %v991_v25, 5  ;;  %v997_v59 = vrot.slane %v995_v54, 4  ;;  %v1003_v49 = vrot.slane %v1001_v38, 5 }
  0x9c   :  { %v1025_v56 = vshll.u32 %v563_v20, 16  ;;  %v6525_v1 = vcombine.low %v283_v44, %v283_v44  ;;  %v6526_v2 = vcombine.high %v283_v44, %v283_v44  ;;  %v284_v7 = vsel %vm8788_vm4, 0, %v221_v41  ;;  %2001 = vmatmul.mubr.bf16.gmra.mrb[32].mxu1 %v8982_v42 }
  0x9d   :  { %v988_v57 = vor.u32 %v987_v35, %v984_v55  ;;  %v998_v3 = vor.u32 %v997_v59, %v993_v37  ;;  %v300_v8 = vsel %vm8788_vm4, %v218_v47, 0  ;;  %v561_v6 = vld [vmem:[#allocation2 + $0x84] sm:$0xf]  ;;  %v562_v14 = vld [vmem:[#allocation2 + $0x88] sm:$0xf]  ;;  %v6528_v21 = vcombine.low %v284_v7, %v284_v7  ;;  %2008 = vmatprep.mubr.bf16.mxu1 %v9032_v26 }
  0x9e   :  { %v9040_v19 = vrot.slane %v1025_v56, 5  ;;  %516 = vst [vmem:[#allocation2 + $0x9c] sm:$0xf] %v6525_v1  ;;  %517 = vst [vmem:[#allocation2 + $0xa0] sm:$0xf] %v6526_v2  ;;  %v6529_v22 = vcombine.high %v284_v7, %v284_v7  ;;  %v6530_v5 = vcombine.low %v300_v8, %v300_v8  ;;  %1527 = vmatmul.mubr.bf16.gmra.mrb[28].mxu0 %v8980_v40  ;;  %v1006_v24 = vshrl.u32 %v561_v6, 16 }
  0x9f   :  { %v989_v4 = vrot.slane %v988_v57, 4  ;;  %v999_v46 = vrot.slane %v998_v3, 4  ;;  %v1009_v11 = vshll.u32 %v561_v6, 16  ;;  %1534 = vmatprep.mubr.bf16.mxu0 %v9029_v33  ;;  %v1015_v61 = vshll.u32 %v562_v14, 16  ;;  %519 = vst [vmem:[#allocation2 + $0xa8] sm:$0xf] %v6528_v21 }
  0xa0   :  { %v1019_v62 = vshrl.u32 %v562_v14, 16  ;;  %v564_v27 = vld [vmem:[#allocation2 + $0x90] sm:$0xf]  ;;  %v565_v28 = vld [vmem:[#allocation2 + $0x94] sm:$0xf]  ;;  %v1008_v39 = vrot.slane %v1006_v24, 4  ;;  %v9052_v51 = vcombine.low %v561_v6, %v562_v14 }
  0xa1   :  { %520 = vst [vmem:[#allocation2 + $0xac] sm:$0xf] %v6529_v22  ;;  %521 = vst [vmem:[#allocation2 + $0xb0] sm:$0x1] %v6530_v5  ;;  %v994_v30 = vsel %vm8798_vm5, %v989_v4, %v993_v37  ;;  %v1004_v32 = vsel %vm8798_vm5, %v999_v46, %v1003_v49  ;;  %v1011_v43 = vrot.slane %v1009_v11, 5  ;;  %v1017_v47 = vrot.slane %v1015_v61, 5 }
  0xa2   :  { %v566_v45 = vld [vmem:[#allocation2 + $0x98] sm:$0x1]  ;;  %v1021_v48 = vrot.slane %v1019_v62, 4  ;;  %v1030_v53 = vshrl.u32 %v564_v27, 16  ;;  %v1033_v54 = vshll.u32 %v564_v27, 16  ;;  %v1039_v38 = vshll.u32 %v565_v28, 16 }
  0xa3   :  { %v1012_v25 = vor.u32 %v1011_v43, %v1008_v39  ;;  %v1043_v20 = vshrl.u32 %v565_v28, 16  ;;  %v9054_v44 = vcombine.low %v994_v30, %v1004_v32  ;;  %v1049_v35 = vshll.u32 %v566_v45, 16  ;;  %v106_v14 = vld [vmem:[#allocation3 + $0xf0] sm:$0xff]  ;;  %v107_v21 = vld [vmem:[#allocation3 + $0xf8] sm:$0xff]  ;;  %v9072_v62 = vld [vmem:[#allocation2 + $0xa4] sm:$0x1] }
  0xa4   :  { %v1022_v41 = vor.u32 %v1021_v48, %v1017_v47  ;;  %v1032_v55 = vrot.slane %v1030_v53, 4  ;;  %v1035_v59 = vrot.slane %v1033_v54, 5  ;;  %v1041_v49 = vrot.slane %v1039_v38, 5  ;;  %2009 = vmatmul.mubr.bf16.gmra.mrb[36].mxu1 %v9014_v17 }
  0xa5   :  { %v1013_v37 = vrot.slane %v1012_v25, 4  ;;  %v1045_v56 = vrot.slane %v1043_v20, 4  ;;  %v567_v1 = vld [vmem:[#allocation2 + $0x9c] sm:$0xf]  ;;  %v9056_v57 = vld [vmem:[#allocation2 + $0xa0] sm:$0xf]  ;;  %2016 = vmatprep.mubr.bf16.mxu1 %v9052_v51  ;;  %v9076_v43 = vcombine.low %v564_v27, %v565_v28 }
  0xa6   :  { %v1023_v2 = vrot.slane %v1022_v41, 4  ;;  %1535 = vmatmul.mubr.bf16.gmra.mrb[32].mxu0 %v9008_v16  ;;  %v1036_v3 = vor.u32 %v1035_v59, %v1032_v55  ;;  %v1054_v8 = vshrl.u32 %v567_v1, 16  ;;  %v1057_v13 = vshll.u32 %v567_v1, 16  ;;  %v9070_v24 = vld [vmem:[#allocation2 + $0xa8] sm:$0xf] }
  0xa7   :  { %v1046_v7 = vor.u32 %v1045_v56, %v1041_v49  ;;  %1542 = vmatprep.mubr.bf16.mxu0 %v9054_v44  ;;  %v1051_v60 = vrot.slane %v1049_v35, 5  ;;  %v223_v6 = vshrl.u32 %v9046_v29, 16  ;;  %v1018_v22 = vsel %vm8798_vm5, %v1013_v37, %v1017_v47 }
  0xa8   :  { %v1028_v5 = vsel %vm8798_vm5, %v1023_v2, %v9040_v19  ;;  %v1063_v4 = vshll.u32 %v9056_v57, 16  ;;  %v1067_v46 = vshrl.u32 %v9056_v57, 16  ;;  %v1037_v11 = vrot.slane %v1036_v3, 4  ;;  %v9078_v45 = vld [vmem:[#allocation2 + $0xac] sm:$0xf] }
  0xa9   :  { %v1047_v61 = vrot.slane %v1046_v7, 4  ;;  %v1056_v30 = vrot.slane %v1054_v8, 4  ;;  %v1059_v32 = vrot.slane %v1057_v13, 5  ;;  %v9074_v39 = vcombine.low %v1018_v22, %v1028_v5  ;;  %v9101_v8 = vld [vmem:[#allocation2 + $0xb0] sm:$0x1] }
  0xaa   :  { %v123_v47 = vpack.c.bf16 %v107_v21, %v106_v14  ;;  %v1065_v19 = vrot.slane %v1063_v4, 5  ;;  %v1069_v48 = vrot.slane %v1067_v46, 4  ;;  %v1078_v53 = vshrl.u32 %v9070_v24, 16 }
  0xab   :  { %v225_v25 = vrot.slane %v223_v6, 7  ;;  %v1042_v54 = vsel %vm8798_vm5, %v1037_v11, %v1041_v49  ;;  %v1052_v38 = vsel %vm8798_vm5, %v1047_v61, %v1051_v60  ;;  %v1081_v20 = vshll.u32 %v9070_v24, 16 }
  0xac   :  { %2017 = vmatmul.mubr.bf16.gmra.mrb[40].mxu1 %v9032_v26  ;;  %v1060_v27 = vor.u32 %v1059_v32, %v1056_v30  ;;  %v1087_v28 = vshll.u32 %v9078_v45, 16  ;;  %v1091_v41 = vshrl.u32 %v9078_v45, 16  ;;  %v226_v55 = vshll.u32 %v9046_v29, 16 }
  0xad   :  { %2024 = vmatprep.mubr.bf16.mxu1 %v9076_v43  ;;  %v1073_v35 = vshll.u32 %v9072_v62, 16  ;;  %v9095_v37 = vcombine.low %v567_v1, %v9056_v57  ;;  %v301_v59 = vsel %vm8788_vm4, %v225_v25, 0  ;;  %v230_v49 = vshrl.u32 %v123_v47, 16 }
  0xae   :  { %1543 = vmatmul.mubr.bf16.gmra.mrb[36].mxu0 %v9029_v33  ;;  %v9099_v56 = vcombine.low %v1042_v54, %v1052_v38  ;;  %v1070_v2 = vor.u32 %v1069_v48, %v1065_v19  ;;  %v1080_v3 = vrot.slane %v1078_v53, 4  ;;  %v228_v7 = vor.u32 %v226_v55, %v225_v25 }
  0xaf   :  { %1550 = vmatprep.mubr.bf16.mxu0 %v9074_v39  ;;  %v1083_v29 = vrot.slane %v1081_v20, 5  ;;  %v6533_v13 = vcombine.low %v301_v59, %v301_v59  ;;  %v232_v60 = vrot.slane %v230_v49, 7  ;;  %v233_v6 = vshll.u32 %v123_v47, 16 }
  0xb0   :  { %v1061_v14 = vrot.slane %v1060_v27, 4  ;;  %v1089_v21 = vrot.slane %v1087_v28, 5  ;;  %v1093_v22 = vrot.slane %v1091_v41, 4  ;;  %v285_v1 = vsel %vm8788_vm4, 0, %v228_v7 }
  0xb1   :  { %v6531_v5 = vcombine.low %v285_v1, %v285_v1  ;;  %v6532_v4 = vcombine.high %v285_v1, %v285_v1  ;;  %524 = vst [vmem:[#allocation2 + $0xbc] sm:$0x1] %v6533_v13  ;;  %v235_v46 = vor.u32 %v233_v6, %v232_v60  ;;  %v302_v11 = vsel %vm8788_vm4, %v232_v60, 0 }
  0xb2   :  { %v1071_v61 = vrot.slane %v1070_v2, 4  ;;  %v1075_v30 = vrot.slane %v1073_v35, 5  ;;  %v6536_v32 = vcombine.low %v302_v11, %v302_v11  ;;  %v1084_v48 = vor.u32 %v1083_v29, %v1080_v3 }
  0xb3   :  { %522 = vst [vmem:[#allocation2 + $0xb4] sm:$0xf] %v6531_v5  ;;  %523 = vst [vmem:[#allocation2 + $0xb8] sm:$0xf] %v6532_v4  ;;  %v286_v47 = vsel %vm8788_vm4, 0, %v235_v46  ;;  %v1094_v53 = vor.u32 %v1093_v22, %v1089_v21  ;;  %v1097_v25 = vshll.u32 %v9101_v8, 16  ;;  %v1066_v20 = vsel %vm8798_vm5, %v1061_v14, %v1065_v19 }
  0xb4   :  { %2025 = vmatmul.mubr.bf16.gmra.mrb[44].mxu1 %v9052_v51  ;;  %v6534_v54 = vcombine.low %v286_v47, %v286_v47  ;;  %v6535_v38 = vcombine.high %v286_v47, %v286_v47  ;;  %527 = vst [vmem:[#allocation2 + $0xc8] sm:$0x1] %v6536_v32  ;;  %v1076_v27 = vsel %vm8798_vm5, %v1071_v61, %v1075_v30  ;;  %v1085_v28 = vrot.slane %v1084_v48, 4 }
  0xb5   :  { %2032 = vmatprep.mubr.bf16.mxu1 %v9095_v37  ;;  %v1095_v41 = vrot.slane %v1094_v53, 4  ;;  %v1099_v55 = vrot.slane %v1097_v25, 5  ;;  %v9118_v35 = vcombine.low %v1066_v20, %v1076_v27  ;;  %v9122_v59 = vcombine.low %v9070_v24, %v9078_v45 }
  0xb6   :  { %1551 = vmatmul.mubr.bf16.gmra.mrb[40].mxu0 %v9054_v44  ;;  %525 = vst [vmem:[#allocation2 + $0xc0] sm:$0xf] %v6534_v54  ;;  %526 = vst [vmem:[#allocation2 + $0xc4] sm:$0xf] %v6535_v38  ;;  %v1090_v24 = vsel %vm8798_vm5, %v1085_v28, %v1089_v21 }
  0xb7   :  { %1558 = vmatprep.mubr.bf16.mxu0 %v9099_v56  ;;  %v1100_v60 = vsel %vm8798_vm5, %v1095_v41, %v1099_v55 }
  0xb8   :  { %v9124_v49 = vld [vmem:[#allocation2 + $0xbc] sm:$0x1]  ;;  %v9151_v47 = vcombine.low %v1090_v24, %v1100_v60 }
  0xb9   :  { %v1121_v6 = vshll.u32 %v9124_v49, 16 }
  0xba   :  { %v9126_v2 = vld [vmem:[#allocation2 + $0xb4] sm:$0xf]  ;;  %v9128_v3 = vld [vmem:[#allocation2 + $0xb8] sm:$0xf] }
  0xbb   :  { %v1102_v19 = vshrl.u32 %v9126_v2, 16  ;;  %v1105_v7 = vshll.u32 %v9126_v2, 16  ;;  %v1111_v29 = vshll.u32 %v9128_v3, 16  ;;  %v1115_v13 = vshrl.u32 %v9128_v3, 16  ;;  %v9157_v54 = vld [vmem:[#allocation2 + $0xc8] sm:$0x1] }
  0xbc   :  { %2033 = vmatmul.mubr.bf16.gmra.mrb[48].mxu1 %v9076_v43  ;;  %v1123_v53 = vrot.slane %v1121_v6, 5  ;;  %v9155_v25 = vcombine.low %v9126_v2, %v9128_v3 }
  0xbd   :  { %2040 = vmatprep.mubr.bf16.mxu1 %v9122_v59  ;;  %v1104_v14 = vrot.slane %v1102_v19, 4  ;;  %v1107_v22 = vrot.slane %v1105_v7, 5  ;;  %v1113_v1 = vrot.slane %v1111_v29, 5  ;;  %v1117_v5 = vrot.slane %v1115_v13, 4  ;;  %v9143_v4 = vld [vmem:[#allocation2 + $0xc0] sm:$0xf] }
  0xbe   :  { %1559 = vmatmul.mubr.bf16.gmra.mrb[44].mxu0 %v9074_v39  ;;  %v9145_v46 = vld [vmem:[#allocation2 + $0xc4] sm:$0xf]  ;;  %v1126_v11 = vshrl.u32 %v9143_v4, 16  ;;  %v1129_v21 = vshll.u32 %v9143_v4, 16  ;;  %v1145_v19 = vshll.u32 %v9157_v54, 16 }
  0xbf   :  { %1566 = vmatprep.mubr.bf16.mxu0 %v9118_v35  ;;  %v1108_v61 = vor.u32 %v1107_v22, %v1104_v14  ;;  %v1118_v30 = vor.u32 %v1117_v5, %v1113_v1  ;;  %v1135_v32 = vshll.u32 %v9145_v46, 16  ;;  %v1139_v48 = vshrl.u32 %v9145_v46, 16 }
  0xc0   :  { %v1128_v27 = vrot.slane %v1126_v11, 4  ;;  %v1131_v28 = vrot.slane %v1129_v21, 5  ;;  %v1147_v6 = vrot.slane %v1145_v19, 5  ;;  %v9172_v14 = vcombine.low %v9143_v4, %v9145_v46  ;;  %v9221_v19 = vld [vmem:[#allocation2 + $0xd4] sm:$0x1] }
  0xc1   :  { %v1109_v38 = vrot.slane %v1108_v61, 4  ;;  %v1119_v20 = vrot.slane %v1118_v30, 4  ;;  %v1137_v41 = vrot.slane %v1135_v32, 5  ;;  %v1141_v55 = vrot.slane %v1139_v48, 4  ;;  %v8384_v61 = vld [vmem:[#allocation6 + $0x208] sm:$0xff]   ;;  %v8386_v30 = vld [vmem:[#allocation6 + $0x210] sm:$0xff]  }
  0xc2   :  { %v1132_v13 = vor.u32 %v1131_v28, %v1128_v27  ;;  %v8374_v32 = vld [vmem:[#allocation6 + $0x180] sm:$0xff]   ;;  %v8375_v48 = vld [vmem:[#allocation6 + $0x1c8] sm:$0xff]   ;;  %v8394_v27 = vld [vmem:[#allocation6 + $0x1f8] sm:$0xff]  }
  0xc3   :  { %v1114_v7 = vsel %vm8798_vm5, %v1109_v38, %v1113_v1  ;;  %v1124_v29 = vsel %vm8798_vm5, %v1119_v20, %v1123_v53  ;;  %v1142_v24 = vor.u32 %v1141_v55, %v1137_v41  ;;  %v8388_v53 = vld [vmem:[#allocation6 + $0x218] sm:$0xff]   ;;  %v8376_v38 = vld [vmem:[#allocation6 + $0x188] sm:$0xff]  }
  0xc4   :  { %2041 = vmatmul.mubr.bf16.gmra.mrb[52].mxu1 %v9095_v37  ;;  %v9168_v60 = vcombine.low %v1114_v7, %v1124_v29  ;;  %v1133_v22 = vrot.slane %v1132_v13, 4  ;;  %v8392_v20 = vld [vmem:[#allocation6 + $0x228] sm:$0xff]  }
  0xc5   :  { %2048 = vmatprep.mubr.bf16.mxu1 %v9155_v25  ;;  %v1143_v5 = vrot.slane %v1142_v24, 4  ;;  %v8494_v13 = vld [vmem:[#allocation2 + $0x20] sm:$0x1] }
  0xc6   :  { %1567 = vmatmul.mubr.bf16.gmra.mrb[48].mxu0 %v9099_v56  ;;  %v1138_v1 = vsel %vm8798_vm5, %v1133_v22, %v1137_v41  ;;  %v1169_v22 = vshll.u32 %v9221_v19, 16 }
  0xc7   :  { %1574 = vmatprep.mubr.bf16.mxu0 %v9151_v47  ;;  %v1148_v11 = vsel %vm8798_vm5, %v1143_v5, %v1147_v6  ;;  %v11426_v6 = vmov 0  ;;  %v8495_v5 = vld [vmem:[#allocation2 + $0x10] sm:$0xf] }
  0xc8   :  { %v9182_v21 = vcombine.low %v1138_v1, %v1148_v11  ;;  %v11427_v6 = vsel %vm9225_vm8, 4294967295, %v11426_v6  ;;  %v2254_v1 = vrot.slane %v8495_v5, 5 }
  0xc9   :  { %11428 = vst [vmem:[#allocation15_spill] sm:$0xff] %v11427_v6 }
  0xcc   :  { %2049 = vmatmul.mubr.bf16.gmra.mrb[56].mxu1 %v9122_v59 }
  0xcd   :  { %2056 = vmatprep.mubr.bf16.mxu1 %v9172_v14 }
  0xce   :  { %1575 = vmatmul.mubr.bf16.gmra.mrb[52].mxu0 %v9118_v35 }
  0xcf   :  { %1582 = vmatprep.mubr.bf16.mxu0 %v9168_v60 }
  0xd4   :  { %2057 = vmatmul.mubr.bf16.gmra.mrb[60].mxu1 %v9155_v25 }
  0xd5   :  { %7755 = vmatprep.mubr.bf16.mxu1 %v8850_v36  ;;  %v8377_v36 = vld [vmem:[#allocation6 + $0x1d0] sm:$0xff]  }
  0xd6   :  { %1583 = vmatmul.mubr.bf16.gmra.mrb[56].mxu0 %v9151_v47 }
  0xd7   :  { %1590 = vmatprep.mubr.bf16.mxu0 %v9182_v21 }
  0xdc   :  { %7756 = vmatmul.mubr.bf16.vlgmr.msra.gmra.mrb[64].mxu1 %v8863_v10  ;;  %v8378_v10 = vld [vmem:[#allocation6 + $0x190] sm:$0xff]  }
  0xdd   :  { %7759 = vmatprep.mubr.bf16.mxu1 %v8878_v34  ;;  %7788 = vmatpush3.bf16.msra.mxu1 %v8960_v9  ;;  %v8390_v34 = vld [vmem:[#allocation6 + $0x220] sm:$0xff]   ;;  %v8380_v9 = vld [vmem:[#allocation6 + $0x198] sm:$0xff]  }
  0xde   :  { %1591 = vmatmul.mubr.bf16.gmra.mrb[60].mxu0 %v9168_v60  ;;  %7789 = vmatprep.subr.bf16.mxu1 %v8384_v61 }
  0xdf   :  { %7707 = vmatprep.mubr.bf16.mxu0 %v8873_v23  ;;  %v8379_v23 = vld [vmem:[#allocation6 + $0x1d8] sm:$0xff]  }
  0xe1   :  { %7790 = vmatpush3.bf16.msra.mxu1 %v8384_v61  ;;  %v8496_v61 = vld [vmem:[#allocation2 + $0x28] sm:$0xf] }
  0xe2   :  { %7791 = vmatprep.subr.bf16.mxu1 %v8386_v30 }
  0xe4   :  { %7760 = vmatmul.mubr.bf16.gmra.mrb[68].mxu1 %v8922_v31  ;;  %v8385_v31 = vld [vmem:[#allocation6 + $0x1e8] sm:$0xff]  }
  0xe5   :  { %7763 = vmatprep.mubr.bf16.mxu1 %v8940_v15  ;;  %7792 = vmatpush3.bf16.msra.mxu1 %v8386_v30  ;;  %v8395_v15 = vld [vmem:[#allocation6 + $0x230] sm:$0xff]   ;;  %v2268_v30 = vrot.slane %v8496_v61, 5 }
  0xe6   :  { %7708 = vmatmul.mubr.bf16.vlgmr.msra.gmra.mrb[64].mxu0 %v8887_v52  ;;  %7793 = vmatprep.subr.bf16.mxu1 %v8388_v53  ;;  %v8381_v52 = vld [vmem:[#allocation6 + $0x1e0] sm:$0xff]  }
  0xe7   :  { %7148 = vmatpush3.bf16.msra.mxu0 %v8374_v32  ;;  %7711 = vmatprep.mubr.bf16.mxu0 %v8904_v63  ;;  %v8383_v63 = vld [vmem:[#allocation6 + $0x1a0] sm:$0xff]  }
  0xe8   :  { %7149 = vmatprep.subr.bf16.mxu0 %v8375_v48  ;;  %v8497_v48 = vld [vmem:[#allocation2 + $0x34] sm:$0xf] }
  0xe9   :  { %7794 = vmatpush3.bf16.msra.mxu1 %v8388_v53  ;;  %v8498_v53 = vld [vmem:[#allocation2 + $0x2c] sm:$0x1] }
  0xea   :  { %7795 = vmatprep.subr.bf16.mxu1 %v8390_v34 }
  0xeb   :  { %7150 = vmatpush3.bf16.msra.mxu0 %v8376_v38  ;;  %v2271_v38 = vrot.slane %v8498_v53, 5  ;;  %v8511_v53 = vld [vmem:[#allocation2 + $0x48] sm:$0xf] }
  0xec   :  { %7151 = vmatprep.subr.bf16.mxu0 %v8377_v36  ;;  %7764 = vmatmul.mubr.bf16.gmra.mrb[72].mxu1 %v8948_v50  ;;  %v8389_v50 = vld [vmem:[#allocation6 + $0x1f0] sm:$0xff]  }
  0xed   :  { %7767 = vmatprep.mubr.bf16.mxu1 %v8982_v42  ;;  %7796 = vmatpush3.bf16.msra.mxu1 %v8390_v34  ;;  %v8391_v42 = vld [vmem:[#allocation6 + $0x1b0] sm:$0xff]   ;;  %v2256_v34 = vrot.slane %v2254_v1, 4 }
  0xee   :  { %7712 = vmatmul.mubr.bf16.gmra.mrb[68].mxu0 %v8943_v18  ;;  %7797 = vmatprep.subr.bf16.mxu1 %v8392_v20  ;;  %v8387_v18 = vld [vmem:[#allocation6 + $0x1a8] sm:$0xff]  }
  0xef   :  { %7715 = vmatprep.mubr.bf16.mxu0 %v8963_v12  ;;  %7152 = vmatpush3.bf16.msra.mxu0 %v8378_v10  ;;  %v8397_v12 = vld [vmem:[#allocation6 + $0x238] sm:$0xff]   ;;  %v1171_v10 = vrot.slane %v1169_v22, 5 }
  0xf0   :  { %7153 = vmatprep.subr.bf16.mxu0 %v8379_v23 }
  0xf1   :  { %7798 = vmatpush3.bf16.msra.mxu1 %v8392_v20 }
  0xf2   :  { %7799 = vmatprep.subr.bf16.mxu1 %v8395_v15 }
  0xf3   :  { %7154 = vmatpush3.bf16.msra.mxu0 %v8380_v9  ;;  %v8500_v9 = vld [vmem:[#allocation2 + $0x14] sm:$0x1] }
  0xf4   :  { %7155 = vmatprep.subr.bf16.mxu0 %v8381_v52  ;;  %7768 = vmatmul.mubr.bf16.gmra.mrb[76].mxu1 %v9014_v17  ;;  %v9211_v17 = vld [vmem:[#allocation2 + $0xd0] sm:$0xf]  ;;  %v2257_v20 = vrot.slane %v8500_v9, 5 }
  0xf5   :  { %7771 = vmatprep.mubr.bf16.mxu1 %v9032_v26  ;;  %7800 = vmatpush3.bf16.msra.mxu1 %v8395_v15 }
  0xf6   :  { %7716 = vmatmul.mubr.bf16.gmra.mrb[72].mxu0 %v8980_v40  ;;  %7801 = vmatprep.subr.bf16.mxu1 %v8397_v12  ;;  %v8396_v40 = vld [vmem:[#allocation6 + $0x1b8] sm:$0xff]  }
  0xf7   :  { %7719 = vmatprep.mubr.bf16.mxu0 %v9008_v16  ;;  %7156 = vmatpush3.bf16.msra.mxu0 %v8383_v63  ;;  %v9209_v16 = vld [vmem:[#allocation2 + $0xcc] sm:$0xf] }
  0xf8   :  { %7157 = vmatprep.subr.bf16.mxu0 %v8385_v31  ;;  %v1150_v26 = vshrl.u32 %v9209_v16, 16  ;;  %v1153_v28 = vshll.u32 %v9209_v16, 16  ;;  %v8501_v31 = vld [vmem:[#allocation2 + $0x24] sm:$0xf] }
  0xf9   :  { %7802 = vmatpush3.bf16.msra.mxu1 %v8397_v12  ;;  %v6624_v15 = vrot.slane %v8501_v31, 9 }
  0xfa   :  { %v1152_v41 = vrot.slane %v1150_v26, 4  ;;  %v1155_v55 = vrot.slane %v1153_v28, 5 }
  0xfb   :  { %7158 = vmatpush3.bf16.msra.mxu0 %v8387_v18  ;;  %v2270_v18 = vrot.slane %v2268_v30, 4 }
  0xfc   :  { %7159 = vmatprep.subr.bf16.mxu0 %v8389_v50  ;;  %7772 = vmatmul.mubr.bf16.gmra.mrb[80].mxu1 %v9052_v51  ;;  %v1163_v51 = vshrl.u32 %v9211_v17, 16  ;;  %v1156_v24 = vor.u32 %v1155_v55, %v1152_v41  ;;  %v8502_v50 = vld [vmem:[#allocation2 + $0x30] sm:$0xf]  ;;  %v8505_v55 = vld [vmem:[#allocation2 + $0x40] sm:$0xf] }
  0xfd   :  { %7775 = vmatprep.mubr.bf16.mxu1 %v9076_v43  ;;  %v6625_v12 = vrot.slane %v8502_v50, 9  ;;  %v2272_v41 = vsel %vm9225_vm8, %v2270_v18, %v2271_v38  ;;  %v6627_v38 = vrot.slane %v8511_v53, 9  ;;  %v8514_v18 = vld [vmem:[#allocation2 + $0x64] sm:$0xf] }
  0xfe   :  { %7720 = vmatmul.mubr.bf16.gmra.mrb[76].mxu0 %v9029_v33  ;;  %v1159_v33 = vshll.u32 %v9211_v17, 16  ;;  %v1157_v36 = vrot.slane %v1156_v24, 4  ;;  %v2303_v50 = vrot.slane %v8514_v18, 5  ;;  %v8527_v18 = vld [vmem:[#allocation2 + $0x84] sm:$0xf] }
  0xff   :  { %7723 = vmatprep.mubr.bf16.mxu0 %v9054_v44  ;;  %7160 = vmatpush3.bf16.msra.mxu0 %v8391_v42  ;;  %v8492_v44 = vld [vmem:[#allocation2 + $0x1c] sm:$0xf] }
 0x100   :  { %7161 = vmatprep.subr.bf16.mxu0 %v8394_v27  ;;  %v2261_v43 = vrot.slane %v8492_v44, 5  ;;  %v9223_v7 = vrot.slane %v1159_v33, 5  ;;  %v8503_v27 = vld [vmem:[#allocation2 + $0x38] sm:$0x1]  ;;  %v2258_v33 = vsel %vm9225_vm8, %v2256_v34, %v2257_v20 }
 0x101   :  { %v8513_v20 = vld [vmem:[#allocation2 + $0x58] sm:$0xf] }
 0x102   :  { %v1162_v26 = vsel %vm8798_vm5, %v1157_v36, %v9223_v7 }
 0x103   :  { %7162 = vmatpush3.bf16.msra.mxu0 %v8396_v40  ;;  %v2278_v40 = vrot.slane %v8503_v27, 5 }
 0x104   :  { %7776 = vmatmul.mubr.bf16.gmra.mrb[84].mxu1 %v9095_v37  ;;  %v8493_v37 = vld [vmem:[#allocation2 + $0x18] sm:$0xf] }
 0x105   :  { %7779 = vmatprep.mubr.bf16.mxu1 %v9122_v59  ;;  %v6623_v29 = vrot.slane %v8493_v37, 9  ;;  %v2264_v59 = vrot.slane %v8494_v13, 5 }
 0x106   :  { %7724 = vmatmul.mubr.bf16.gmra.mrb[80].mxu0 %v9074_v39  ;;  %v1165_v39 = vrot.slane %v1163_v51, 4  ;;  %v8504_v51 = vld [vmem:[#allocation2 + $0x4] sm:$0xf] }
 0x107   :  { %7727 = vmatprep.mubr.bf16.mxu0 %v9099_v56  ;;  %v2263_v56 = vrot.slane %v2261_v43, 4  ;;  %v2262_v32 = vsel %vm9225_vm8, %v6623_v29, %v2261_v43  ;;  %v2247_v44 = vrot.slane %v8504_v51, 5 }
 0x108   :  { %v1166_v11 = vor.u32 %v1165_v39, %v9223_v7  ;;  %v2282_v7 = vrot.slane %v8505_v55, 5 }
 0x10a   :  { %v1167_v52 = vrot.slane %v1166_v11, 4 }
 0x10c   :  { %7780 = vmatmul.mubr.bf16.gmra.mrb[88].mxu1 %v9155_v25  ;;  %v2275_v25 = vrot.slane %v8497_v48, 5  ;;  %v1172_v43 = vsel %vm8798_vm5, %v1167_v52, %v1171_v10  ;;  %v8510_v48 = vld [vmem:[#allocation2 + $0x44] sm:$0x1]  ;;  %v2296_v52 = vrot.slane %v8513_v20, 5  ;;  %v8526_v20 = vld [vmem:[#allocation2 + $0x94] sm:$0xf] }
 0x10d   :  { %7783 = vmatprep.mubr.bf16.mxu1 %v9172_v14  ;;  %v8499_v14 = vld [vmem:[#allocation2 + $0xc] sm:$0xf]  ;;  %v6572_v22 = vcombine.low %v1162_v26, %v1172_v43 }
 0x10e   :  { %7728 = vmatmul.mubr.bf16.gmra.mrb[84].mxu0 %v9118_v35  ;;  %v2265_v35 = vsel %vm9225_vm8, %v2263_v56, %v2264_v59  ;;  %v6622_v23 = vrot.slane %v8499_v14, 9  ;;  %v2277_v42 = vrot.slane %v2275_v25, 4  ;;  %v2276_v39 = vsel %vm9225_vm8, %v6625_v12, %v2275_v25  ;;  %v8507_v56 = vld [vmem:[#allocation2 + $0x8] sm:$0x1]  ;;  %v8508_v59 = vld [vmem:[#allocation2] sm:$0xf] }
 0x10f   :  { %7731 = vmatprep.mubr.bf16.mxu0 %v9151_v47  ;;  %v6554_v47 = vcombine.low %v9209_v16, %v9211_v17  ;;  %v9241_v63 = vcombine.low %v2262_v32, %v2265_v35  ;;  %v2250_v13 = vrot.slane %v8507_v56, 5  ;;  %v6621_v24 = vrot.slane %v8508_v59, 9 }
 0x110   :  { %v2255_v28 = vsel %vm9225_vm8, %v6622_v23, %v2254_v1  ;;  %v2279_v37 = vsel %vm9225_vm8, %v2277_v42, %v2278_v40  ;;  %v2249_v1 = vrot.slane %v2247_v44, 4  ;;  %v2284_v35 = vrot.slane %v2282_v7, 4  ;;  %v8515_v40 = vld [vmem:[#allocation2 + $0x54] sm:$0xf] }
 0x111   :  { %v9263_v5 = vcombine.low %v2255_v28, %v2258_v33  ;;  %v9267_v61 = vcombine.low %v2276_v39, %v2279_v37  ;;  %v2285_v25 = vrot.slane %v8510_v48, 5  ;;  %v2248_v14 = vsel %vm9225_vm8, %v6621_v24, %v2247_v44  ;;  %v8516_v33 = vld [vmem:[#allocation2 + $0x5c] sm:$0x1]  ;;  %v8517_v44 = vld [vmem:[#allocation2 + $0x60] sm:$0xf] }
 0x112   :  { %v2251_v23 = vsel %vm9225_vm8, %v2249_v1, %v2250_v13  ;;  %v6628_v26 = vrot.slane %v8515_v40, 9  ;;  %v2298_v28 = vrot.slane %v2296_v52, 4  ;;  %v2299_v51 = vrot.slane %v8516_v33, 5  ;;  %v8519_v37 = vld [vmem:[#allocation2 + $0x70] sm:$0xf] }
 0x113   :  { %v2286_v9 = vsel %vm9225_vm8, %v2284_v35, %v2285_v25  ;;  %v6639_v12 = vcombine.low %v2248_v14, %v2251_v23  ;;  %v6629_v43 = vrot.slane %v8517_v44, 9  ;;  %v8520_v13 = vld [vmem:[#allocation2 + $0x7c] sm:$0xf]  ;;  %v8521_v1 = vld [vmem:[#allocation2 + $0x6c] sm:$0xf] }
 0x114   :  { %7784 = vmatmul.mubr.bf16.gmra.mrb[92].mxu1 %v6554_v47  ;;  %v8512_v47 = vld [vmem:[#allocation2 + $0x50] sm:$0x1]  ;;  %v2300_v39 = vsel %vm9225_vm8, %v2298_v28, %v2299_v51  ;;  %v2317_v59 = vrot.slane %v8520_v13, 5  ;;  %v8522_v35 = vld [vmem:[#allocation2 + $0x74] sm:$0x1] }
 0x115   :  { %7803 = vmatprep.mubr.bf16.mxu1 %v9241_v63  ;;  %v2292_v10 = vrot.slane %v8512_v47, 5  ;;  %v2313_v48 = vrot.slane %v8522_v35, 5  ;;  %v8523_v25 = vld [vmem:[#allocation2 + $0x78] sm:$0xf]  ;;  %v8525_v23 = vld [vmem:[#allocation2 + $0x88] sm:$0xf] }
 0x116   :  { %7732 = vmatmul.mubr.bf16.gmra.mrb[88].mxu0 %v9168_v60  ;;  %v2269_v60 = vsel %vm9225_vm8, %v6624_v15, %v2268_v30  ;;  %v8509_v30 = vld [vmem:[#allocation2 + $0x3c] sm:$0xf]  ;;  %v6631_v53 = vrot.slane %v8523_v25, 9  ;;  %v8528_v28 = vld [vmem:[#allocation2 + $0x8c] sm:$0x1] }
 0x117   :  { %7735 = vmatprep.mubr.bf16.mxu0 %v9182_v21  ;;  %v8506_v21 = vld [vmem:[#allocation2 + $0x4c] sm:$0xf]  ;;  %v9265_v11 = vcombine.low %v2269_v60, %v2272_v41  ;;  %v6626_v32 = vrot.slane %v8509_v30, 9  ;;  %v2305_v60 = vrot.slane %v2303_v50, 4  ;;  %v8518_v41 = vld [vmem:[#allocation2 + $0x68] sm:$0x1] }
 0x118   :  { %v2289_v29 = vrot.slane %v8506_v21, 5  ;;  %v2306_v55 = vrot.slane %v8518_v41, 5  ;;  %v2310_v21 = vrot.slane %v8519_v37, 5  ;;  %v6630_v30 = vrot.slane %v8521_v1, 9  ;;  %v8531_v35 = vld [vmem:[#allocation2 + $0x9c] sm:$0xf] }
 0x119   :  { %v2283_v34 = vsel %vm9225_vm8, %v6626_v32, %v2282_v7  ;;  %v2297_v7 = vsel %vm9225_vm8, %v6628_v26, %v2296_v52  ;;  %v2331_v52 = vrot.slane %v8526_v20, 5  ;;  %v2327_v33 = vrot.slane %v8528_v28, 5 }
 0x11a   :  { %v2291_v36 = vrot.slane %v2289_v29, 4  ;;  %v2290_v31 = vsel %vm9225_vm8, %v6627_v38, %v2289_v29  ;;  %v9284_v42 = vcombine.low %v2283_v34, %v2286_v9  ;;  %v2304_v29 = vsel %vm9225_vm8, %v6629_v43, %v2303_v50  ;;  %v8529_v43 = vld [vmem:[#allocation2 + $0x90] sm:$0xf] }
 0x11b   :  { %v2307_v56 = vsel %vm9225_vm8, %v2305_v60, %v2306_v55  ;;  %v9299_v24 = vcombine.low %v2297_v7, %v2300_v39  ;;  %v2312_v32 = vrot.slane %v2310_v21, 4  ;;  %v2319_v38 = vrot.slane %v2317_v59, 4  ;;  %v8530_v55 = vld [vmem:[#allocation2 + $0x98] sm:$0x1] }
 0x11c   :  { %7804 = vmatmul.mubr.bf16.vlgmr.msra.gmra.mrb[64].mxu1 %v9265_v11  ;;  %v2293_v15 = vsel %vm9225_vm8, %v2291_v36, %v2292_v10  ;;  %v8524_v36 = vld [vmem:[#allocation2 + $0x80] sm:$0x1]  ;;  %v2311_v10 = vsel %vm9225_vm8, %v6630_v30, %v2310_v21  ;;  %v2324_v34 = vrot.slane %v8525_v23, 5  ;;  %v2318_v9 = vsel %vm9225_vm8, %v6631_v53, %v2317_v59 }
 0x11d   :  { %7807 = vmatprep.mubr.bf16.mxu1 %v9267_v61  ;;  %v9286_v27 = vcombine.low %v2290_v31, %v2293_v15  ;;  %v2320_v47 = vrot.slane %v8524_v36, 5  ;;  %v2314_v14 = vsel %vm9225_vm8, %v2312_v32, %v2313_v48  ;;  %v6632_v50 = vrot.slane %v8527_v18, 9 }
 0x11e   :  { %7736 = vmatmul.mubr.bf16.gmra.mrb[92].mxu0 %v6572_v22  ;;  %v9301_v22 = vcombine.low %v2304_v29, %v2307_v56  ;;  %v9315_v15 = vcombine.low %v2311_v10, %v2314_v14  ;;  %v2326_v26 = vrot.slane %v2324_v34, 4  ;;  %v6633_v60 = vrot.slane %v8529_v43, 9 }
 0x11f   :  { %2670 = vmatprep.mubr.bf16.mxu0 %v9263_v5  ;;  %v2333_v41 = vrot.slane %v2331_v52, 4  ;;  %v2334_v7 = vrot.slane %v8530_v55, 5  ;;  %v2338_v21 = vrot.slane %v9056_v57, 5  ;;  %v2325_v29 = vsel %vm9225_vm8, %v6632_v50, %v2324_v34  ;;  %v8532_v34 = vld [vmem:[#allocation2 + $0xa8] sm:$0xf] }
 0x120   :  { %v2328_v56 = vsel %vm9225_vm8, %v2326_v26, %v2327_v33  ;;  %v2332_v13 = vsel %vm9225_vm8, %v6633_v60, %v2331_v52  ;;  %v2345_v59 = vrot.slane %v9078_v45, 5  ;;  %v6634_v48 = vrot.slane %v8531_v35, 9 }
 0x121   :  { %v9337_v32 = vcombine.low %v2325_v29, %v2328_v56  ;;  %v2340_v25 = vrot.slane %v2338_v21, 4  ;;  %v2348_v20 = vrot.slane %v9101_v8, 5  ;;  %v2352_v8 = vrot.slane %v9128_v3, 5 }
 0x122   :  { %v2360_v26 = vrot.slane %v9145_v46, 5  ;;  %v6636_v60 = vrot.slane %v9126_v2, 9 }
 0x124   :  { %7808 = vmatmul.mubr.bf16.gmra.mrb[68].mxu1 %v9284_v42 }
 0x125   :  { %7811 = vmatprep.mubr.bf16.mxu1 %v9286_v27 }
 0x126   :  { %2671 = vmatmul.mubr.bf16.vlgmr.msra.gmra.mrb[96].mxu0 %v6639_v12 }
 0x127   :  { %2678 = vmatprep.mubr.bf16.mxu0 %v9241_v63 }
 0x12c   :  { %7812 = vmatmul.mubr.bf16.gmra.mrb[72].mxu1 %v9299_v24 }
 0x12d   :  { %7815 = vmatprep.mubr.bf16.mxu1 %v9301_v22 }
 0x12e   :  { %2679 = vmatmul.mubr.bf16.gmra.mrb[100].mxu0 %v9263_v5  ;;  %v2321_v5 = vsel %vm9225_vm8, %v2319_v38, %v2320_v47  ;;  %v2341_v47 = vrot.slane %v9072_v62, 5  ;;  %v2339_v62 = vsel %vm9225_vm8, %v6634_v48, %v2338_v21 }
 0x12f   :  { %2686 = vmatprep.mubr.bf16.mxu0 %v9265_v11  ;;  %v7027_v31 = vpop.f32.mrb[0].mxu1  ;;  %v9317_v40 = vcombine.low %v2318_v9, %v2321_v5  ;;  %v6635_v9 = vrot.slane %v8532_v34, 9  ;;  %v2347_v5 = vrot.slane %v2345_v59, 4  ;;  %v2371_v34 = vrot.slane %v9221_v19, 5 }
 0x130   :  { %v7028_v12 = vpop.f32.mrb[1].mxu1  ;;  %v2342_v50 = vsel %vm9225_vm8, %v2340_v25, %v2341_v47 }
 0x131   :  { %v9319_v51 = vadd.f32 %v7028_v12, %v7027_v31  ;;  %v7030_v44 = vpop.f32.mrb[2].mxu1  ;;  %v2346_v12 = vsel %vm9225_vm8, %v6635_v9, %v2345_v59  ;;  %v9365_v43 = vcombine.low %v2339_v62, %v2342_v50  ;;  %v2363_v59 = vrot.slane %v9157_v54, 5 }
 0x132   :  { %v7031_v39 = vpop.f32.mrb[3].mxu1 }
 0x133   :  { %v9321_v37 = vadd.f32 %v7031_v39, %v7030_v44  ;;  %v2354_v39 = vrot.slane %v2352_v8, 4 }
 0x134   :  { %7816 = vmatmul.mubr.bf16.gmra.mrb[76].mxu1 %v9315_v15 }
 0x135   :  { %7819 = vmatprep.mubr.bf16.mxu1 %v9317_v40 }
 0x136   :  { %2687 = vmatmul.mubr.bf16.gmra.mrb[104].mxu0 %v9241_v63  ;;  %v2335_v63 = vsel %vm9225_vm8, %v2333_v41, %v2334_v7  ;;  %v2355_v41 = vrot.slane %v9124_v49, 5 }
 0x137   :  { %2694 = vmatprep.mubr.bf16.mxu0 %v9267_v61  ;;  %v7033_v57 = vpop.f32.mrb[4].mxu1  ;;  %v9339_v36 = vcombine.low %v2332_v13, %v2335_v63  ;;  %v6637_v13 = vrot.slane %v9143_v4, 9  ;;  %v2362_v63 = vrot.slane %v2360_v26, 4  ;;  %v2353_v4 = vsel %vm9225_vm8, %v6636_v60, %v2352_v8 }
 0x138   :  { %v7034_v53 = vpop.f32.mrb[5].mxu1  ;;  %v2356_v54 = vsel %vm9225_vm8, %v2354_v39, %v2355_v41 }
 0x139   :  { %v6891_v1 = vpop.f32.mrb[0].mxu0  ;;  %v9342_v10 = vadd.f32 %v7034_v53, %v7033_v57  ;;  %v7036_v14 = vpop.f32.mrb[6].mxu1  ;;  %v2368_v57 = vrot.slane %v9211_v17, 5  ;;  %v9394_v17 = vcombine.low %v2353_v4, %v2356_v54  ;;  %v6638_v53 = vrot.slane %v9209_v16, 9 }
 0x13a   :  { %v6892_v30 = vpop.f32.mrb[1].mxu0  ;;  %v7037_v52 = vpop.f32.mrb[7].mxu1 }
 0x13b   :  { %v6894_v38 = vpop.f32.mrb[2].mxu0  ;;  %v9344_v23 = vadd.f32 %v6892_v30, %v6891_v1  ;;  %v9347_v31 = vadd.f32 %v7037_v52, %v7036_v14  ;;  %v2361_v30 = vsel %vm9225_vm8, %v6637_v13, %v2360_v26  ;;  %v2369_v16 = vsel %vm9225_vm8, %v6638_v53, %v2368_v57 }
 0x13c   :  { %v6895_v45 = vpop.f32.mrb[3].mxu0  ;;  %7820 = vmatmul.mubr.bf16.gmra.mrb[80].mxu1 %v9337_v32 }
 0x13d   :  { %v9349_v18 = vadd.f32 %v6895_v45, %v6894_v38  ;;  %7823 = vmatprep.mubr.bf16.mxu1 %v9339_v36  ;;  %v2370_v38 = vrot.slane %v2368_v57, 4 }
 0x13e   :  { %2695 = vmatmul.mubr.bf16.gmra.mrb[108].mxu0 %v9265_v11  ;;  %v2349_v11 = vsel %vm9225_vm8, %v2347_v5, %v2348_v20 }
 0x13f   :  { %2702 = vmatprep.mubr.bf16.mxu0 %v9284_v42  ;;  %v7039_v33 = vpop.f32.mrb[8].mxu1  ;;  %v9369_v3 = vcombine.low %v2346_v12, %v2349_v11  ;;  %v2372_v19 = vsel %vm9225_vm8, %v2370_v38, %v2371_v34 }
 0x140   :  { %v7040_v55 = vpop.f32.mrb[9].mxu1 }
 0x141   :  { %v6897_v28 = vpop.f32.mrb[4].mxu0  ;;  %v9371_v21 = vadd.f32 %v7040_v55, %v7039_v33  ;;  %v7042_v29 = vpop.f32.mrb[10].mxu1 }
 0x142   :  { %v6898_v44 = vpop.f32.mrb[5].mxu0  ;;  %v7043_v1 = vpop.f32.mrb[11].mxu1 }
 0x143   :  { %v6900_v7 = vpop.f32.mrb[6].mxu0  ;;  %v9373_v56 = vadd.f32 %v6898_v44, %v6897_v28  ;;  %v9377_v2 = vadd.f32 %v7043_v1, %v7042_v29  ;;  %v6656_v28 = vcombine.low %v2369_v16, %v2372_v19 }
 0x144   :  { %v6901_v46 = vpop.f32.mrb[7].mxu0  ;;  %7824 = vmatmul.mubr.bf16.gmra.mrb[84].mxu1 %v9365_v43 }
 0x145   :  { %v9379_v49 = vadd.f32 %v6901_v46, %v6900_v7  ;;  %7827 = vmatprep.mubr.bf16.mxu1 %v9369_v3 }
 0x146   :  { %2703 = vmatmul.mubr.bf16.gmra.mrb[112].mxu0 %v9267_v61  ;;  %v2364_v61 = vsel %vm9225_vm8, %v2362_v63, %v2363_v59 }
 0x147   :  { %2710 = vmatprep.mubr.bf16.mxu0 %v9286_v27  ;;  %v7045_v48 = vpop.f32.mrb[12].mxu1  ;;  %v9397_v45 = vcombine.low %v2361_v30, %v2364_v61 }
 0x148   :  { %v7046_v47 = vpop.f32.mrb[13].mxu1 }
 0x149   :  { %v6903_v35 = vpop.f32.mrb[8].mxu0  ;;  %v9400_v9 = vadd.f32 %v7046_v47, %v7045_v48  ;;  %v7048_v5 = vpop.f32.mrb[14].mxu1 }
 0x14a   :  { %v6904_v25 = vpop.f32.mrb[9].mxu0  ;;  %v7049_v62 = vpop.f32.mrb[15].mxu1 }
 0x14b   :  { %v6906_v14 = vpop.f32.mrb[10].mxu0  ;;  %v9402_v20 = vadd.f32 %v6904_v25, %v6903_v35  ;;  %v9404_v50 = vadd.f32 %v7049_v62, %v7048_v5 }
 0x14c   :  { %v6907_v52 = vpop.f32.mrb[11].mxu0  ;;  %7828 = vmatmul.mubr.bf16.gmra.mrb[88].mxu1 %v9394_v17 }
 0x14d   :  { %v9406_v8 = vadd.f32 %v6907_v52, %v6906_v14  ;;  %7831 = vmatprep.mubr.bf16.mxu1 %v9397_v45 }
 0x14e   :  { %2711 = vmatmul.mubr.bf16.gmra.mrb[116].mxu0 %v9284_v42 }
 0x14f   :  { %2718 = vmatprep.mubr.bf16.mxu0 %v9299_v24  ;;  %v7051_v11 = vpop.f32.mrb[16].mxu1 }
 0x150   :  { %v7052_v33 = vpop.f32.mrb[17].mxu1 }
 0x151   :  { %v6909_v12 = vpop.f32.mrb[12].mxu0  ;;  %v9416_v60 = vadd.f32 %v7052_v33, %v7051_v11  ;;  %v7054_v42 = vpop.f32.mrb[18].mxu1 }
 0x152   :  { %v6910_v26 = vpop.f32.mrb[13].mxu0  ;;  %v7055_v7 = vpop.f32.mrb[19].mxu1 }
 0x153   :  { %v6912_v44 = vpop.f32.mrb[14].mxu0  ;;  %v9418_v41 = vadd.f32 %v6910_v26, %v6909_v12  ;;  %v9420_v39 = vadd.f32 %v7055_v7, %v7054_v42 }
 0x154   :  { %v6913_v55 = vpop.f32.mrb[15].mxu0  ;;  %7832 = vmatmul.mubr.bf16.gmra.mrb[92].mxu1 %v6656_v28 }
 0x155   :  { %v9422_v29 = vadd.f32 %v6913_v55, %v6912_v44 }
 0x156   :  { %2719 = vmatmul.mubr.bf16.gmra.mrb[120].mxu0 %v9286_v27 }
 0x157   :  { %2726 = vmatprep.mubr.bf16.mxu0 %v9301_v22  ;;  %v7057_v13 = vpop.f32.mrb[20].mxu1 }
 0x158   :  { %v7058_v59 = vpop.f32.mrb[21].mxu1 }
 0x159   :  { %v6915_v46 = vpop.f32.mrb[16].mxu0  ;;  %v9426_v57 = vadd.f32 %v7058_v59, %v7057_v13  ;;  %v7060_v4 = vpop.f32.mrb[22].mxu1 }
 0x15a   :  { %v6916_v63 = vpop.f32.mrb[17].mxu0  ;;  %v7061_v61 = vpop.f32.mrb[23].mxu1 }
 0x15b   :  { %v6918_v1 = vpop.f32.mrb[18].mxu0  ;;  %v9428_v54 = vadd.f32 %v6916_v63, %v6915_v46  ;;  %v9430_v35 = vadd.f32 %v7061_v61, %v7060_v4 }
 0x15c   :  { %v6919_v30 = vpop.f32.mrb[19].mxu0 }
 0x15d   :  { %v9432_v48 = vadd.f32 %v6919_v30, %v6918_v1 }
 0x15e   :  { %2727 = vmatmul.mubr.bf16.gmra.mrb[124].mxu0 %v9299_v24 }
 0x15f   :  { %2734 = vmatprep.mubr.bf16.mxu0 %v9315_v15  ;;  %v7063_v25 = vpop.f32.mrb[24].mxu1 }
 0x160   :  { %v7064_v38 = vpop.f32.mrb[25].mxu1 }
 0x161   :  { %v6921_v27 = vpop.f32.mrb[20].mxu0  ;;  %v9436_v14 = vadd.f32 %v7064_v38, %v7063_v25  ;;  %v7066_v34 = vpop.f32.mrb[26].mxu1 }
 0x162   :  { %v6922_v53 = vpop.f32.mrb[21].mxu0  ;;  %v7067_v62 = vpop.f32.mrb[27].mxu1 }
 0x163   :  { %v6924_v47 = vpop.f32.mrb[22].mxu0  ;;  %v9438_v5 = vadd.f32 %v6922_v53, %v6921_v27  ;;  %v9440_v16 = vadd.f32 %v7067_v62, %v7066_v34 }
 0x164   :  { %v6925_v52 = vpop.f32.mrb[23].mxu0 }
 0x165   :  { %v9442_v19 = vadd.f32 %v6925_v52, %v6924_v47 }
 0x166   :  { %2735 = vmatmul.mubr.bf16.gmra.mrb[128].mxu0 %v9301_v22 }
 0x167   :  { %2742 = vmatprep.mubr.bf16.mxu0 %v9317_v40  ;;  %v7069_v12 = vpop.f32.mrb[28].mxu1 }
 0x168   :  { %v7070_v26 = vpop.f32.mrb[29].mxu1 }
 0x169   :  { %v6927_v24 = vpop.f32.mrb[24].mxu0  ;;  %v9446_v33 = vadd.f32 %v7070_v26, %v7069_v12  ;;  %v7072_v44 = vpop.f32.mrb[30].mxu1 }
 0x16a   :  { %v6928_v11 = vpop.f32.mrb[25].mxu0  ;;  %v7073_v7 = vpop.f32.mrb[31].mxu1 }
 0x16b   :  { %v6930_v28 = vpop.f32.mrb[26].mxu0  ;;  %v9448_v42 = vadd.f32 %v6928_v11, %v6927_v24  ;;  %v9450_v46 = vadd.f32 %v7073_v7, %v7072_v44 }
 0x16c   :  { %v6931_v55 = vpop.f32.mrb[27].mxu0 }
 0x16d   :  { %v9452_v13 = vadd.f32 %v6931_v55, %v6930_v28 }
 0x16e   :  { %2743 = vmatmul.mubr.bf16.gmra.mrb[132].mxu0 %v9315_v15 }
 0x16f   :  { %2750 = vmatprep.mubr.bf16.mxu0 %v9337_v32  ;;  %v7075_v63 = vpop.f32.mrb[32].mxu1 }
 0x170   :  { %v7076_v1 = vpop.f32.mrb[33].mxu1 }
 0x171   :  { %v6933_v22 = vpop.f32.mrb[28].mxu0  ;;  %v9456_v30 = vadd.f32 %v7076_v1, %v7075_v63  ;;  %v7078_v61 = vpop.f32.mrb[34].mxu1 }
 0x172   :  { %v6934_v59 = vpop.f32.mrb[29].mxu0  ;;  %v7079_v53 = vpop.f32.mrb[35].mxu1 }
 0x173   :  { %v6936_v4 = vpop.f32.mrb[30].mxu0  ;;  %v9458_v27 = vadd.f32 %v6934_v59, %v6933_v22  ;;  %v9460_v38 = vadd.f32 %v7079_v53, %v7078_v61 }
 0x174   :  { %v6937_v25 = vpop.f32.mrb[31].mxu0 }
 0x175   :  { %v9462_v47 = vadd.f32 %v6937_v25, %v6936_v4 }
 0x176   :  { %2751 = vmatmul.mubr.bf16.gmra.mrb[136].mxu0 %v9317_v40 }
 0x177   :  { %2758 = vmatprep.mubr.bf16.mxu0 %v9339_v36  ;;  %v7081_v34 = vpop.f32.mrb[36].mxu1 }
 0x178   :  { %v7082_v62 = vpop.f32.mrb[37].mxu1 }
 0x179   :  { %v6939_v15 = vpop.f32.mrb[32].mxu0  ;;  %v9468_v11 = vadd.f32 %v7082_v62, %v7081_v34  ;;  %v7084_v26 = vpop.f32.mrb[38].mxu1 }
 0x17a   :  { %v6940_v52 = vpop.f32.mrb[33].mxu0  ;;  %v7085_v44 = vpop.f32.mrb[39].mxu1 }
 0x17b   :  { %v9466_v24 = vadd.f32 %v6940_v52, %v6939_v15  ;;  %v6942_v12 = vpop.f32.mrb[34].mxu0  ;;  %v9472_v7 = vadd.f32 %v7085_v44, %v7084_v26 }
 0x17c   :  { %v6943_v28 = vpop.f32.mrb[35].mxu0 }
 0x17d   :  { %v9470_v55 = vadd.f32 %v6943_v28, %v6942_v12 }
 0x17e   :  { %2759 = vmatmul.mubr.bf16.gmra.mrb[140].mxu0 %v9337_v32 }
 0x17f   :  { %2766 = vmatprep.mubr.bf16.mxu0 %v9365_v43  ;;  %v7087_v22 = vpop.f32.mrb[40].mxu1 }
 0x180   :  { %v7088_v59 = vpop.f32.mrb[41].mxu1 }
 0x181   :  { %v6945_v40 = vpop.f32.mrb[36].mxu0  ;;  %v9478_v61 = vadd.f32 %v7088_v59, %v7087_v22  ;;  %v7090_v25 = vpop.f32.mrb[42].mxu1 }
 0x182   :  { %v6946_v63 = vpop.f32.mrb[37].mxu0  ;;  %v7091_v15 = vpop.f32.mrb[43].mxu1 }
 0x183   :  { %v9476_v1 = vadd.f32 %v6946_v63, %v6945_v40  ;;  %v6948_v4 = vpop.f32.mrb[38].mxu0  ;;  %v9482_v52 = vadd.f32 %v7091_v15, %v7090_v25 }
 0x184   :  { %v6949_v53 = vpop.f32.mrb[39].mxu0 }
 0x185   :  { %v9480_v34 = vadd.f32 %v6949_v53, %v6948_v4  ;;  %11429 = vst [vmem:[#allocation16_spill] sm:$0xff] %v9482_v52 }
 0x186   :  { %2767 = vmatmul.mubr.bf16.gmra.mrb[144].mxu0 %v9339_v36 }
 0x187   :  { %2774 = vmatprep.mubr.bf16.mxu0 %v9369_v3  ;;  %v7093_v62 = vpop.f32.mrb[44].mxu1 }
 0x188   :  { %v7094_v26 = vpop.f32.mrb[45].mxu1 }
 0x189   :  { %v6951_v32 = vpop.f32.mrb[40].mxu0  ;;  %v9488_v40 = vadd.f32 %v7094_v26, %v7093_v62  ;;  %v7096_v22 = vpop.f32.mrb[46].mxu1 }
 0x18a   :  { %v6952_v12 = vpop.f32.mrb[41].mxu0  ;;  %v7097_v59 = vpop.f32.mrb[47].mxu1 }
 0x18b   :  { %v9486_v28 = vadd.f32 %v6952_v12, %v6951_v32  ;;  %v6954_v44 = vpop.f32.mrb[42].mxu0  ;;  %v9492_v25 = vadd.f32 %v7097_v59, %v7096_v22 }
 0x18c   :  { %v6955_v63 = vpop.f32.mrb[43].mxu0 }
 0x18d   :  { %v9490_v4 = vadd.f32 %v6955_v63, %v6954_v44  ;;  %11431 = vst [vmem:[#allocation18_spill] sm:$0xff] %v9492_v25 }
 0x18e   :  { %2775 = vmatmul.mubr.bf16.gmra.mrb[148].mxu0 %v9365_v43 }
 0x18f   :  { %11430 = vst [vmem:[#allocation17_spill] sm:$0xff] %v9490_v4  ;;  %2782 = vmatprep.mubr.bf16.mxu0 %v9394_v17  ;;  %v7099_v53 = vpop.f32.mrb[48].mxu1 }
 0x190   :  { %v7100_v6 = vpop.f32.mrb[49].mxu1 }
 0x191   :  { %v6957_v36 = vpop.f32.mrb[44].mxu0  ;;  %v9498_v62 = vadd.f32 %v7100_v6, %v7099_v53  ;;  %v7102_v26 = vpop.f32.mrb[50].mxu1 }
 0x192   :  { %v6958_v15 = vpop.f32.mrb[45].mxu0  ;;  %v7103_v0 = vpop.f32.mrb[51].mxu1 }
 0x193   :  { %v9496_v32 = vadd.f32 %v6958_v15, %v6957_v36  ;;  %v6960_v12 = vpop.f32.mrb[46].mxu0  ;;  %11432 = vst [vmem:[#allocation19_spill] sm:$0xff] %v9498_v62  ;;  %v9502_v22 = vadd.f32 %v7103_v0, %v7102_v26 }
 0x194   :  { %v6961_v58 = vpop.f32.mrb[47].mxu0 }
 0x195   :  { %v9500_v44 = vadd.f32 %v6961_v58, %v6960_v12  ;;  %11433 = vst [vmem:[#allocation20_spill] sm:$0xff] %v9502_v22 }
 0x196   :  { %2783 = vmatmul.mubr.bf16.gmra.mrb[152].mxu0 %v9369_v3 }
 0x197   :  { %2790 = vmatprep.mubr.bf16.mxu0 %v9397_v45  ;;  %v7105_v63 = vpop.f32.mrb[52].mxu1 }
 0x198   :  { %v7106_v52 = vpop.f32.mrb[53].mxu1 }
 0x199   :  { %v6963_v43 = vpop.f32.mrb[48].mxu0  ;;  %v9508_v6 = vadd.f32 %v7106_v52, %v7105_v63  ;;  %v7108_v53 = vpop.f32.mrb[54].mxu1 }
 0x19a   :  { %v6964_v59 = vpop.f32.mrb[49].mxu0  ;;  %v7109_v25 = vpop.f32.mrb[55].mxu1 }
 0x19b   :  { %v9506_v36 = vadd.f32 %v6964_v59, %v6963_v43  ;;  %v6966_v15 = vpop.f32.mrb[50].mxu0  ;;  %11435 = vst [vmem:[#allocation22_spill] sm:$0xff] %v9508_v6  ;;  %v9512_v0 = vadd.f32 %v7109_v25, %v7108_v53 }
 0x19c   :  { %v6967_v62 = vpop.f32.mrb[51].mxu0 }
 0x19d   :  { %11434 = vst [vmem:[#allocation21_spill] sm:$0xff] %v9506_v36  ;;  %v9510_v58 = vadd.f32 %v6967_v62, %v6966_v15  ;;  %11437 = vst [vmem:[#allocation24_spill] sm:$0xff] %v9512_v0 }
 0x19e   :  { %2791 = vmatmul.mubr.bf16.gmra.mrb[156].mxu0 %v9394_v17 }
 0x19f   :  { %11436 = vst [vmem:[#allocation23_spill] sm:$0xff] %v9510_v58  ;;  %v7111_v45 = vpop.f32.mrb[56].mxu1 }
 0x1a0   :  { %v7112_v26 = vpop.f32.mrb[57].mxu1 }
 0x1a1   :  { %v6969_v3 = vpop.f32.mrb[52].mxu0  ;;  %v9517_v59 = vadd.f32 %v7112_v26, %v7111_v45  ;;  %v7114_v52 = vpop.f32.mrb[58].mxu1 }
 0x1a2   :  { %v6970_v12 = vpop.f32.mrb[53].mxu0  ;;  %v7115_v6 = vpop.f32.mrb[59].mxu1 }
 0x1a3   :  { %v9515_v22 = vadd.f32 %v6970_v12, %v6969_v3  ;;  %v6972_v43 = vpop.f32.mrb[54].mxu0  ;;  %11438 = vst [vmem:[#allocation25_spill] sm:$0xff] %v9517_v59  ;;  %v9521_v62 = vadd.f32 %v7115_v6, %v7114_v52 }
 0x1a4   :  { %v6973_v63 = vpop.f32.mrb[55].mxu0 }
 0x1a5   :  { %v9519_v36 = vadd.f32 %v6973_v63, %v6972_v43  ;;  %11440 = vst [vmem:[#allocation27_spill] sm:$0xff] %v9521_v62 }
 0x1a7   :  { %11439 = vst [vmem:[#allocation26_spill] sm:$0xff] %v9519_v36  ;;  %v7117_v15 = vpop.f32.mrb[60].mxu1 }
 0x1a8   :  { %v7118_v17 = vpop.f32.mrb[61].mxu1 }
 0x1a9   :  { %v6975_v25 = vpop.f32.mrb[56].mxu0  ;;  %v9525_v4 = vadd.f32 %v7118_v17, %v7117_v15  ;;  %v7120_v3 = vpop.f32.mrb[62].mxu1 }
 0x1aa   :  { %v6976_v53 = vpop.f32.mrb[57].mxu0  ;;  %v7121_v45 = vpop.f32.mrb[63].mxu1 }
 0x1ab   :  { %v9523_v0 = vadd.f32 %v6976_v53, %v6975_v25  ;;  %v6978_v58 = vpop.f32.mrb[58].mxu0  ;;  %11441 = vst [vmem:[#allocation28_spill] sm:$0xff] %v9525_v4  ;;  %v9529_v59 = vadd.f32 %v7121_v45, %v7120_v3 }
 0x1ac   :  { %v6979_v12 = vpop.f32.mrb[59].mxu0 }
 0x1ad   :  { %v9527_v26 = vadd.f32 %v6979_v12, %v6978_v58 }
 0x1b1   :  { %v6981_v43 = vpop.f32.mrb[60].mxu0 }
 0x1b2   :  { %v6982_v63 = vpop.f32.mrb[61].mxu0 }
 0x1b3   :  { %v9531_v6 = vadd.f32 %v6982_v63, %v6981_v43  ;;  %v6984_v52 = vpop.f32.mrb[62].mxu0 }
 0x1b4   :  { %v6985_v62 = vpop.f32.mrb[63].mxu0 }
 0x1b5   :  { %v9533_v36 = vadd.f32 %v6985_v62, %v6984_v52 }
 0x1b9   :  { %v7709_v25 = vpop.f32.mrb[64].mxu0 }
 0x1ba   :  { %v1642_v53 = vadd.f32 %v7709_v25, %v9373_v56  ;;  %v1633_v15 = vpop.f32.mrb[65].mxu0 }
 0x1bb   :  { %v1634_v17 = vadd.f32 %v9344_v23, %v1633_v15  ;;  %v7710_v4 = vpop.f32.mrb[66].mxu0 }
 0x1bc   :  { %v9538_v58 = vadd.f32 %v9342_v10, %v1642_v53  ;;  %v1645_v3 = vadd.f32 %v7710_v4, %v9379_v49  ;;  %v1636_v12 = vpop.f32.mrb[67].mxu0 }
 0x1bd   :  { %v9542_v45 = vadd.f32 %v9319_v51, %v1634_v17  ;;  %v1637_v43 = vadd.f32 %v9349_v18, %v1636_v12 }
 0x1be   :  { %v9546_v62 = vadd.f32 %v9347_v31, %v1645_v3 }
 0x1bf   :  { %v9549_v56 = vadd.f32 %v9321_v37, %v1637_v43 }
 0x1c1   :  { %v7713_v63 = vpop.f32.mrb[68].mxu0 }
 0x1c2   :  { %v1658_v23 = vadd.f32 %v7713_v63, %v9418_v41  ;;  %v1649_v52 = vpop.f32.mrb[69].mxu0 }
 0x1c3   :  { %v1650_v10 = vadd.f32 %v9402_v20, %v1649_v52  ;;  %v7714_v25 = vpop.f32.mrb[70].mxu0 }
 0x1c4   :  { %v9554_v49 = vadd.f32 %v9400_v9, %v1658_v23  ;;  %v1661_v51 = vadd.f32 %v7714_v25, %v9422_v29  ;;  %v1652_v4 = vpop.f32.mrb[71].mxu0 }
 0x1c5   :  { %v9558_v18 = vadd.f32 %v9371_v21, %v1650_v10  ;;  %v1653_v31 = vadd.f32 %v9406_v8, %v1652_v4 }
 0x1c6   :  { %v9562_v37 = vadd.f32 %v9404_v50, %v1661_v51 }
 0x1c7   :  { %v9565_v41 = vadd.f32 %v9377_v2, %v1653_v31 }
 0x1c9   :  { %v7717_v53 = vpop.f32.mrb[72].mxu0 }
 0x1ca   :  { %v1674_v20 = vadd.f32 %v7717_v53, %v9438_v5  ;;  %v1665_v15 = vpop.f32.mrb[73].mxu0 }
 0x1cb   :  { %v1666_v9 = vadd.f32 %v9428_v54, %v1665_v15  ;;  %v7718_v17 = vpop.f32.mrb[74].mxu0 }
 0x1cc   :  { %v9570_v29 = vadd.f32 %v9426_v57, %v1674_v20  ;;  %v1677_v21 = vadd.f32 %v7718_v17, %v9442_v19  ;;  %v1668_v3 = vpop.f32.mrb[75].mxu0  ;;  %v11444_v17 = vld [vmem:[#allocation16_spill] sm:$0xff] }
 0x1cd   :  { %v9574_v8 = vadd.f32 %v9416_v60, %v1666_v9  ;;  %v1669_v50 = vadd.f32 %v9432_v48, %v1668_v3 }
 0x1ce   :  { %v9578_v2 = vadd.f32 %v9430_v35, %v1677_v21 }
 0x1cf   :  { %v9581_v5 = vadd.f32 %v9420_v39, %v1669_v50 }
 0x1d1   :  { %v7721_v12 = vpop.f32.mrb[76].mxu0 }
 0x1d2   :  { %v1690_v54 = vadd.f32 %v7721_v12, %v9458_v27  ;;  %v1681_v43 = vpop.f32.mrb[77].mxu0 }
 0x1d3   :  { %v1682_v57 = vadd.f32 %v9448_v42, %v1681_v43  ;;  %v7722_v63 = vpop.f32.mrb[78].mxu0 }
 0x1d4   :  { %v9586_v19 = vadd.f32 %v9446_v33, %v1690_v54  ;;  %v1693_v60 = vadd.f32 %v7722_v63, %v9462_v47  ;;  %v1684_v23 = vpop.f32.mrb[79].mxu0  ;;  %v11448_v63 = vld [vmem:[#allocation19_spill] sm:$0xff] }
 0x1d5   :  { %v9590_v48 = vadd.f32 %v9436_v14, %v1682_v57  ;;  %v1685_v35 = vadd.f32 %v9452_v13, %v1684_v23  ;;  %v11449_v23 = vld [vmem:[#allocation23_spill] sm:$0xff] }
 0x1d6   :  { %v9594_v39 = vadd.f32 %v9450_v46, %v1693_v60 }
 0x1d7   :  { %v9597_v27 = vadd.f32 %v9440_v16, %v1685_v35 }
 0x1d9   :  { %v7725_v52 = vpop.f32.mrb[80].mxu0 }
 0x1da   :  { %v1706_v42 = vadd.f32 %v7725_v52, %v9476_v1  ;;  %v1697_v10 = vpop.f32.mrb[81].mxu0  ;;  %v11450_v52 = vld [vmem:[#allocation24_spill] sm:$0xff] }
 0x1db   :  { %v1698_v33 = vadd.f32 %v9466_v24, %v1697_v10  ;;  %v7726_v25 = vpop.f32.mrb[82].mxu0  ;;  %v11451_v10 = vld [vmem:[#allocation20_spill] sm:$0xff] }
 0x1dc   :  { %v9602_v47 = vadd.f32 %v9468_v11, %v1706_v42  ;;  %v1709_v14 = vadd.f32 %v7726_v25, %v9480_v34  ;;  %v1700_v51 = vpop.f32.mrb[83].mxu0 }
 0x1dd   :  { %v9606_v13 = vadd.f32 %v9456_v30, %v1698_v33  ;;  %v1701_v46 = vadd.f32 %v9470_v55, %v1700_v51 }
 0x1de   :  { %v9610_v16 = vadd.f32 %v9472_v7, %v1709_v14  ;;  %v11442_v7 = vld [vmem:[#allocation17_spill] sm:$0xff] }
 0x1df   :  { %v9613_v1 = vadd.f32 %v9460_v38, %v1701_v46  ;;  %v11443_v38 = vld [vmem:[#allocation18_spill] sm:$0xff] }
 0x1e1   :  { %v7729_v4 = vpop.f32.mrb[84].mxu0 }
 0x1e2   :  { %v1722_v24 = vadd.f32 %v7729_v4, %v9496_v32  ;;  %v1713_v31 = vpop.f32.mrb[85].mxu0 }
 0x1e3   :  { %v1714_v11 = vadd.f32 %v9486_v28, %v1713_v31  ;;  %v7730_v53 = vpop.f32.mrb[86].mxu0 }
 0x1e4   :  { %v9618_v34 = vadd.f32 %v9488_v40, %v1722_v24  ;;  %v1725_v30 = vadd.f32 %v7730_v53, %v9500_v44  ;;  %v1716_v20 = vpop.f32.mrb[87].mxu0  ;;  %v11445_v40 = vld [vmem:[#allocation21_spill] sm:$0xff]  ;;  %v11446_v44 = vld [vmem:[#allocation22_spill] sm:$0xff] }
 0x1e5   :  { %v9622_v55 = vadd.f32 %v9478_v61, %v1714_v11  ;;  %v1717_v15 = vadd.f32 %v11442_v7, %v1716_v20  ;;  %v11447_v61 = vld [vmem:[#allocation26_spill] sm:$0xff]  ;;  %v11452_v11 = vld [vmem:[#allocation28_spill] sm:$0xff] }
 0x1e6   :  { %v9626_v9 = vadd.f32 %v11443_v38, %v1725_v30 }
 0x1e7   :  { %v9629_v32 = vadd.f32 %v11444_v17, %v1717_v15  ;;  %v11454_v15 = vld [vmem:[#allocation25_spill] sm:$0xff] }
 0x1e9   :  { %v7733_v21 = vpop.f32.mrb[88].mxu0 }
 0x1ea   :  { %v1738_v28 = vadd.f32 %v7733_v21, %v9515_v22  ;;  %v1729_v3 = vpop.f32.mrb[89].mxu0  ;;  %v11456_v21 = vld [vmem:[#allocation27_spill] sm:$0xff] }
 0x1eb   :  { %v1730_v50 = vadd.f32 %v11445_v40, %v1729_v3  ;;  %v7734_v12 = vpop.f32.mrb[90].mxu0 }
 0x1ec   :  { %v9634_v54 = vadd.f32 %v11446_v44, %v1738_v28  ;;  %v1741_v43 = vadd.f32 %v7734_v12, %v11447_v61  ;;  %v1732_v57 = vpop.f32.mrb[91].mxu0 }
 0x1ed   :  { %v9638_v60 = vadd.f32 %v11448_v63, %v1730_v50  ;;  %v1733_v35 = vadd.f32 %v11449_v23, %v1732_v57 }
 0x1ee   :  { %v9642_v42 = vadd.f32 %v11450_v52, %v1741_v43 }
 0x1ef   :  { %v9645_v22 = vadd.f32 %v11451_v10, %v1733_v35  ;;  %v7805_v25 = vpop.f32.mrb[64].mxu1 }
 0x1f0   :  { %v2833_v46 = vpop.f32.mrb[65].mxu1 }
 0x1f1   :  { %v7737_v33 = vpop.f32.mrb[92].mxu0  ;;  %v7806_v31 = vpop.f32.mrb[66].mxu1 }
 0x1f2   :  { %v1754_v14 = vadd.f32 %v7737_v33, %v9531_v6  ;;  %v1745_v51 = vpop.f32.mrb[93].mxu0  ;;  %v2836_v7 = vpop.f32.mrb[67].mxu1 }
 0x1f3   :  { %v1746_v4 = vadd.f32 %v9523_v0, %v1745_v51  ;;  %v7738_v24 = vpop.f32.mrb[94].mxu0 }
 0x1f4   :  { %v9650_v53 = vadd.f32 %v11452_v11, %v1754_v14  ;;  %v1757_v30 = vadd.f32 %v7738_v24, %v9533_v36  ;;  %v1748_v20 = vpop.f32.mrb[95].mxu0 }
 0x1f5   :  { %v9654_v38 = vadd.f32 %v11454_v15, %v1746_v4  ;;  %v1749_v17 = vadd.f32 %v9527_v26, %v1748_v20 }
 0x1f6   :  { %11453 = vst [vmem:[#allocation17_spill] sm:$0xff] %v9650_v53  ;;  %v9658_v6 = vadd.f32 %v9529_v59, %v1757_v30 }
 0x1f7   :  { %v9661_v28 = vadd.f32 %v11456_v21, %v1749_v17  ;;  %v7809_v3 = vpop.f32.mrb[68].mxu1 }
 0x1f8   :  { %11455 = vst [vmem:[#allocation18_spill] sm:$0xff] %v9658_v6  ;;  %v2849_v50 = vpop.f32.mrb[69].mxu1 }
 0x1f9   :  { %v7163_v0 = vpop.f32.mrb[96].mxu0  ;;  %v7810_v36 = vpop.f32.mrb[70].mxu1 }
 0x1fa   :  { %v7164_v40 = vpop.f32.mrb[97].mxu0  ;;  %v2852_v43 = vpop.f32.mrb[71].mxu1 }
 0x1fb   :  { %v7165_v12 = vadd.f32 %v7164_v40, %v7163_v0  ;;  %v7166_v44 = vpop.f32.mrb[98].mxu0 }
 0x1fc   :  { %v7167_v61 = vpop.f32.mrb[99].mxu0 }
 0x1fd   :  { %v7985_v57 = vadd.f32 %v7165_v12, %v9542_v45  ;;  %v7168_v63 = vadd.f32 %v7167_v61, %v7166_v44 }
 0x1ff   :  { %v7986_v23 = vadd.f32 %v7985_v57, %v2833_v46  ;;  %v7993_v26 = vadd.f32 %v7168_v63, %v9549_v56  ;;  %v9665_v52 = vpop.f32.mrb[72].mxu1 }
 0x200   :  { %v9667_v33 = vpop.f32.mrb[73].mxu1 }
 0x201   :  { %v7994_v59 = vadd.f32 %v7993_v26, %v2836_v7  ;;  %v7169_v35 = vpop.f32.mrb[100].mxu0  ;;  %v9669_v4 = vpop.f32.mrb[74].mxu1  ;;  %vm2992_vm10 = vcmp.gt.f32.partialorder %v7986_v23, 0.0 }
 0x202   :  { %v7170_v10 = vpop.f32.mrb[101].mxu0  ;;  %v9671_v11 = vpop.f32.mrb[75].mxu1 }
 0x203   :  { %v7171_v14 = vadd.f32 %v7170_v10, %v7169_v35  ;;  %v7172_v51 = vpop.f32.mrb[102].mxu0  ;;  %vm2993_vm9 = vcmp.gt.f32.partialorder %v7994_v59, 0.0 }
 0x204   :  { %v7173_v24 = vpop.f32.mrb[103].mxu0 }
 0x205   :  { %v7981_v45 = vadd.f32 %v7171_v14, %v9538_v58  ;;  %v7174_v30 = vadd.f32 %v7173_v24, %v7172_v51  ;;  %v3025_v14 = vmul.f32 0.2, %v7994_v59 }
 0x207   :  { %v7982_v46 = vadd.f32 %v7981_v45, %v7805_v25  ;;  %v7989_v56 = vadd.f32 %v7174_v30, %v9546_v62  ;;  %v9675_v15 = vpop.f32.mrb[76].mxu1 }
 0x208   :  { %v9677_v21 = vpop.f32.mrb[77].mxu1 }
 0x209   :  { %v7990_v20 = vadd.f32 %v7989_v56, %v7806_v31  ;;  %v7175_v7 = vpop.f32.mrb[104].mxu0  ;;  %v9679_v12 = vpop.f32.mrb[78].mxu1  ;;  %v3026_v56 = vmul.f32 0.2, %v7982_v46  ;;  %vm2994_vm11 = vcmp.gt.f32.partialorder %v7982_v46, 0.0 }
 0x20a   :  { %v7176_v17 = vpop.f32.mrb[105].mxu0  ;;  %v9681_v61 = vpop.f32.mrb[79].mxu1 }
 0x20b   :  { %v7177_v0 = vadd.f32 %v7176_v17, %v7175_v7  ;;  %v7178_v40 = vpop.f32.mrb[106].mxu0  ;;  %v9696_v7 = vsel %vm2993_vm9, %v7994_v59, %v3025_v14  ;;  %vm2995_vm12 = vcmp.gt.f32.partialorder %v7990_v20, 0.0 }
 0x20c   :  { %v7179_v44 = vpop.f32.mrb[107].mxu0  ;;  %11457 = vst [vmem:[#allocation16_spill] sm:$0xff] %v9696_v7 }
 0x20d   :  { %v8001_v58 = vadd.f32 %v7177_v0, %v9558_v18  ;;  %v7180_v57 = vadd.f32 %v7179_v44, %v7178_v40  ;;  %v9701_v44 = vsel %vm2994_vm11, %v7982_v46, %v3026_v56 }
 0x20e   :  { %v3129_v46 = vmul.f32 %v9701_v44, %v9701_v44 }
 0x20f   :  { %v8002_v25 = vadd.f32 %v8001_v58, %v2849_v50  ;;  %v8009_v62 = vadd.f32 %v7180_v57, %v9565_v41  ;;  %v9687_v26 = vpop.f32.mrb[80].mxu1  ;;  %v3024_v50 = vmul.f32 0.2, %v7986_v23  ;;  %v3027_v58 = vmul.f32 0.2, %v7990_v20 }
 0x210   :  { %v9689_v10 = vpop.f32.mrb[81].mxu1 }
 0x211   :  { %v9685_v31 = vadd.f32 %v8009_v62, %v2852_v43  ;;  %v7181_v63 = vpop.f32.mrb[108].mxu0  ;;  %v9691_v45 = vpop.f32.mrb[82].mxu1  ;;  %v9699_v40 = vsel %vm2992_vm10, %v7986_v23, %v3024_v50  ;;  %v3028_v59 = vmul.f32 0.2, %v8002_v25  ;;  %vm2996_vm13 = vcmp.gt.f32.partialorder %v8002_v25, 0.0 }
 0x212   :  { %v7182_v35 = vpop.f32.mrb[109].mxu0  ;;  %v9693_v18 = vpop.f32.mrb[83].mxu1  ;;  %11458 = vst [vmem:[#allocation21_spill] sm:$0xff] %v9699_v40  ;;  %v3127_v23 = vmul.f32 %v9699_v40, %v9699_v40  ;;  %v9719_v50 = vsel %vm2995_vm12, %v7990_v20, %v3027_v58 }
 0x213   :  { %v7183_v51 = vadd.f32 %v7182_v35, %v7181_v63  ;;  %v7184_v24 = vpop.f32.mrb[110].mxu0  ;;  %11459 = vst [vmem:[#allocation22_spill] sm:$0xff] %v9719_v50  ;;  %v3130_v53 = vmul.f32 %v9719_v50, %v9719_v50  ;;  %vm2997_vm14 = vcmp.gt.f32.partialorder %v9685_v31, 0.0 }
 0x214   :  { %v7185_v30 = vpop.f32.mrb[111].mxu0 }
 0x215   :  { %v7997_v41 = vadd.f32 %v7183_v51, %v9554_v49  ;;  %v7186_v43 = vadd.f32 %v7185_v30, %v7184_v24  ;;  %v3128_v49 = vmul.f32 %v9696_v7, %v9696_v7 }
 0x217   :  { %v7998_v17 = vadd.f32 %v7997_v41, %v7809_v3  ;;  %v8005_v0 = vadd.f32 %v7186_v43, %v9562_v37  ;;  %v9703_v63 = vpop.f32.mrb[84].mxu1  ;;  %v3159_v43 = vadd.f32 %v3128_v49, %v3127_v23 }
 0x218   :  { %v9707_v51 = vpop.f32.mrb[85].mxu1 }
 0x219   :  { %v8006_v57 = vadd.f32 %v8005_v0, %v7810_v36  ;;  %v7187_v62 = vpop.f32.mrb[112].mxu0  ;;  %v9709_v37 = vpop.f32.mrb[86].mxu1  ;;  %v3088_v36 = vadd.f32 %v9696_v7, %v9699_v40  ;;  %v3160_v6 = vadd.f32 %v3159_v43, %v3129_v46  ;;  %v3030_v20 = vmul.f32 0.2, %v7998_v17 }
 0x21a   :  { %v7188_v35 = vpop.f32.mrb[113].mxu0  ;;  %v9717_v30 = vpop.f32.mrb[87].mxu1  ;;  %vm2998_vm15 = vcmp.gt.f32.partialorder %v7998_v17, 0.0 }
 0x21b   :  { %v7189_v3 = vadd.f32 %v7188_v35, %v7187_v62  ;;  %v7190_v14 = vpop.f32.mrb[114].mxu0  ;;  %v3089_v0 = vadd.f32 %v3088_v36, %v9701_v44  ;;  %v9723_v62 = vsel %vm2996_vm13, %v8002_v25, %v3028_v59  ;;  %v3029_v35 = vmul.f32 0.2, %v9685_v31 }
 0x21c   :  { %v7191_v24 = vpop.f32.mrb[115].mxu0  ;;  %v3131_v59 = vmul.f32 %v9723_v62, %v9723_v62  ;;  %vm2999_vm0 = vcmp.gt.f32.partialorder %v8006_v57, 0.0 }
 0x21d   :  { %v8017_v56 = vadd.f32 %v7189_v3, %v9574_v8  ;;  %v7192_v41 = vadd.f32 %v7191_v24, %v7190_v14  ;;  %v3090_v25 = vadd.f32 %v3089_v0, %v9719_v50  ;;  %v9740_v3 = vsel %vm2997_vm14, %v9685_v31, %v3029_v35 }
 0x21e   :  { %11460 = vst [vmem:[#allocation26_spill] sm:$0xff] %v9740_v3  ;;  %v3132_v31 = vmul.f32 %v9740_v3, %v9740_v3 }
 0x21f   :  { %v8018_v7 = vadd.f32 %v8017_v56, %v9667_v33  ;;  %v8025_v40 = vadd.f32 %v7192_v41, %v9581_v5  ;;  %v9732_v49 = vpop.f32.mrb[88].mxu1  ;;  %v9747_v56 = vsel %vm2998_vm15, %v7998_v17, %v3030_v20  ;;  %v3031_v41 = vmul.f32 0.2, %v8006_v57 }
 0x220   :  { %v9737_v5 = vpop.f32.mrb[89].mxu1  ;;  %11461 = vst [vmem:[#allocation19_spill] sm:$0xff] %v9747_v56  ;;  %v3133_v17 = vmul.f32 %v9747_v56, %v9747_v56 }
 0x221   :  { %v8026_v8 = vadd.f32 %v8025_v40, %v9671_v11  ;;  %v7193_v58 = vpop.f32.mrb[116].mxu0  ;;  %v9742_v36 = vpop.f32.mrb[90].mxu1  ;;  %v3161_v11 = vadd.f32 %v3160_v6, %v3130_v53  ;;  %v3091_v40 = vadd.f32 %v3090_v25, %v9723_v62  ;;  %v3032_v35 = vmul.f32 0.2, %v8018_v7 }
 0x222   :  { %v7194_v33 = vpop.f32.mrb[117].mxu0  ;;  %v9745_v24 = vpop.f32.mrb[91].mxu1  ;;  %vm3000_vm1 = vcmp.gt.f32.partialorder %v8018_v7, 0.0  ;;  %v9757_v20 = vsel %vm2999_vm0, %v8006_v57, %v3031_v41 }
 0x223   :  { %v7195_v14 = vadd.f32 %v7194_v33, %v7193_v58  ;;  %v7196_v23 = vpop.f32.mrb[118].mxu0  ;;  %v3162_v50 = vadd.f32 %v3161_v11, %v3131_v59  ;;  %v3092_v6 = vadd.f32 %v3091_v40, %v9740_v3  ;;  %v3033_v11 = vmul.f32 0.2, %v8026_v8 }
 0x224   :  { %v7197_v46 = vpop.f32.mrb[119].mxu0  ;;  %vm3001_vm2 = vcmp.gt.f32.partialorder %v8026_v8, 0.0 }
 0x225   :  { %v8013_v43 = vadd.f32 %v7195_v14, %v9570_v29  ;;  %v7198_v0 = vadd.f32 %v7197_v46, %v7196_v23  ;;  %v3163_v33 = vadd.f32 %v3162_v50, %v3132_v31  ;;  %v3093_v14 = vadd.f32 %v3092_v6, %v9747_v56 }
 0x226   :  { %v9777_v6 = vsel %vm3001_vm2, %v8026_v8, %v3033_v11 }
 0x227   :  { %v8014_v58 = vadd.f32 %v8013_v43, %v9665_v52  ;;  %v8021_v53 = vadd.f32 %v7198_v0, %v9578_v2  ;;  %v9760_v59 = vpop.f32.mrb[92].mxu1  ;;  %v9765_v2 = vsel %vm3000_vm1, %v8018_v7, %v3032_v35  ;;  %v3164_v57 = vadd.f32 %v3163_v33, %v3133_v17 }
 0x228   :  { %v9763_v52 = vpop.f32.mrb[93].mxu1  ;;  %v3094_v7 = vadd.f32 %v3093_v14, %v9757_v20  ;;  %v3135_v35 = vmul.f32 %v9765_v2, %v9765_v2 }
 0x229   :  { %v8022_v29 = vadd.f32 %v8021_v53, %v9669_v4  ;;  %v7199_v25 = vpop.f32.mrb[120].mxu0  ;;  %v9767_v43 = vpop.f32.mrb[94].mxu1  ;;  %v3134_v4 = vmul.f32 %v9757_v20, %v9757_v20  ;;  %v3034_v50 = vmul.f32 0.2, %v8014_v58  ;;  %vm3002_vm3 = vcmp.gt.f32.partialorder %v8014_v58, 0.0 }
 0x22a   :  { %v7200_v23 = vpop.f32.mrb[121].mxu0  ;;  %v9771_v0 = vpop.f32.mrb[95].mxu1 }
 0x22b   :  { %v7201_v40 = vadd.f32 %v7200_v23, %v7199_v25  ;;  %v7202_v46 = vpop.f32.mrb[122].mxu0  ;;  %v3165_v33 = vadd.f32 %v3164_v57, %v3134_v4  ;;  %v3095_v23 = vadd.f32 %v3094_v7, %v9765_v2  ;;  %v9782_v56 = vsel %vm3002_vm3, %v8014_v58, %v3034_v50 }
 0x22c   :  { %v7203_v41 = vpop.f32.mrb[123].mxu0  ;;  %v3035_v3 = vmul.f32 0.2, %v8022_v29  ;;  %vm3003_vm6 = vcmp.gt.f32.partialorder %v8022_v29, 0.0  ;;  %v3137_v57 = vmul.f32 %v9782_v56, %v9782_v56 }
 0x22d   :  { %v8033_v31 = vadd.f32 %v7201_v40, %v9590_v48  ;;  %v7204_v53 = vadd.f32 %v7203_v41, %v7202_v46  ;;  %v3166_v14 = vadd.f32 %v3165_v33, %v3135_v35  ;;  %v3136_v46 = vmul.f32 %v9777_v6, %v9777_v6 }
 0x22e   :  { %v9790_v4 = vsel %vm3003_vm6, %v8022_v29, %v3035_v3 }
 0x22f   :  { %v8034_v17 = vadd.f32 %v8033_v31, %v9677_v21  ;;  %v8041_v25 = vadd.f32 %v7204_v53, %v9597_v27  ;;  %v3096_v27 = vadd.f32 %v3095_v23, %v9777_v6  ;;  %v3167_v31 = vadd.f32 %v3166_v14, %v3136_v46 }
 0x231   :  { %v8042_v48 = vadd.f32 %v8041_v25, %v9681_v61  ;;  %v7205_v40 = vpop.f32.mrb[124].mxu0  ;;  %v3036_v11 = vmul.f32 0.2, %v8034_v17  ;;  %vm3004_vm7 = vcmp.gt.f32.partialorder %v8034_v17, 0.0  ;;  %v3097_v53 = vadd.f32 %v3096_v27, %v9782_v56 }
 0x232   :  { %v7206_v8 = vpop.f32.mrb[125].mxu0  ;;  %v3168_v23 = vadd.f32 %v3167_v31, %v3137_v57 }
 0x233   :  { %v7207_v41 = vadd.f32 %v7206_v8, %v7205_v40  ;;  %v7208_v21 = vpop.f32.mrb[126].mxu0  ;;  %v9794_v7 = vsel %vm3004_vm7, %v8034_v17, %v3036_v11  ;;  %v3037_v35 = vmul.f32 0.2, %v8042_v48  ;;  %v3138_v40 = vmul.f32 %v9790_v4, %v9790_v4 }
 0x234   :  { %v7209_v58 = vpop.f32.mrb[127].mxu0  ;;  %vm3005_vm9 = vcmp.gt.f32.partialorder %v8042_v48, 0.0  ;;  %v3098_v14 = vadd.f32 %v3097_v53, %v9790_v4  ;;  %v3139_v17 = vmul.f32 %v9794_v7, %v9794_v7 }
 0x235   :  { %v8029_v61 = vadd.f32 %v7207_v41, %v9586_v19  ;;  %v7210_v50 = vadd.f32 %v7209_v58, %v7208_v21  ;;  %v9804_v8 = vsel %vm3005_vm9, %v8042_v48, %v3037_v35  ;;  %v3169_v11 = vadd.f32 %v3168_v23, %v3138_v40 }
 0x236   :  { %v3099_v41 = vadd.f32 %v3098_v14, %v9794_v7 }
 0x237   :  { %v8030_v25 = vadd.f32 %v8029_v61, %v9675_v15  ;;  %v8037_v33 = vadd.f32 %v7210_v50, %v9594_v39  ;;  %v3170_v61 = vadd.f32 %v3169_v11, %v3139_v17  ;;  %v3140_v50 = vmul.f32 %v9804_v8, %v9804_v8 }
 0x238   :  { %v3100_v53 = vadd.f32 %v3099_v41, %v9804_v8 }
 0x239   :  { %v3038_v3 = vmul.f32 0.2, %v8030_v25  ;;  %v8038_v29 = vadd.f32 %v8037_v33, %v9679_v12  ;;  %v7211_v19 = vpop.f32.mrb[128].mxu0  ;;  %vm3006_vm10 = vcmp.gt.f32.partialorder %v8030_v25, 0.0  ;;  %v3171_v40 = vadd.f32 %v3170_v61, %v3140_v50 }
 0x23a   :  { %v7212_v46 = vpop.f32.mrb[129].mxu0 }
 0x23b   :  { %v7213_v15 = vadd.f32 %v7212_v46, %v7211_v19  ;;  %v7214_v39 = vpop.f32.mrb[130].mxu0  ;;  %v9807_v27 = vsel %vm3006_vm10, %v8030_v25, %v3038_v3  ;;  %v3039_v57 = vmul.f32 0.2, %v8038_v29  ;;  %vm3007_vm11 = vcmp.gt.f32.partialorder %v8038_v29, 0.0 }
 0x23c   :  { %v7215_v21 = vpop.f32.mrb[131].mxu0  ;;  %v3141_v35 = vmul.f32 %v9807_v27, %v9807_v27  ;;  %v3101_v3 = vadd.f32 %v3100_v53, %v9807_v27 }
 0x23d   :  { %v8049_v12 = vadd.f32 %v7213_v15, %v9606_v13  ;;  %v7216_v58 = vadd.f32 %v7215_v21, %v7214_v39  ;;  %v9817_v25 = vsel %vm3007_vm11, %v8038_v29, %v3039_v57 }
 0x23e   :  { %v3172_v46 = vadd.f32 %v3171_v40, %v3141_v35  ;;  %v3142_v15 = vmul.f32 %v9817_v25, %v9817_v25 }
 0x23f   :  { %v8050_v48 = vadd.f32 %v8049_v12, %v9689_v10  ;;  %v8057_v31 = vadd.f32 %v7216_v58, %v9613_v1 }
 0x240   :  { %v3173_v58 = vadd.f32 %v3172_v46, %v3142_v15 }
 0x241   :  { %vm3008_vm12 = vcmp.gt.f32.partialorder %v8050_v48, 0.0  ;;  %v3040_v33 = vmul.f32 0.2, %v8050_v48  ;;  %v8058_v13 = vadd.f32 %v8057_v31, %v9693_v18  ;;  %v7217_v23 = vpop.f32.mrb[132].mxu0  ;;  %v3102_v18 = vadd.f32 %v3101_v3, %v9817_v25 }
 0x242   :  { %v7218_v19 = vpop.f32.mrb[133].mxu0 }
 0x243   :  { %v9821_v14 = vsel %vm3008_vm12, %v8050_v48, %v3040_v33  ;;  %v3041_v10 = vmul.f32 0.2, %v8058_v13  ;;  %v7219_v1 = vadd.f32 %v7218_v19, %v7217_v23  ;;  %v7220_v17 = vpop.f32.mrb[134].mxu0  ;;  %vm3009_vm13 = vcmp.gt.f32.partialorder %v8058_v13, 0.0 }
 0x244   :  { %v7221_v29 = vpop.f32.mrb[135].mxu0  ;;  %v3143_v41 = vmul.f32 %v9821_v14, %v9821_v14  ;;  %v3103_v61 = vadd.f32 %v3102_v18, %v9821_v14 }
 0x245   :  { %v8045_v39 = vadd.f32 %v7219_v1, %v9602_v47  ;;  %v7222_v11 = vadd.f32 %v7221_v29, %v7220_v17  ;;  %v9829_v21 = vsel %vm3009_vm13, %v8058_v13, %v3041_v10 }
 0x246   :  { %v3174_v31 = vadd.f32 %v3173_v58, %v3143_v41  ;;  %v3144_v53 = vmul.f32 %v9829_v21, %v9829_v21  ;;  %v8400_v58 = vld [vmem:[#allocation8 + $0x140] sm:$0xff]  }
 0x247   :  { %v8046_v57 = vadd.f32 %v8045_v39, %v9687_v26  ;;  %v8053_v12 = vadd.f32 %v7222_v11, %v9610_v16  ;;  %v3104_v16 = vadd.f32 %v3103_v61, %v9829_v21  ;;  %7835 = vmatprep.subr.bf16.mxu1 %v8400_v58 }
 0x248   :  { %v3175_v1 = vadd.f32 %v3174_v31, %v3144_v53  ;;  %7836 = vmatpush3.bf16.msra.mxu1 %v8400_v58 }
 0x249   :  { %vm3010_vm14 = vcmp.gt.f32.partialorder %v8046_v57, 0.0  ;;  %v3042_v50 = vmul.f32 0.2, %v8046_v57  ;;  %v8054_v48 = vadd.f32 %v8053_v12, %v9691_v45  ;;  %v7223_v47 = vpop.f32.mrb[136].mxu0  ;;  %v8398_v12 = vld [vmem:[#allocation8 + $0x100] sm:$0xff]  }
 0x24a   :  { %v7224_v35 = vpop.f32.mrb[137].mxu0  ;;  %7283 = vmatprep.subr.bf16.mxu0 %v8398_v12 }
 0x24b   :  { %v9837_v33 = vsel %vm3010_vm14, %v8046_v57, %v3042_v50  ;;  %vm3011_vm15 = vcmp.gt.f32.partialorder %v8054_v48, 0.0  ;;  %v3043_v13 = vmul.f32 0.2, %v8054_v48  ;;  %v7225_v26 = vadd.f32 %v7224_v35, %v7223_v47  ;;  %v7226_v23 = vpop.f32.mrb[138].mxu0 }
 0x24c   :  { %v3145_v40 = vmul.f32 %v9837_v33, %v9837_v33  ;;  %v7227_v3 = vpop.f32.mrb[139].mxu0  ;;  %v3105_v17 = vadd.f32 %v3104_v16, %v9837_v33 }
 0x24d   :  { %v9842_v19 = vsel %vm3011_vm15, %v8054_v48, %v3043_v13  ;;  %v8065_v45 = vadd.f32 %v7225_v26, %v9622_v55  ;;  %v7228_v10 = vadd.f32 %v7227_v3, %v7226_v23  ;;  %v8399_v48 = vld [vmem:[#allocation8 + $0xc0] sm:$0xff]   ;;  %v8401_v3 = vld [vmem:[#allocation8 + $0x148] sm:$0xff]  }
 0x24e   :  { %v3176_v29 = vadd.f32 %v3175_v1, %v3145_v40  ;;  %v3146_v39 = vmul.f32 %v9842_v19, %v9842_v19  ;;  %v3106_v57 = vadd.f32 %v3105_v17, %v9842_v19  ;;  %7284 = vmatpush3.bf16.msra.mxu0 %v8399_v48  ;;  %v8403_v17 = vld [vmem:[#allocation8 + $0xc8] sm:$0xff]   ;;  %7837 = vmatprep.subr.bf16.mxu1 %v8401_v3 }
 0x24f   :  { %v8066_v46 = vadd.f32 %v8065_v45, %v9707_v51  ;;  %v8073_v15 = vadd.f32 %v7228_v10, %v9629_v32  ;;  %v8402_v45 = vld [vmem:[#allocation8 + $0x108] sm:$0xff]   ;;  %7838 = vmatpush3.bf16.msra.mxu1 %v8401_v3 }
 0x250   :  { %v3177_v47 = vadd.f32 %v3176_v29, %v3146_v39  ;;  %7285 = vmatprep.subr.bf16.mxu0 %v8402_v45 }
 0x251   :  { %vm3012_vm0 = vcmp.gt.f32.partialorder %v8066_v46, 0.0  ;;  %v3044_v11 = vmul.f32 0.2, %v8066_v46  ;;  %v8074_v18 = vadd.f32 %v8073_v15, %v9717_v30  ;;  %v7229_v41 = vpop.f32.mrb[140].mxu0 }
 0x252   :  { %v7230_v55 = vpop.f32.mrb[141].mxu0  ;;  %7286 = vmatpush3.bf16.msra.mxu0 %v8403_v17  ;;  %v8409_v17 = vld [vmem:[#allocation8 + $0x168] sm:$0xff]  }
 0x253   :  { %v9852_v61 = vsel %vm3012_vm0, %v8066_v46, %v3044_v11  ;;  %vm3013_vm1 = vcmp.gt.f32.partialorder %v8074_v18, 0.0  ;;  %v3045_v51 = vmul.f32 0.2, %v8074_v18  ;;  %v7231_v50 = vadd.f32 %v7230_v55, %v7229_v41  ;;  %v7232_v32 = vpop.f32.mrb[142].mxu0  ;;  %v8404_v11 = vld [vmem:[#allocation8 + $0x150] sm:$0xff]  }
 0x254   :  { %v3107_v31 = vadd.f32 %v3106_v57, %v9852_v61  ;;  %v3147_v53 = vmul.f32 %v9852_v61, %v9852_v61  ;;  %v7233_v30 = vpop.f32.mrb[143].mxu0  ;;  %v8407_v55 = vld [vmem:[#allocation8 + $0xd0] sm:$0xff]   ;;  %7839 = vmatprep.subr.bf16.mxu1 %v8404_v11 }
 0x255   :  { %v9857_v35 = vsel %vm3013_vm1, %v8074_v18, %v3045_v51  ;;  %v8061_v13 = vadd.f32 %v7231_v50, %v9618_v34  ;;  %v7234_v26 = vadd.f32 %v7233_v30, %v7232_v32  ;;  %v8406_v18 = vld [vmem:[#allocation8 + $0x110] sm:$0xff]   ;;  %7840 = vmatpush3.bf16.msra.mxu1 %v8404_v11  ;;  %v8408_v30 = vld [vmem:[#allocation8 + $0x160] sm:$0xff]  }
 0x256   :  { %v3178_v23 = vadd.f32 %v3177_v47, %v3147_v53  ;;  %v3108_v16 = vadd.f32 %v3107_v31, %v9857_v35  ;;  %v3148_v40 = vmul.f32 %v9857_v35, %v9857_v35  ;;  %7287 = vmatprep.subr.bf16.mxu0 %v8406_v18  ;;  %v8405_v53 = vld [vmem:[#allocation8 + $0x158] sm:$0xff]  }
 0x257   :  { %v8062_v10 = vadd.f32 %v8061_v13, %v9703_v63  ;;  %v8069_v1 = vadd.f32 %v7234_v26, %v9626_v9  ;;  %7288 = vmatpush3.bf16.msra.mxu0 %v8407_v55  ;;  %7841 = vmatprep.subr.bf16.mxu1 %v8405_v53 }
 0x258   :  { %v3179_v46 = vadd.f32 %v3178_v23, %v3148_v40  ;;  %v8410_v23 = vld [vmem:[#allocation8 + $0x118] sm:$0xff]   ;;  %v8412_v40 = vld [vmem:[#allocation8 + $0x120] sm:$0xff]  }
 0x259   :  { %vm3014_vm2 = vcmp.gt.f32.partialorder %v8062_v10, 0.0  ;;  %v3046_v34 = vmul.f32 0.2, %v8062_v10  ;;  %v8070_v15 = vadd.f32 %v8069_v1, %v9709_v37  ;;  %v7235_v29 = vpop.f32.mrb[144].mxu0  ;;  %7842 = vmatpush3.bf16.msra.mxu1 %v8405_v53  ;;  %7289 = vmatprep.subr.bf16.mxu0 %v8410_v23 }
 0x25a   :  { %v7236_v39 = vpop.f32.mrb[145].mxu0  ;;  %7843 = vmatprep.subr.bf16.mxu1 %v8408_v30 }
 0x25b   :  { %v9866_v41 = vsel %vm3014_vm2, %v8062_v10, %v3046_v34  ;;  %vm3015_vm3 = vcmp.gt.f32.partialorder %v8070_v15, 0.0  ;;  %v3047_v63 = vmul.f32 0.2, %v8070_v15  ;;  %v7237_v57 = vadd.f32 %v7236_v39, %v7235_v29  ;;  %v7238_v9 = vpop.f32.mrb[146].mxu0  ;;  %v8415_v29 = vld [vmem:[#allocation8 + $0x128] sm:$0xff]  }
 0x25c   :  { %v3109_v12 = vadd.f32 %v3108_v16, %v9866_v41  ;;  %v3149_v58 = vmul.f32 %v9866_v41, %v9866_v41  ;;  %v7239_v51 = vpop.f32.mrb[147].mxu0  ;;  %v8411_v16 = vld [vmem:[#allocation8 + $0xd8] sm:$0xff]  }
 0x25d   :  { %v9871_v37 = vsel %vm3015_vm3, %v8070_v15, %v3047_v63  ;;  %v8081_v50 = vadd.f32 %v7237_v57, %v9638_v60  ;;  %v7240_v32 = vadd.f32 %v7239_v51, %v7238_v9  ;;  %7290 = vmatpush3.bf16.msra.mxu0 %v8411_v16  ;;  %7844 = vmatpush3.bf16.msra.mxu1 %v8408_v30  ;;  %v8416_v51 = vld [vmem:[#allocation8 + $0xe8] sm:$0xff]  }
 0x25e   :  { %v3180_v48 = vadd.f32 %v3179_v46, %v3149_v58  ;;  %v3110_v47 = vadd.f32 %v3109_v12, %v9871_v37  ;;  %v3150_v31 = vmul.f32 %v9871_v37, %v9871_v37  ;;  %v8414_v46 = vld [vmem:[#allocation8 + $0xe0] sm:$0xff]   ;;  %7291 = vmatprep.subr.bf16.mxu0 %v8412_v40  ;;  %7845 = vmatprep.subr.bf16.mxu1 %v8409_v17  ;;  %v8413_v58 = vld [vmem:[#allocation8 + $0x170] sm:$0xff]   ;;  %v8420_v40 = vld [vmem:[#allocation8 + $0x138] sm:$0xff]  }
 0x25f   :  { %v8082_v13 = vadd.f32 %v8081_v50, %v9737_v5  ;;  %v8089_v26 = vadd.f32 %v7240_v32, %v9645_v22 }
 0x260   :  { %v3181_v3 = vadd.f32 %v3180_v48, %v3150_v31  ;;  %v8417_v48 = vld [vmem:[#allocation8 + $0x130] sm:$0xff]  }
 0x261   :  { %vm3016_vm6 = vcmp.gt.f32.partialorder %v8082_v13, 0.0  ;;  %v3048_v60 = vmul.f32 0.2, %v8082_v13  ;;  %v8090_v45 = vadd.f32 %v8089_v26, %v9745_v24  ;;  %v7241_v10 = vpop.f32.mrb[148].mxu0  ;;  %7292 = vmatpush3.bf16.msra.mxu0 %v8414_v46  ;;  %7846 = vmatpush3.bf16.msra.mxu1 %v8409_v17  ;;  %v8419_v26 = vld [vmem:[#allocation8 + $0xf0] sm:$0xff]  }
 0x262   :  { %v7242_v1 = vpop.f32.mrb[149].mxu0  ;;  %7293 = vmatprep.subr.bf16.mxu0 %v8415_v29  ;;  %7847 = vmatprep.subr.bf16.mxu1 %v8413_v58 }
 0x263   :  { %v9880_v5 = vsel %vm3016_vm6, %v8082_v13, %v3048_v60  ;;  %vm3017_vm7 = vcmp.gt.f32.partialorder %v8090_v45, 0.0  ;;  %v3049_v22 = vmul.f32 0.2, %v8090_v45  ;;  %v7243_v34 = vadd.f32 %v7242_v1, %v7241_v10  ;;  %v7244_v15 = vpop.f32.mrb[150].mxu0  ;;  %v8418_v13 = vld [vmem:[#allocation8 + $0x178] sm:$0xff]  }
 0x264   :  { %v3111_v39 = vadd.f32 %v3110_v47, %v9880_v5  ;;  %v3151_v24 = vmul.f32 %v9880_v5, %v9880_v5  ;;  %v7245_v11 = vpop.f32.mrb[151].mxu0 }
 0x265   :  { %v9885_v18 = vsel %vm3017_vm7, %v8090_v45, %v3049_v22  ;;  %v8077_v63 = vadd.f32 %v7243_v34, %v9634_v54  ;;  %v7246_v57 = vadd.f32 %v7245_v11, %v7244_v15  ;;  %7294 = vmatpush3.bf16.msra.mxu0 %v8416_v51  ;;  %7848 = vmatpush3.bf16.msra.mxu1 %v8413_v58  ;;  %v8421_v34 = vld [vmem:[#allocation8 + $0xf8] sm:$0xff]  }
 0x266   :  { %v3182_v9 = vadd.f32 %v3181_v3, %v3151_v24  ;;  %v3112_v55 = vadd.f32 %v3111_v39, %v9885_v18  ;;  %v3152_v12 = vmul.f32 %v9885_v18, %v9885_v18  ;;  %7295 = vmatprep.subr.bf16.mxu0 %v8417_v48  ;;  %7849 = vmatprep.subr.bf16.mxu1 %v8418_v13  ;;  %v9907_v24 = vld [vmem:[#allocation8 + $0x80] sm:$0xff]  }
 0x267   :  { %v8078_v50 = vadd.f32 %v8077_v63, %v9732_v49  ;;  %v8085_v32 = vadd.f32 %v7246_v57, %v9642_v42 }
 0x268   :  { %v3183_v47 = vadd.f32 %v3182_v9, %v3152_v12 }
 0x269   :  { %vm3018_vm9 = vcmp.gt.f32.partialorder %v8078_v50, 0.0  ;;  %v3050_v54 = vmul.f32 0.2, %v8078_v50  ;;  %v8086_v31 = vadd.f32 %v8085_v32, %v9742_v36  ;;  %v7247_v53 = vpop.f32.mrb[152].mxu0  ;;  %7296 = vmatpush3.bf16.msra.mxu0 %v8419_v26  ;;  %7850 = vmatpush3.bf16.msra.mxu1 %v8418_v13 }
 0x26a   :  { %v7248_v30 = vpop.f32.mrb[153].mxu0  ;;  %7297 = vmatprep.subr.bf16.mxu0 %v8420_v40  ;;  %7883 = vmatprep.subr.bf16.mxu1 %v9907_v24 }
 0x26b   :  { %v9894_v23 = vsel %vm3018_vm9, %v8078_v50, %v3050_v54  ;;  %vm3019_vm10 = vcmp.gt.f32.partialorder %v8086_v31, 0.0  ;;  %v3051_v49 = vmul.f32 0.2, %v8086_v31  ;;  %v7249_v16 = vadd.f32 %v7248_v30, %v7247_v53  ;;  %v7250_v42 = vpop.f32.mrb[154].mxu0  ;;  %v11463_v30 = vld [vmem:[#allocation18_spill] sm:$0xff] }
 0x26c   :  { %v3113_v3 = vadd.f32 %v3112_v55, %v9894_v23  ;;  %v3153_v36 = vmul.f32 %v9894_v23, %v9894_v23  ;;  %v7251_v60 = vpop.f32.mrb[155].mxu0 }
 0x26d   :  { %v9899_v45 = vsel %vm3019_vm10, %v8086_v31, %v3051_v49  ;;  %v8097_v10 = vadd.f32 %v7249_v16, %v9654_v38  ;;  %v7252_v1 = vadd.f32 %v7251_v60, %v7250_v42  ;;  %7298 = vmatpush3.bf16.msra.mxu0 %v8421_v34 }
 0x26e   :  { %v3184_v17 = vadd.f32 %v3183_v47, %v3153_v36  ;;  %v3114_v46 = vadd.f32 %v3113_v3, %v9899_v45  ;;  %v3154_v22 = vmul.f32 %v9899_v45, %v9899_v45 }
 0x26f   :  { %v8098_v15 = vadd.f32 %v8097_v10, %v9763_v52  ;;  %v8105_v29 = vadd.f32 %v7252_v1, %v9661_v28 }
 0x270   :  { %v3185_v39 = vadd.f32 %v3184_v17, %v3154_v22 }
 0x271   :  { %vm3020_vm11 = vcmp.gt.f32.partialorder %v8098_v15, 0.0  ;;  %v3052_v38 = vmul.f32 0.2, %v8098_v15  ;;  %v8106_v11 = vadd.f32 %v8105_v29, %v9771_v0  ;;  %v7253_v63 = vpop.f32.mrb[156].mxu0  ;;  %v11462_v0 = vld [vmem:[#allocation17_spill] sm:$0xff] }
 0x272   :  { %v7254_v57 = vpop.f32.mrb[157].mxu0 }
 0x273   :  { %v9911_v9 = vsel %vm3020_vm11, %v8098_v15, %v3052_v38  ;;  %vm3021_vm12 = vcmp.gt.f32.partialorder %v8106_v11, 0.0  ;;  %v3053_v52 = vmul.f32 0.2, %v8106_v11  ;;  %v7255_v55 = vadd.f32 %v7254_v57, %v7253_v63  ;;  %v7256_v28 = vpop.f32.mrb[158].mxu0  ;;  %v3727_v63 = vld [vmem:[#allocation2] sm:$0xf] }
 0x274   :  { %v3115_v12 = vadd.f32 %v3114_v46, %v9911_v9  ;;  %v3155_v58 = vmul.f32 %v9911_v9, %v9911_v9  ;;  %v7257_v51 = vpop.f32.mrb[159].mxu0  ;;  %v3728_v57 = vld [vmem:[#allocation2 + $0x4] sm:$0xf] }
 0x275   :  { %v9916_v50 = vsel %vm3021_vm12, %v8106_v11, %v3053_v52  ;;  %v8093_v32 = vadd.f32 %v7255_v55, %v11462_v0  ;;  %v7258_v48 = vadd.f32 %v7257_v51, %v7256_v28  ;;  %v3938_v28 = vshrl.u32 %v3727_v63, 16 }
 0x276   :  { %v3186_v47 = vadd.f32 %v3185_v39, %v3155_v58  ;;  %v3116_v54 = vadd.f32 %v3115_v12, %v9916_v50  ;;  %v3156_v31 = vmul.f32 %v9916_v50, %v9916_v50  ;;  %v3941_v12 = vshll.u32 %v3727_v63, 16 }
 0x277   :  { %v8094_v53 = vadd.f32 %v8093_v32, %v9760_v59  ;;  %v8101_v13 = vadd.f32 %v7258_v48, %v11463_v30  ;;  %v3947_v0 = vshll.u32 %v3728_v57, 16  ;;  %v3951_v32 = vshrl.u32 %v3728_v57, 16 }
 0x278   :  { %v3187_v26 = vadd.f32 %v3186_v47, %v3156_v31  ;;  %v3943_v30 = vrot.slane %v3941_v12, 5  ;;  %v3234_v12 = vld [vmem:[%s11391_s3] sm:$0x1] }
 0x279   :  { %vm3022_vm13 = vcmp.gt.f32.partialorder %v8094_v53, 0.0  ;;  %v3054_v49 = vmul.f32 0.2, %v8094_v53  ;;  %v8102_v16 = vadd.f32 %v8101_v13, %v9767_v43 }
 0x27b   :  { %v9925_v42 = vsel %vm3022_vm13, %v8094_v53, %v3054_v49  ;;  %vm3023_vm14 = vcmp.gt.f32.partialorder %v8102_v16, 0.0  ;;  %v3055_v40 = vmul.f32 0.2, %v8102_v16  ;;  %v3940_v53 = vrot.slane %v3938_v28, 4 }
 0x27c   :  { %v3117_v3 = vadd.f32 %v3116_v54, %v9925_v42  ;;  %v3157_v36 = vmul.f32 %v9925_v42, %v9925_v42  ;;  %v3953_v49 = vrot.slane %v3951_v32, 4 }
 0x27d   :  { %v9930_v60 = vsel %vm3023_vm14, %v8102_v16, %v3055_v40  ;;  %v3729_v16 = vld [vmem:[#allocation2 + $0x8] sm:$0x1] }
 0x27e   :  { %v3188_v10 = vadd.f32 %v3187_v26, %v3157_v36  ;;  %v3118_v59 = vadd.f32 %v3117_v3, %v9930_v60  ;;  %v3158_v1 = vmul.f32 %v9930_v60, %v9930_v60  ;;  %v3949_v26 = vrot.slane %v3947_v0, 5  ;;  %v11466_v0 = vld [vmem:[#allocation21_spill] sm:$0xff] }
 0x27f   :  { %v3944_v3 = vor.u32 %v3943_v30, %v3940_v53 }
 0x280   :  { %v3119_v17 = vrot.slane %v3118_v59, 4  ;;  %v3189_v46 = vadd.f32 %v3188_v10, %v3158_v1  ;;  %v3957_v1 = vshll.u32 %v3729_v16, 16 }
 0x282   :  { %v3120_v43 = vadd.f32 %v3119_v17, %v3118_v59  ;;  %v3190_v22 = vrot.slane %v3189_v46, 4  ;;  %v3954_v59 = vor.u32 %v3953_v49, %v3949_v26  ;;  %v3959_v63 = vrot.slane %v3957_v1, 5 }
 0x284   :  { %v3121_v34 = vrot.slane %v3120_v43, 2  ;;  %v3191_v15 = vadd.f32 %v3190_v22, %v3189_v46 }
 0x286   :  { %v3122_v29 = vadd.f32 %v3121_v34, %v3120_v43  ;;  %v3192_v39 = vrot.slane %v3191_v15, 2 }
 0x288   :  { %v3123_v38 = vrot.slane %v3122_v29, 1  ;;  %v3193_v11 = vadd.f32 %v3192_v39, %v3191_v15  ;;  %v3236_v15 = vlaneseq }
 0x28a   :  { %v3124_v52 = vadd.f32 %v3123_v38, %v3122_v29  ;;  %v3194_v55 = vrot.slane %v3193_v11, 1  ;;  %v3945_v38 = vrot.slane %v3944_v3, 4  ;;  %v9963_v57 = vshrl.u32 %v3236_v15, 7 }
 0x28c   :  { %v9935_v58 = vmul.f32 0.00390625, %v3124_v52  ;;  %v3195_v51 = vadd.f32 %v3194_v55, %v3193_v11  ;;  %v3955_v11 = vrot.slane %v3954_v59, 4  ;;  %11464 = vst [vmem:[#allocation23_spill] sm:$0xff] %v9963_v57  ;;  %v3950_v55 = vsel %vm8798_vm5, %v3945_v38, %v3949_v26  ;;  %v11468_v26 = vld [vmem:[#allocation22_spill] sm:$0xff]  ;;  %v11470_v59 = vld [vmem:[#allocation19_spill] sm:$0xff] }
 0x28d   :  { %v8438_v52 = vld [vmem:[#allocation8 + $0x1c8] sm:$0xff]  }
 0x28e   :  { %v3196_v48 = vmul.f32 0.00390625, %v3195_v51  ;;  %v3197_v47 = vmul.f32 %v9935_v58, %v9935_v58  ;;  %v3230_v54 = vsub.f32 %v9925_v42, %v9935_v58  ;;  %v3231_v31 = vsub.f32 %v9930_v60, %v9935_v58 }
 0x28f   :  { %v3220_v10 = vsub.f32 %v9852_v61, %v9935_v58  ;;  %v3221_v42 = vsub.f32 %v9857_v35, %v9935_v58  ;;  %v3222_v60 = vsub.f32 %v9866_v41, %v9935_v58  ;;  %v3223_v17 = vsub.f32 %v9871_v37, %v9935_v58 }
 0x290   :  { %v3198_v13 = vsub.f32 %v3196_v48, %v3197_v47  ;;  %v3224_v46 = vsub.f32 %v9880_v5, %v9935_v58  ;;  %v3225_v43 = vsub.f32 %v9885_v18, %v9935_v58  ;;  %v3960_v28 = vsel %vm8798_vm5, %v3955_v11, %v3959_v63  ;;  %v11467_v48 = vld [vmem:[#allocation16_spill] sm:$0xff] }
 0x291   :  { %v11407_v51 = vsub.s32 0, %v9963_v57  ;;  %v3200_v32 = vsub.f32 %v11466_v0, %v9935_v58  ;;  %v3201_v47 = vsub.f32 %v11467_v48, %v9935_v58  ;;  %v9977_v53 = vcombine.low %v3950_v55, %v3960_v28 }
 0x292   :  { %v3199_v40 = vmax.f32 %v3198_v13, 0.0  ;;  %v3202_v13 = vsub.f32 %v9701_v44, %v9935_v58  ;;  %v3203_v49 = vsub.f32 %v11468_v26, %v9935_v58  ;;  %v3204_v16 = vsub.f32 %v9723_v62, %v9935_v58 }
 0x293   :  { %v3206_v1 = vsub.f32 %v11470_v59, %v9935_v58  ;;  %v3207_v15 = vsub.f32 %v9757_v20, %v9935_v58  ;;  %v3208_v38 = vsub.f32 %v9765_v2, %v9935_v58  ;;  %v3209_v44 = vsub.f32 %v9777_v6, %v9935_v58 }
 0x294   :  { %v3232_v36 = vadd.f32 1e-05, %v3199_v40  ;;  %v11469_v40 = vld [vmem:[#allocation26_spill] sm:$0xff]  ;;  %v3210_v11 = vsub.f32 %v9782_v56, %v9935_v58  ;;  %v3211_v62 = vsub.f32 %v9790_v4, %v9935_v58  ;;  %v3212_v63 = vsub.f32 %v9794_v7, %v9935_v58 }
 0x295   :  { %v3205_v3 = vsub.f32 %v11469_v40, %v9935_v58  ;;  %v3213_v20 = vsub.f32 %v9804_v8, %v9935_v58  ;;  %v3214_v2 = vsub.f32 %v9807_v27, %v9935_v58  ;;  %v3215_v6 = vsub.f32 %v9817_v25, %v9935_v58  ;;  %v10012_v56 = vld [vmem:[%s11392_s4] ss:$0 sm:$0xff] }
 0x296   :  { %8488 = vrsqrt.f32 %v3232_v36  ;;  %v3216_v4 = vsub.f32 %v9821_v14, %v9935_v58  ;;  %v3217_v7 = vsub.f32 %v9829_v21, %v9935_v58  ;;  %v3218_v8 = vsub.f32 %v9837_v33, %v9935_v58 }
 0x297   :  { %v3219_v27 = vsub.f32 %v9842_v19, %v9935_v58  ;;  %v11471_v35 = vsub.f32 %v9894_v23, %v9935_v58  ;;  %v11472_v41 = vsub.f32 %v9899_v45, %v9935_v58  ;;  %v11473_v37 = vsub.f32 %v9911_v9, %v9935_v58 }
 0x298   :  { %v11474_v5 = vsub.f32 %v9916_v50, %v9935_v58 }
 0x2a0   :  { %v8489_v30 = vpop.eup %8488 }
 0x2a1   :  { %v3235_v36 = vmul.f32 %v8489_v30, %v3234_v12 }
 0x2a3   :  { %v3239_v55 = vrot.slane %v3235_v36, %v11407_v51 }
 0x2a5   :  { %v3270_v28 = vmul.f32 %v3239_v55, %v3230_v54  ;;  %v3271_v12 = vmul.f32 %v3239_v55, %v3231_v31  ;;  %v3240_v25 = vmul.f32 %v3239_v55, %v3200_v32  ;;  %v3241_v0 = vmul.f32 %v3239_v55, %v3201_v47 }
 0x2a6   :  { %v3242_v48 = vmul.f32 %v3239_v55, %v3202_v13  ;;  %v3243_v30 = vmul.f32 %v3239_v55, %v3203_v49  ;;  %v3244_v26 = vmul.f32 %v3239_v55, %v3204_v16  ;;  %v3245_v40 = vmul.f32 %v3239_v55, %v3205_v3 }
 0x2a7   :  { %v3309_v36 = vadd.f32 %v10012_v56, %v3270_v28  ;;  %v3310_v14 = vadd.f32 %v10012_v56, %v3271_v12  ;;  %v3246_v59 = vmul.f32 %v3239_v55, %v3206_v1  ;;  %v3247_v21 = vmul.f32 %v3239_v55, %v3207_v15 }
 0x2a8   :  { %v3248_v51 = vmul.f32 %v3239_v55, %v3208_v38  ;;  %v3249_v39 = vmul.f32 %v3239_v55, %v3209_v44  ;;  %v3250_v33 = vmul.f32 %v3239_v55, %v3210_v11  ;;  %v3251_v29 = vmul.f32 %v3239_v55, %v3211_v62 }
 0x2a9   :  { %v3326_v34 = vpack.c.bf16 %v3310_v14, %v3309_v36  ;;  %v3252_v19 = vmul.f32 %v3239_v55, %v3212_v63  ;;  %v3253_v54 = vmul.f32 %v3239_v55, %v3213_v20  ;;  %v3254_v31 = vmul.f32 %v3239_v55, %v3214_v2 }
 0x2aa   :  { %v3255_v32 = vmul.f32 %v3239_v55, %v3215_v6  ;;  %v3256_v47 = vmul.f32 %v3239_v55, %v3216_v4  ;;  %v3257_v13 = vmul.f32 %v3239_v55, %v3217_v7  ;;  %v3258_v49 = vmul.f32 %v3239_v55, %v3218_v8 }
 0x2ab   :  { %v3433_v16 = vshrl.u32 %v3326_v34, 16  ;;  %v3436_v3 = vshll.u32 %v3326_v34, 16  ;;  %v3259_v22 = vmul.f32 %v3239_v55, %v3219_v27  ;;  %v3260_v1 = vmul.f32 %v3239_v55, %v3220_v10 }
 0x2ac   :  { %v3261_v15 = vmul.f32 %v3239_v55, %v3221_v42  ;;  %v3262_v38 = vmul.f32 %v3239_v55, %v3222_v60  ;;  %v3263_v44 = vmul.f32 %v3239_v55, %v3223_v17  ;;  %v3264_v34 = vmul.f32 %v3239_v55, %v3224_v46  ;;  %v8431_v60 = vld [vmem:[#allocation8 + $0x40] sm:$0xff]  }
 0x2ad   :  { %v3435_v11 = vrot.slane %v3433_v16, 7  ;;  %v3265_v61 = vmul.f32 %v3239_v55, %v3225_v43  ;;  %v3266_v10 = vmul.f32 %v3239_v55, %v11471_v35  ;;  %v3267_v42 = vmul.f32 %v3239_v55, %v11472_v41  ;;  %7419 = vmatprep.subr.bf16.mxu0 %v8431_v60 }
 0x2ae   :  { %v3268_v17 = vmul.f32 %v3239_v55, %v11473_v37  ;;  %v3269_v46 = vmul.f32 %v3239_v55, %v11474_v5  ;;  %v3279_v18 = vadd.f32 %v10012_v56, %v3240_v25  ;;  %v3280_v43 = vadd.f32 %v10012_v56, %v3241_v0 }
 0x2af   :  { %v3438_v62 = vor.u32 %v3436_v3, %v3435_v11  ;;  %v3502_v63 = vsel %vm8788_vm4, %v3435_v11, 0  ;;  %v3281_v45 = vadd.f32 %v10012_v56, %v3242_v48  ;;  %v3282_v20 = vadd.f32 %v10012_v56, %v3243_v30 }
 0x2b0   :  { %v6729_v2 = vcombine.low %v3502_v63, %v3502_v63  ;;  %v3283_v9 = vadd.f32 %v10012_v56, %v3244_v26  ;;  %v3284_v6 = vadd.f32 %v10012_v56, %v3245_v40  ;;  %v3285_v50 = vadd.f32 %v10012_v56, %v3246_v59 }
 0x2b1   :  { %v3486_v58 = vsel %vm8788_vm4, 0, %v3438_v62  ;;  %v3286_v55 = vadd.f32 %v10012_v56, %v3247_v21  ;;  %v3287_v4 = vadd.f32 %v10012_v56, %v3248_v51  ;;  %v3288_v7 = vadd.f32 %v10012_v56, %v3249_v39 }
 0x2b2   :  { %v6727_v8 = vcombine.low %v3486_v58, %v3486_v58  ;;  %v6728_v27 = vcombine.high %v3486_v58, %v3486_v58  ;;  %3726 = vst [vmem:[#allocation2 + $0xc8] sm:$0x1] %v6729_v2  ;;  %v3289_v28 = vadd.f32 %v10012_v56, %v3250_v33  ;;  %v3290_v12 = vadd.f32 %v10012_v56, %v3251_v29 }
 0x2b3   :  { %v3291_v25 = vadd.f32 %v10012_v56, %v3252_v19  ;;  %v3292_v0 = vadd.f32 %v10012_v56, %v3253_v54  ;;  %v3293_v48 = vadd.f32 %v10012_v56, %v3254_v31  ;;  %v3294_v30 = vadd.f32 %v10012_v56, %v3255_v32 }
 0x2b4   :  { %3724 = vst [vmem:[#allocation2 + $0xc0] sm:$0xf] %v6727_v8  ;;  %3725 = vst [vmem:[#allocation2 + $0xc4] sm:$0xf] %v6728_v27  ;;  %v3295_v51 = vadd.f32 %v10012_v56, %v3256_v47  ;;  %v3296_v39 = vadd.f32 %v10012_v56, %v3257_v13  ;;  %v3297_v26 = vadd.f32 %v10012_v56, %v3258_v49 }
 0x2b5   :  { %v3298_v40 = vadd.f32 %v10012_v56, %v3259_v22  ;;  %v3299_v29 = vadd.f32 %v10012_v56, %v3260_v1  ;;  %v3300_v36 = vadd.f32 %v10012_v56, %v3261_v15  ;;  %v3301_v14 = vadd.f32 %v10012_v56, %v3262_v38 }
 0x2b6   :  { %v3302_v59 = vadd.f32 %v10012_v56, %v3263_v44  ;;  %v3303_v21 = vadd.f32 %v10012_v56, %v3264_v34  ;;  %v3304_v33 = vadd.f32 %v10012_v56, %v3265_v61  ;;  %v3305_v19 = vadd.f32 %v10012_v56, %v3266_v10 }
 0x2b7   :  { %v3306_v54 = vadd.f32 %v10012_v56, %v3267_v42  ;;  %v3307_v31 = vadd.f32 %v10012_v56, %v3268_v17  ;;  %v3308_v22 = vadd.f32 %v10012_v56, %v3269_v46  ;;  %v3311_v32 = vpack.c.bf16 %v3280_v43, %v3279_v18 }
 0x2b8   :  { %v3312_v47 = vpack.c.bf16 %v3282_v20, %v3281_v45  ;;  %v3313_v13 = vpack.c.bf16 %v3284_v6, %v3283_v9  ;;  %v3314_v49 = vpack.c.bf16 %v3286_v55, %v3285_v50  ;;  %v3315_v16 = vpack.c.bf16 %v3288_v7, %v3287_v4 }
 0x2b9   :  { %v3316_v3 = vpack.c.bf16 %v3290_v12, %v3289_v28  ;;  %v3317_v1 = vpack.c.bf16 %v3292_v0, %v3291_v25  ;;  %v3318_v15 = vpack.c.bf16 %v3294_v30, %v3293_v48  ;;  %v3319_v38 = vpack.c.bf16 %v3296_v39, %v3295_v51 }
 0x2ba   :  { %v3320_v44 = vpack.c.bf16 %v3298_v40, %v3297_v26  ;;  %v3321_v34 = vpack.c.bf16 %v3300_v36, %v3299_v29  ;;  %v3322_v11 = vpack.c.bf16 %v3302_v59, %v3301_v14  ;;  %v10088_v61 = vpack.c.bf16 %v3304_v33, %v3303_v21 }
 0x2bb   :  { %v10090_v35 = vpack.c.bf16 %v3306_v54, %v3305_v19  ;;  %v10092_v10 = vpack.c.bf16 %v3308_v22, %v3307_v31  ;;  %v3328_v41 = vshrl.u32 %v3311_v32, 16  ;;  %v3331_v56 = vshll.u32 %v3311_v32, 16 }
 0x2bc   :  { %v3335_v42 = vshrl.u32 %v3312_v47, 16  ;;  %v3338_v60 = vshll.u32 %v3312_v47, 16  ;;  %v3342_v37 = vshrl.u32 %v3313_v13, 16  ;;  %v3345_v17 = vshll.u32 %v3313_v13, 16 }
 0x2bd   :  { %v3349_v5 = vshrl.u32 %v3314_v49, 16  ;;  %v10094_v46 = vrot.slane %v3328_v41, 7  ;;  %v3352_v43 = vshll.u32 %v3314_v49, 16  ;;  %v3356_v62 = vshrl.u32 %v3315_v16, 16 }
 0x2be   :  { %v10096_v18 = vrot.slane %v3335_v42, 7  ;;  %v10098_v63 = vrot.slane %v3342_v37, 7  ;;  %v3359_v20 = vshll.u32 %v3315_v16, 16  ;;  %v3363_v2 = vshrl.u32 %v3316_v3, 16 }
 0x2bf   :  { %v10100_v45 = vrot.slane %v3349_v5, 7  ;;  %v3333_v9 = vor.u32 %v3331_v56, %v10094_v46  ;;  %v3358_v50 = vrot.slane %v3356_v62, 7  ;;  %v3366_v58 = vshll.u32 %v3316_v3, 16 }
 0x2c0   :  { %v3340_v6 = vor.u32 %v3338_v60, %v10096_v18  ;;  %v3347_v55 = vor.u32 %v3345_v17, %v10098_v63  ;;  %v3365_v7 = vrot.slane %v3363_v2, 7  ;;  %v3370_v8 = vshrl.u32 %v3317_v1, 16 }
 0x2c1   :  { %v3354_v4 = vor.u32 %v3352_v43, %v10100_v45  ;;  %v3361_v27 = vor.u32 %v3359_v20, %v3358_v50  ;;  %v3373_v28 = vshll.u32 %v3317_v1, 16  ;;  %v3377_v12 = vshrl.u32 %v3318_v15, 16 }
 0x2c2   :  { %v3380_v25 = vshll.u32 %v3318_v15, 16  ;;  %v3368_v0 = vor.u32 %v3366_v58, %v3365_v7  ;;  %v3372_v48 = vrot.slane %v3370_v8, 7  ;;  %v3384_v30 = vshrl.u32 %v3319_v38, 16 }
 0x2c3   :  { %v3387_v51 = vshll.u32 %v3319_v38, 16  ;;  %v3379_v39 = vrot.slane %v3377_v12, 7  ;;  %v3391_v26 = vshrl.u32 %v3320_v44, 16  ;;  %v3394_v40 = vshll.u32 %v3320_v44, 16 }
 0x2c4   :  { %v3398_v29 = vshrl.u32 %v3321_v34, 16  ;;  %v3375_v36 = vor.u32 %v3373_v28, %v3372_v48  ;;  %v3386_v14 = vrot.slane %v3384_v30, 7  ;;  %v3401_v59 = vshll.u32 %v3321_v34, 16 }
 0x2c5   :  { %v3405_v21 = vshrl.u32 %v3322_v11, 16  ;;  %v3382_v33 = vor.u32 %v3380_v25, %v3379_v39  ;;  %v3393_v19 = vrot.slane %v3391_v26, 7  ;;  %v3408_v31 = vshll.u32 %v3322_v11, 16 }
 0x2c6   :  { %v3400_v54 = vrot.slane %v3398_v29, 7  ;;  %v3389_v22 = vor.u32 %v3387_v51, %v3386_v14  ;;  %v3412_v47 = vshrl.u32 %v10088_v61, 16  ;;  %v3415_v13 = vshll.u32 %v10088_v61, 16 }
 0x2c7   :  { %v3407_v32 = vrot.slane %v3405_v21, 7  ;;  %v3396_v49 = vor.u32 %v3394_v40, %v3393_v19  ;;  %v3419_v3 = vshrl.u32 %v10090_v35, 16  ;;  %v3422_v1 = vshll.u32 %v10090_v35, 16 }
 0x2c8   :  { %v3403_v16 = vor.u32 %v3401_v59, %v3400_v54  ;;  %v3414_v38 = vrot.slane %v3412_v47, 7  ;;  %v3426_v44 = vshrl.u32 %v10092_v10, 16  ;;  %v3429_v34 = vshll.u32 %v10092_v10, 16 }
 0x2c9   :  { %v3410_v15 = vor.u32 %v3408_v31, %v3407_v32  ;;  %v3421_v41 = vrot.slane %v3419_v3, 7  ;;  %v3471_v11 = vsel %vm8788_vm4, 0, %v3333_v9  ;;  %v3472_v56 = vsel %vm8788_vm4, 0, %v3340_v6 }
 0x2ca   :  { %v3473_v61 = vsel %vm8788_vm4, 0, %v3347_v55  ;;  %v3417_v42 = vor.u32 %v3415_v13, %v3414_v38  ;;  %v3428_v60 = vrot.slane %v3426_v44, 7  ;;  %v3474_v35 = vsel %vm8788_vm4, 0, %v3354_v4 }
 0x2cb   :  { %v10122_v37 = vsel %vm8788_vm4, 0, %v3361_v27  ;;  %v3424_v10 = vor.u32 %v3422_v1, %v3421_v41  ;;  %v10126_v17 = vsel %vm8788_vm4, 0, %v3368_v0  ;;  %v10130_v5 = vsel %vm8788_vm4, 0, %v3375_v36 }
 0x2cc   :  { %v10134_v43 = vsel %vm8788_vm4, 0, %v3382_v33  ;;  %v3431_v62 = vor.u32 %v3429_v34, %v3428_v60  ;;  %v10138_v20 = vsel %vm8788_vm4, 0, %v3389_v22  ;;  %v10142_v2 = vsel %vm8788_vm4, 0, %v3396_v49 }
 0x2cd   :  { %v10146_v9 = vsel %vm8788_vm4, 0, %v3403_v16  ;;  %v10150_v6 = vsel %vm8788_vm4, 0, %v3410_v15  ;;  %v10154_v58 = vsel %vm8788_vm4, 0, %v3417_v42  ;;  %v10158_v55 = vsel %vm8788_vm4, 0, %v3424_v10 }
 0x2ce   :  { %v3487_v4 = vsel %vm8788_vm4, %v10094_v46, 0  ;;  %v10165_v8 = vsel %vm8788_vm4, 0, %v3431_v62  ;;  %v3488_v27 = vsel %vm8788_vm4, %v10096_v18, 0  ;;  %v3489_v28 = vsel %vm8788_vm4, %v10098_v63, 0 }
 0x2cf   :  { %v3490_v12 = vsel %vm8788_vm4, %v10100_v45, 0  ;;  %v3491_v25 = vsel %vm8788_vm4, %v3358_v50, 0  ;;  %v3492_v46 = vsel %vm8788_vm4, %v3365_v7, 0  ;;  %v3493_v0 = vsel %vm8788_vm4, %v3372_v48, 0 }
 0x2d0   :  { %v10184_v18 = vsel %vm8788_vm4, %v3379_v39, 0  ;;  %v10188_v63 = vsel %vm8788_vm4, %v3386_v14, 0  ;;  %v10192_v45 = vsel %vm8788_vm4, %v3393_v19, 0  ;;  %v10196_v50 = vsel %vm8788_vm4, %v3400_v54, 0 }
 0x2d1   :  { %v10200_v7 = vsel %vm8788_vm4, %v3407_v32, 0  ;;  %v10204_v48 = vsel %vm8788_vm4, %v3414_v38, 0  ;;  %v10208_v30 = vsel %vm8788_vm4, %v3421_v41, 0  ;;  %v10212_v51 = vsel %vm8788_vm4, %v3428_v60, 0 }
 0x2d2   :  { %v6682_v39 = vcombine.low %v3471_v11, %v3471_v11  ;;  %v6683_v26 = vcombine.high %v3471_v11, %v3471_v11  ;;  %v6684_v40 = vcombine.low %v3487_v4, %v3487_v4  ;;  %v6685_v29 = vcombine.low %v3472_v56, %v3472_v56 }
 0x2d3   :  { %v6686_v36 = vcombine.high %v3472_v56, %v3472_v56  ;;  %v6687_v14 = vcombine.low %v3488_v27, %v3488_v27  ;;  %v6688_v59 = vcombine.low %v3473_v61, %v3473_v61  ;;  %v6689_v21 = vcombine.high %v3473_v61, %v3473_v61 }
 0x2d4   :  { %v6690_v33 = vcombine.low %v3489_v28, %v3489_v28  ;;  %3679 = vst [vmem:[#allocation2 + $0xc] sm:$0xf] %v6682_v39  ;;  %v6691_v19 = vcombine.low %v3474_v35, %v3474_v35  ;;  %v6692_v54 = vcombine.high %v3474_v35, %v3474_v35  ;;  %v6693_v31 = vcombine.low %v3490_v12, %v3490_v12 }
 0x2d5   :  { %v6694_v22 = vcombine.low %v10122_v37, %v10122_v37  ;;  %3680 = vst [vmem:[#allocation2 + $0x10] sm:$0xf] %v6683_v26  ;;  %3681 = vst [vmem:[#allocation2 + $0x14] sm:$0x1] %v6684_v40  ;;  %v6695_v23 = vcombine.high %v10122_v37, %v10122_v37  ;;  %v6696_v32 = vcombine.low %v3491_v25, %v3491_v25 }
 0x2d6   :  { %3682 = vst [vmem:[#allocation2 + $0x18] sm:$0xf] %v6685_v29  ;;  %3683 = vst [vmem:[#allocation2 + $0x1c] sm:$0xf] %v6686_v36  ;;  %v6697_v47 = vcombine.low %v10126_v17, %v10126_v17  ;;  %v6698_v13 = vcombine.high %v10126_v17, %v10126_v17  ;;  %v6699_v49 = vcombine.low %v3492_v46, %v3492_v46 }
 0x2d7   :  { %3684 = vst [vmem:[#allocation2 + $0x20] sm:$0x1] %v6687_v14  ;;  %3685 = vst [vmem:[#allocation2 + $0x24] sm:$0xf] %v6688_v59  ;;  %v6700_v16 = vcombine.low %v10130_v5, %v10130_v5  ;;  %v6701_v3 = vcombine.high %v10130_v5, %v10130_v5  ;;  %v6702_v1 = vcombine.low %v3493_v0, %v3493_v0 }
 0x2d8   :  { %3686 = vst [vmem:[#allocation2 + $0x28] sm:$0xf] %v6689_v21  ;;  %3687 = vst [vmem:[#allocation2 + $0x2c] sm:$0x1] %v6690_v33  ;;  %v6703_v15 = vcombine.low %v10134_v43, %v10134_v43  ;;  %v6704_v38 = vcombine.high %v10134_v43, %v10134_v43  ;;  %v6705_v44 = vcombine.low %v10184_v18, %v10184_v18 }
 0x2d9   :  { %3688 = vst [vmem:[#allocation2 + $0x30] sm:$0xf] %v6691_v19  ;;  %3689 = vst [vmem:[#allocation2 + $0x34] sm:$0xf] %v6692_v54  ;;  %v6706_v34 = vcombine.low %v10138_v20, %v10138_v20  ;;  %v6707_v41 = vcombine.high %v10138_v20, %v10138_v20  ;;  %v6708_v11 = vcombine.low %v10188_v63, %v10188_v63 }
 0x2da   :  { %3690 = vst [vmem:[#allocation2 + $0x38] sm:$0x1] %v6693_v31  ;;  %3691 = vst [vmem:[#allocation2 + $0x3c] sm:$0xf] %v6694_v22  ;;  %v6709_v56 = vcombine.low %v10142_v2, %v10142_v2  ;;  %v6710_v61 = vcombine.high %v10142_v2, %v10142_v2  ;;  %v6711_v42 = vcombine.low %v10192_v45, %v10192_v45 }
 0x2db   :  { %3692 = vst [vmem:[#allocation2 + $0x40] sm:$0xf] %v6695_v23  ;;  %3693 = vst [vmem:[#allocation2 + $0x44] sm:$0x1] %v6696_v32  ;;  %v6712_v60 = vcombine.low %v10146_v9, %v10146_v9  ;;  %v6713_v35 = vcombine.high %v10146_v9, %v10146_v9  ;;  %v6714_v37 = vcombine.low %v10196_v50, %v10196_v50  ;;  %v3730_v62 = vld [vmem:[#allocation2 + $0xc] sm:$0xf] }
 0x2dc   :  { %3694 = vst [vmem:[#allocation2 + $0x48] sm:$0xf] %v6697_v47  ;;  %3695 = vst [vmem:[#allocation2 + $0x4c] sm:$0xf] %v6698_v13  ;;  %v6715_v10 = vcombine.low %v10150_v6, %v10150_v6  ;;  %v6716_v17 = vcombine.high %v10150_v6, %v10150_v6  ;;  %v6717_v5 = vcombine.low %v10200_v7, %v10200_v7  ;;  %v3731_v4 = vld [vmem:[#allocation2 + $0x10] sm:$0xf] }
 0x2dd   :  { %3696 = vst [vmem:[#allocation2 + $0x50] sm:$0x1] %v6699_v49  ;;  %3697 = vst [vmem:[#allocation2 + $0x54] sm:$0xf] %v6700_v16  ;;  %v6718_v43 = vcombine.low %v10154_v58, %v10154_v58  ;;  %v6719_v20 = vcombine.high %v10154_v58, %v10154_v58  ;;  %v6720_v2 = vcombine.low %v10204_v48, %v10204_v48  ;;  %v3732_v27 = vld [vmem:[#allocation2 + $0x14] sm:$0x1] }
 0x2de   :  { %3698 = vst [vmem:[#allocation2 + $0x58] sm:$0xf] %v6701_v3  ;;  %3699 = vst [vmem:[#allocation2 + $0x5c] sm:$0x1] %v6702_v1  ;;  %v6721_v9 = vcombine.low %v10158_v55, %v10158_v55  ;;  %v6722_v6 = vcombine.high %v10158_v55, %v10158_v55  ;;  %v10266_v28 = vld [vmem:[#allocation2 + $0x18] sm:$0xf]  ;;  %v6723_v58 = vcombine.low %v10208_v30, %v10208_v30 }
 0x2df   :  { %3700 = vst [vmem:[#allocation2 + $0x60] sm:$0xf] %v6703_v15  ;;  %3701 = vst [vmem:[#allocation2 + $0x64] sm:$0xf] %v6704_v38  ;;  %v6724_v12 = vcombine.low %v10165_v8, %v10165_v8  ;;  %v6725_v25 = vcombine.high %v10165_v8, %v10165_v8  ;;  %v6726_v55 = vcombine.low %v10212_v51, %v10212_v51  ;;  %v10276_v46 = vld [vmem:[#allocation2 + $0x1c] sm:$0xf] }
 0x2e0   :  { %3702 = vst [vmem:[#allocation2 + $0x68] sm:$0x1] %v6705_v44  ;;  %3703 = vst [vmem:[#allocation2 + $0x6c] sm:$0xf] %v6706_v34  ;;  %v3962_v0 = vshrl.u32 %v3730_v62, 16  ;;  %v3965_v18 = vshll.u32 %v3730_v62, 16 }
 0x2e1   :  { %3704 = vst [vmem:[#allocation2 + $0x70] sm:$0xf] %v6707_v41  ;;  %3705 = vst [vmem:[#allocation2 + $0x74] sm:$0x1] %v6708_v11  ;;  %v3971_v63 = vshll.u32 %v3731_v4, 16  ;;  %v3975_v45 = vshrl.u32 %v3731_v4, 16 }
 0x2e2   :  { %3706 = vst [vmem:[#allocation2 + $0x78] sm:$0xf] %v6709_v56  ;;  %3707 = vst [vmem:[#allocation2 + $0x7c] sm:$0xf] %v6710_v61  ;;  %v3735_v50 = vld [vmem:[#allocation2 + $0x20] sm:$0x1] }
 0x2e3   :  { %3708 = vst [vmem:[#allocation2 + $0x80] sm:$0x1] %v6711_v42  ;;  %3709 = vst [vmem:[#allocation2 + $0x84] sm:$0xf] %v6712_v60  ;;  %v3981_v8 = vshll.u32 %v3732_v27, 16  ;;  %v3986_v7 = vshrl.u32 %v10266_v28, 16 }
 0x2e4   :  { %3710 = vst [vmem:[#allocation2 + $0x88] sm:$0xf] %v6713_v35  ;;  %3711 = vst [vmem:[#allocation2 + $0x8c] sm:$0x1] %v6714_v37  ;;  %v3989_v48 = vshll.u32 %v10266_v28, 16  ;;  %v3995_v30 = vshll.u32 %v10276_v46, 16 }
 0x2e5   :  { %3712 = vst [vmem:[#allocation2 + $0x90] sm:$0xf] %v6715_v10  ;;  %3713 = vst [vmem:[#allocation2 + $0x94] sm:$0xf] %v6716_v17  ;;  %v10281_v51 = vld [vmem:[#allocation2 + $0x24] sm:$0xf] }
 0x2e6   :  { %3714 = vst [vmem:[#allocation2 + $0x98] sm:$0x1] %v6717_v5  ;;  %3715 = vst [vmem:[#allocation2 + $0x9c] sm:$0xf] %v6718_v43  ;;  %v3964_v39 = vrot.slane %v3962_v0, 4  ;;  %v3967_v26 = vrot.slane %v3965_v18, 5 }
 0x2e7   :  { %3716 = vst [vmem:[#allocation2 + $0xa0] sm:$0xf] %v6719_v20  ;;  %3717 = vst [vmem:[#allocation2 + $0xa4] sm:$0x1] %v6720_v2  ;;  %v3973_v40 = vrot.slane %v3971_v63, 5  ;;  %v3977_v29 = vrot.slane %v3975_v45, 4 }
 0x2e8   :  { %3718 = vst [vmem:[#allocation2 + $0xa8] sm:$0xf] %v6721_v9  ;;  %3719 = vst [vmem:[#allocation2 + $0xac] sm:$0xf] %v6722_v6  ;;  %v10283_v36 = vld [vmem:[#allocation2 + $0x28] sm:$0xf]  ;;  %v3968_v19 = vor.u32 %v3967_v26, %v3964_v39 }
 0x2e9   :  { %3720 = vst [vmem:[#allocation2 + $0xb0] sm:$0x1] %v6723_v58  ;;  %3721 = vst [vmem:[#allocation2 + $0xb4] sm:$0xf] %v6724_v12  ;;  %v3983_v14 = vrot.slane %v3981_v8, 5  ;;  %v3988_v59 = vrot.slane %v3986_v7, 4  ;;  %v3978_v54 = vor.u32 %v3977_v29, %v3973_v40 }
 0x2ea   :  { %3722 = vst [vmem:[#allocation2 + $0xb8] sm:$0xf] %v6725_v25  ;;  %3723 = vst [vmem:[#allocation2 + $0xbc] sm:$0x1] %v6726_v55  ;;  %v3991_v21 = vrot.slane %v3989_v48, 5  ;;  %v3997_v33 = vrot.slane %v3995_v30, 5 }
 0x2eb   :  { %v3999_v31 = vshrl.u32 %v10276_v46, 16  ;;  %v4005_v22 = vshll.u32 %v3735_v50, 16  ;;  %v4010_v32 = vshrl.u32 %v10281_v51, 16  ;;  %v4013_v47 = vshll.u32 %v10281_v51, 16  ;;  %v3738_v15 = vld [vmem:[#allocation2 + $0x2c] sm:$0x1] }
 0x2ec   :  { %v3992_v23 = vor.u32 %v3991_v21, %v3988_v59  ;;  %v4019_v13 = vshll.u32 %v10283_v36, 16  ;;  %v3969_v49 = vrot.slane %v3968_v19, 4  ;;  %v3979_v16 = vrot.slane %v3978_v54, 4  ;;  %v10289_v11 = vld [vmem:[#allocation2 + $0x30] sm:$0xf]  ;;  %v8432_v43 = vld [vmem:[#allocation8] sm:$0xff]  }
 0x2ed   :  { %v4001_v3 = vrot.slane %v3999_v31, 4  ;;  %v4007_v1 = vrot.slane %v4005_v22, 5  ;;  %v4012_v44 = vrot.slane %v4010_v32, 4  ;;  %v4015_v34 = vrot.slane %v4013_v47, 5  ;;  %v10296_v35 = vld [vmem:[#allocation2 + $0x34] sm:$0xf] }
 0x2ee   :  { %v3993_v38 = vrot.slane %v3992_v23, 4  ;;  %v4021_v41 = vrot.slane %v4019_v13, 5  ;;  %v3974_v56 = vsel %vm8798_vm5, %v3969_v49, %v3973_v40  ;;  %v3984_v61 = vsel %vm8798_vm5, %v3979_v16, %v3983_v14  ;;  %v8441_v62 = vld [vmem:[#allocation8 + $0x48] sm:$0xff]   ;;  %v3741_v9 = vld [vmem:[#allocation2 + $0x38] sm:$0x1]  ;;  %v8451_v59 = vld [vmem:[#allocation8 + $0x50] sm:$0xff]  }
 0x2ef   :  { %v4002_v42 = vor.u32 %v4001_v3, %v3997_v33  ;;  %v4023_v60 = vshrl.u32 %v10283_v36, 16  ;;  %v10298_v37 = vcombine.low %v3974_v56, %v3984_v61  ;;  %v4016_v17 = vor.u32 %v4015_v34, %v4012_v44  ;;  %v10307_v55 = vld [vmem:[#allocation2 + $0x3c] sm:$0xf]  ;;  %v10312_v50 = vld [vmem:[#allocation2 + $0x40] sm:$0xf]  ;;  %v8452_v61 = vld [vmem:[#allocation8 + $0x10] sm:$0xff]  }
 0x2f0   :  { %v3998_v10 = vsel %vm8798_vm5, %v3993_v38, %v3997_v33  ;;  %v4029_v5 = vshll.u32 %v3738_v15, 16  ;;  %v4034_v6 = vshrl.u32 %v10289_v11, 16  ;;  %v4037_v4 = vshll.u32 %v10289_v11, 16  ;;  %v8442_v39 = vld [vmem:[#allocation8 + $0x8] sm:$0xff]   ;;  %v10324_v31 = vld [vmem:[#allocation2 + $0x48] sm:$0xf] }
 0x2f1   :  { %v4003_v20 = vrot.slane %v4002_v42, 4  ;;  %v4025_v2 = vrot.slane %v4023_v60, 4  ;;  %4666 = vmatprep.mubr.bf16.mxu0 %v10298_v37  ;;  %v4017_v27 = vrot.slane %v4016_v17, 4  ;;  %v4043_v12 = vshll.u32 %v10296_v35, 16  ;;  %v3744_v14 = vld [vmem:[#allocation2 + $0x44] sm:$0x1] }
 0x2f2   :  { %v4031_v58 = vrot.slane %v4029_v5, 5  ;;  %v4047_v25 = vshrl.u32 %v10296_v35, 16  ;;  %4667 = vmatmul.mubr.bf16.vlgmr.msra.gmra.mrb[160].mxu0 %v9977_v53  ;;  %v4036_v63 = vrot.slane %v4034_v6, 4  ;;  %v4039_v45 = vrot.slane %v4037_v4, 5  ;;  %v10328_v13 = vld [vmem:[#allocation2 + $0x4c] sm:$0xf] }
 0x2f3   :  { %v4008_v0 = vsel %vm8798_vm5, %v4003_v20, %v4007_v1  ;;  %v4026_v18 = vor.u32 %v4025_v2, %v4021_v41  ;;  %v4022_v7 = vsel %vm8798_vm5, %v4017_v27, %v4021_v41  ;;  %v4045_v48 = vrot.slane %v4043_v12, 5  ;;  %7420 = vmatpush3.bf16.msra.mxu0 %v8432_v43  ;;  %v8423_v15 = vld [vmem:[#allocation8 + $0x88] sm:$0xff]   ;;  %v3747_v41 = vld [vmem:[#allocation2 + $0x50] sm:$0x1]  ;;  %v10340_v5 = vld [vmem:[#allocation2 + $0x54] sm:$0xf] }
 0x2f4   :  { %v10314_v8 = vcombine.low %v3998_v10, %v4008_v0  ;;  %v4049_v30 = vrot.slane %v4047_v25, 4  ;;  %v4040_v40 = vor.u32 %v4039_v45, %v4036_v63  ;;  %v4053_v29 = vshll.u32 %v3741_v9, 16  ;;  %7421 = vmatprep.subr.bf16.mxu0 %v8441_v62  ;;  %v8461_v43 = vld [vmem:[#allocation8 + $0x58] sm:$0xff]   ;;  %v10346_v6 = vld [vmem:[#allocation2 + $0x58] sm:$0xf]  ;;  %v8424_v4 = vld [vmem:[#allocation8 + $0x90] sm:$0xff]  }
 0x2f5   :  { %v4027_v26 = vrot.slane %v4026_v18, 4  ;;  %v4058_v53 = vshrl.u32 %v10307_v55, 16  ;;  %v4061_v33 = vshll.u32 %v10307_v55, 16  ;;  %v4067_v19 = vshll.u32 %v10312_v50, 16  ;;  %v10350_v0 = vld [vmem:[#allocation2 + $0x5c] sm:$0x1] }
 0x2f6   :  { %7851 = vmatprep.mubr.bf16.mxu1 %v10314_v8  ;;  %4674 = vmatprep.mubr.bf16.mxu0 %v10314_v8  ;;  %v4050_v21 = vor.u32 %v4049_v30, %v4045_v48  ;;  %v4071_v54 = vshrl.u32 %v10312_v50, 16  ;;  %v4041_v23 = vrot.slane %v4040_v40, 4  ;;  %v4055_v32 = vrot.slane %v4053_v29, 5  ;;  %v8462_v45 = vld [vmem:[#allocation8 + $0x18] sm:$0xff]   ;;  %v8463_v40 = vld [vmem:[#allocation8 + $0x60] sm:$0xff]  }
 0x2f7   :  { %v4032_v22 = vsel %vm8798_vm5, %v4027_v26, %v4031_v58  ;;  %v4060_v47 = vrot.slane %v4058_v53, 4  ;;  %v4063_v3 = vrot.slane %v4061_v33, 5  ;;  %v4069_v1 = vrot.slane %v4067_v19, 5  ;;  %7422 = vmatpush3.bf16.msra.mxu0 %v8442_v39  ;;  %v10358_v26 = vld [vmem:[#allocation2 + $0x60] sm:$0xf] }
 0x2f8   :  { %v10330_v49 = vcombine.low %v4022_v7, %v4032_v22  ;;  %v4051_v16 = vrot.slane %v4050_v21, 4  ;;  %v4046_v38 = vsel %vm8798_vm5, %v4041_v23, %v4045_v48  ;;  %v4073_v44 = vrot.slane %v4071_v54, 4  ;;  %7423 = vmatprep.subr.bf16.mxu0 %v8451_v59  ;;  %v10362_v21 = vld [vmem:[#allocation2 + $0x64] sm:$0xf]  ;;  %v8425_v23 = vld [vmem:[#allocation8 + $0x98] sm:$0xff]  }
 0x2f9   :  { %v4077_v34 = vshll.u32 %v3744_v14, 16  ;;  %v4082_v56 = vshrl.u32 %v10324_v31, 16  ;;  %v4064_v60 = vor.u32 %v4063_v3, %v4060_v47  ;;  %v4085_v10 = vshll.u32 %v10324_v31, 16 }
 0x2fa   :  { %7852 = vmatmul.mubr.bf16.vlgmr.msra.gmra.mrb[96].mxu1 %v10330_v49  ;;  %v4056_v42 = vsel %vm8798_vm5, %v4051_v16, %v4055_v32  ;;  %v4091_v17 = vshll.u32 %v10328_v13, 16  ;;  %4675 = vmatmul.mubr.bf16.gmra.mrb[164].mxu0 %v10298_v37  ;;  %v4074_v20 = vor.u32 %v4073_v44, %v4069_v1  ;;  %v4095_v25 = vshrl.u32 %v10328_v13, 16  ;;  %v10374_v44 = vld [vmem:[#allocation2 + $0x68] sm:$0x1] }
 0x2fb   :  { %v10342_v62 = vcombine.low %v4046_v38, %v4056_v42  ;;  %7884 = vmatpush3.bf16.msra.mxu1 %v9907_v24  ;;  %v4079_v2 = vrot.slane %v4077_v34, 5  ;;  %v4084_v9 = vrot.slane %v4082_v56, 4  ;;  %v4065_v27 = vrot.slane %v4064_v60, 4  ;;  %4682 = vmatprep.mubr.bf16.mxu0 %v10330_v49  ;;  %v8469_v56 = vld [vmem:[#allocation8 + $0x68] sm:$0xff]  }
 0x2fc   :  { %7885 = vmatprep.subr.bf16.mxu1 %v8423_v15  ;;  %v4087_v58 = vrot.slane %v4085_v10, 5  ;;  %v4093_v12 = vrot.slane %v4091_v17, 5  ;;  %v4075_v24 = vrot.slane %v4074_v20, 4  ;;  %v4101_v37 = vshll.u32 %v3747_v41, 16  ;;  %7424 = vmatpush3.bf16.msra.mxu0 %v8452_v61  ;;  %v10379_v17 = vld [vmem:[#allocation2 + $0x6c] sm:$0xf] }
 0x2fd   :  { %7855 = vmatprep.mubr.bf16.mxu1 %v10342_v62  ;;  %v4106_v18 = vshrl.u32 %v10340_v5, 16  ;;  %v4109_v63 = vshll.u32 %v10340_v5, 16  ;;  %v4070_v7 = vsel %vm8798_vm5, %v4065_v27, %v4069_v1  ;;  %v4097_v30 = vrot.slane %v4095_v25, 4  ;;  %7425 = vmatprep.subr.bf16.mxu0 %v8461_v43  ;;  %v8466_v1 = vld [vmem:[#allocation8 + $0x20] sm:$0xff]   ;;  %v10385_v27 = vld [vmem:[#allocation2 + $0x70] sm:$0xf] }
 0x2fe   :  { %v4088_v48 = vor.u32 %v4087_v58, %v4084_v9  ;;  %v4115_v39 = vshll.u32 %v10346_v6, 16  ;;  %v4080_v29 = vsel %vm8798_vm5, %v4075_v24, %v4079_v2  ;;  %v4103_v14 = vrot.slane %v4101_v37, 5  ;;  %v8470_v24 = vld [vmem:[#allocation8 + $0x28] sm:$0xff]  }
 0x2ff   :  { %7886 = vmatpush3.bf16.msra.mxu1 %v8423_v15  ;;  %v4108_v53 = vrot.slane %v4106_v18, 4  ;;  %v4111_v59 = vrot.slane %v4109_v63, 5  ;;  %v10364_v33 = vcombine.low %v4070_v7, %v4080_v29  ;;  %v4098_v54 = vor.u32 %v4097_v30, %v4093_v12  ;;  %v10394_v63 = vld [vmem:[#allocation2 + $0x74] sm:$0x1] }
 0x300   :  { %v4089_v19 = vrot.slane %v4088_v48, 4  ;;  %v10366_v22 = vrot.slane %v4115_v39, 5  ;;  %7887 = vmatprep.subr.bf16.mxu1 %v8424_v4  ;;  %v4119_v47 = vshrl.u32 %v10346_v6, 16  ;;  %v4125_v16 = vshll.u32 %v10350_v0, 16  ;;  %7426 = vmatpush3.bf16.msra.mxu0 %v8462_v45  ;;  %v8471_v48 = vld [vmem:[#allocation8 + $0x70] sm:$0xff]  }
 0x301   :  { %v4112_v32 = vor.u32 %v4111_v59, %v4108_v53  ;;  %v4130_v3 = vshrl.u32 %v10358_v26, 16  ;;  %v4099_v38 = vrot.slane %v4098_v54, 4  ;;  %v4133_v34 = vshll.u32 %v10358_v26, 16  ;;  %7427 = vmatprep.subr.bf16.mxu0 %v8463_v40  ;;  %v10401_v54 = vld [vmem:[#allocation2 + $0x78] sm:$0xf] }
 0x302   :  { %7856 = vmatmul.mubr.bf16.gmra.mrb[100].mxu1 %v10364_v33  ;;  %v4094_v15 = vsel %vm8798_vm5, %v4089_v19, %v4093_v12  ;;  %v4139_v41 = vshll.u32 %v10362_v21, 16  ;;  %4683 = vmatmul.mubr.bf16.gmra.mrb[168].mxu0 %v10314_v8  ;;  %v4121_v42 = vrot.slane %v4119_v47, 4  ;;  %v4127_v60 = vrot.slane %v4125_v16, 5  ;;  %v8426_v8 = vld [vmem:[#allocation8 + $0xa0] sm:$0xff]  }
 0x303   :  { %v4113_v61 = vrot.slane %v4112_v32, 4  ;;  %v4132_v10 = vrot.slane %v4130_v3, 4  ;;  %7888 = vmatpush3.bf16.msra.mxu1 %v8424_v4  ;;  %v4104_v43 = vsel %vm8798_vm5, %v4099_v38, %v4103_v14  ;;  %4690 = vmatprep.mubr.bf16.mxu0 %v10342_v62  ;;  %v4135_v20 = vrot.slane %v4133_v34, 5 }
 0x304   :  { %v4141_v2 = vrot.slane %v4139_v41, 5  ;;  %v4143_v9 = vshrl.u32 %v10362_v21, 16  ;;  %7889 = vmatprep.subr.bf16.mxu1 %v8425_v23  ;;  %v10387_v58 = vcombine.low %v4094_v15, %v4104_v43  ;;  %v4122_v12 = vor.u32 %v4121_v42, %v10366_v22  ;;  %7428 = vmatpush3.bf16.msra.mxu0 %v8466_v1  ;;  %v10406_v1 = vld [vmem:[#allocation2 + $0x7c] sm:$0xf]  ;;  %v8474_v15 = vld [vmem:[#allocation8 + $0x30] sm:$0xff]  }
 0x305   :  { %v4118_v4 = vsel %vm8798_vm5, %v4113_v61, %v10366_v22  ;;  %v4149_v25 = vshll.u32 %v10374_v44, 16  ;;  %v4136_v37 = vor.u32 %v4135_v20, %v4132_v10  ;;  %v4154_v45 = vshrl.u32 %v10379_v17, 16  ;;  %7429 = vmatprep.subr.bf16.mxu0 %v8469_v56  ;;  %v8427_v22 = vld [vmem:[#allocation8 + $0xa8] sm:$0xff]   ;;  %v8477_v56 = vld [vmem:[#allocation8 + $0x78] sm:$0xff]  }
 0x306   :  { %v4145_v18 = vrot.slane %v4143_v9, 4  ;;  %v4157_v7 = vshll.u32 %v10379_v17, 16  ;;  %7859 = vmatprep.mubr.bf16.mxu1 %v10387_v58  ;;  %v4123_v30 = vrot.slane %v4122_v12, 4  ;;  %v4163_v40 = vshll.u32 %v10385_v27, 16  ;;  %v8428_v12 = vld [vmem:[#allocation8 + $0xb0] sm:$0xff]  }
 0x307   :  { %v4151_v39 = vrot.slane %v4149_v25, 5  ;;  %v4167_v29 = vshrl.u32 %v10385_v27, 16  ;;  %7890 = vmatpush3.bf16.msra.mxu1 %v8425_v23  ;;  %v4137_v14 = vrot.slane %v4136_v37, 4  ;;  %v4156_v59 = vrot.slane %v4154_v45, 4  ;;  %v8478_v45 = vld [vmem:[#allocation8 + $0x38] sm:$0xff]  }
 0x308   :  { %v4146_v53 = vor.u32 %v4145_v18, %v4141_v2  ;;  %v4159_v19 = vrot.slane %v4157_v7, 5  ;;  %7891 = vmatprep.subr.bf16.mxu1 %v8426_v8  ;;  %v4128_v32 = vsel %vm8798_vm5, %v4123_v30, %v4127_v60  ;;  %v4165_v47 = vrot.slane %v4163_v40, 5  ;;  %7430 = vmatpush3.bf16.msra.mxu0 %v8470_v24  ;;  %v10413_v60 = vld [vmem:[#allocation2 + $0x80] sm:$0x1]  ;;  %v10427_v18 = vld [vmem:[#allocation2 + $0x88] sm:$0xf] }
 0x309   :  { %v4169_v16 = vrot.slane %v4167_v29, 4  ;;  %v4173_v3 = vshll.u32 %v10394_v63, 16  ;;  %v10408_v23 = vcombine.low %v4118_v4, %v4128_v32  ;;  %v4142_v38 = vsel %vm8798_vm5, %v4137_v14, %v4141_v2  ;;  %7431 = vmatprep.subr.bf16.mxu0 %v8471_v48  ;;  %v10423_v4 = vld [vmem:[#allocation2 + $0x84] sm:$0xf]  ;;  %v10435_v14 = vld [vmem:[#allocation2 + $0x8c] sm:$0x1] }
 0x30a   :  { %v4147_v34 = vrot.slane %v4146_v53, 4  ;;  %v4160_v41 = vor.u32 %v4159_v19, %v4156_v59  ;;  %4691 = vmatmul.mubr.bf16.gmra.mrb[172].mxu0 %v10330_v49  ;;  %v4178_v10 = vshrl.u32 %v10401_v54, 16  ;;  %v4181_v43 = vshll.u32 %v10401_v54, 16  ;;  %11476 = vst [vmem:[#allocation24_spill] sm:$0xff] %v10435_v14  ;;  %v10439_v19 = vld [vmem:[#allocation2 + $0x90] sm:$0xf] }
 0x30b   :  { %v4170_v61 = vor.u32 %v4169_v16, %v4165_v47  ;;  %v4175_v42 = vrot.slane %v4173_v3, 5  ;;  %7892 = vmatpush3.bf16.msra.mxu1 %v8426_v8  ;;  %4698 = vmatprep.mubr.bf16.mxu0 %v10364_v33  ;;  %v4187_v9 = vshll.u32 %v10406_v1, 16  ;;  %v4191_v49 = vshrl.u32 %v10406_v1, 16 }
 0x30c   :  { %7860 = vmatmul.mubr.bf16.gmra.mrb[104].mxu1 %v10408_v23  ;;  %v4152_v20 = vsel %vm8798_vm5, %v4147_v34, %v4151_v39  ;;  %v4161_v2 = vrot.slane %v4160_v41, 4  ;;  %v4180_v37 = vrot.slane %v4178_v10, 4  ;;  %v4183_v8 = vrot.slane %v4181_v43, 5  ;;  %7893 = vmatprep.subr.bf16.mxu1 %v8427_v22 }
 0x30d   :  { %v10425_v25 = vcombine.low %v4142_v38, %v4152_v20  ;;  %v4171_v24 = vrot.slane %v4170_v61, 4  ;;  %7432 = vmatpush3.bf16.msra.mxu0 %v8474_v15  ;;  %v4189_v48 = vrot.slane %v4187_v9, 5  ;;  %v4193_v30 = vrot.slane %v4191_v49, 4  ;;  %v8429_v15 = vld [vmem:[#allocation8 + $0xb8] sm:$0xff]   ;;  %v10452_v49 = vld [vmem:[#allocation2 + $0x98] sm:$0x1] }
 0x30e   :  { %v4166_v7 = vsel %vm8798_vm5, %v4161_v2, %v4165_v47  ;;  %v4197_v39 = vshll.u32 %v10413_v60, 16  ;;  %7433 = vmatprep.subr.bf16.mxu0 %v8477_v56  ;;  %v4184_v29 = vor.u32 %v4183_v8, %v4180_v37  ;;  %v4202_v53 = vshrl.u32 %v10423_v4, 16  ;;  %v10445_v61 = vld [vmem:[#allocation2 + $0x94] sm:$0xf]  ;;  %11477 = vst [vmem:[#allocation20_spill] sm:$0xff] %v10452_v49 }
 0x30f   :  { %7863 = vmatprep.mubr.bf16.mxu1 %v10425_v25  ;;  %v4176_v40 = vsel %vm8798_vm5, %v4171_v24, %v4175_v42  ;;  %v4205_v59 = vshll.u32 %v10423_v4, 16  ;;  %7894 = vmatpush3.bf16.msra.mxu1 %v8427_v22  ;;  %v4194_v47 = vor.u32 %v4193_v30, %v4189_v48  ;;  %v4211_v3 = vshll.u32 %v10427_v18, 16  ;;  %v10455_v37 = vld [vmem:[#allocation2 + $0x9c] sm:$0xf] }
 0x310   :  { %v10441_v32 = vcombine.low %v4166_v7, %v4176_v40  ;;  %v4199_v16 = vrot.slane %v4197_v39, 5  ;;  %7895 = vmatprep.subr.bf16.mxu1 %v8428_v12  ;;  %v4185_v38 = vrot.slane %v4184_v29, 4  ;;  %v4204_v34 = vrot.slane %v4202_v53, 4  ;;  %v10464_v53 = vld [vmem:[#allocation2 + $0xa0] sm:$0xf] }
 0x311   :  { %v4207_v41 = vrot.slane %v4205_v59, 5  ;;  %v4215_v56 = vshrl.u32 %v10427_v18, 16  ;;  %7434 = vmatpush3.bf16.msra.mxu0 %v8478_v45  ;;  %v4195_v42 = vrot.slane %v4194_v47, 4  ;;  %v4213_v10 = vrot.slane %v4211_v3, 5 }
 0x312   :  { %v4221_v22 = vshll.u32 %v10435_v14, 16  ;;  %v4226_v43 = vshrl.u32 %v10439_v19, 16  ;;  %v4190_v20 = vsel %vm8798_vm5, %v4185_v38, %v4189_v48  ;;  %4699 = vmatmul.mubr.bf16.gmra.mrb[176].mxu0 %v10342_v62  ;;  %v4229_v24 = vshll.u32 %v10439_v19, 16  ;;  %v8434_v48 = vld [vmem:[#allocation8 + $0x1c0] sm:$0xff]  }
 0x313   :  { %v4208_v2 = vor.u32 %v4207_v41, %v4204_v34  ;;  %v4217_v9 = vrot.slane %v4215_v56, 4  ;;  %7896 = vmatpush3.bf16.msra.mxu1 %v8428_v12  ;;  %v4200_v8 = vsel %vm8798_vm5, %v4195_v42, %v4199_v16  ;;  %4706 = vmatprep.mubr.bf16.mxu0 %v10387_v58  ;;  %v4235_v62 = vshll.u32 %v10445_v61, 16  ;;  %v10472_v41 = vld [vmem:[#allocation2 + $0xa4] sm:$0x1] }
 0x314   :  { %7864 = vmatmul.mubr.bf16.gmra.mrb[108].mxu1 %v10441_v32  ;;  %v4223_v45 = vrot.slane %v4221_v22, 5  ;;  %v4228_v7 = vrot.slane %v4226_v43, 4  ;;  %v10462_v30 = vcombine.low %v4190_v20, %v4200_v8  ;;  %v4231_v29 = vrot.slane %v4229_v24, 5  ;;  %7897 = vmatprep.subr.bf16.mxu1 %v8429_v15  ;;  %11478 = vst [vmem:[#allocation28_spill] sm:$0xff] %v10472_v41 }
 0x315   :  { %v4209_v39 = vrot.slane %v4208_v2, 4  ;;  %v4218_v40 = vor.u32 %v4217_v9, %v4213_v10  ;;  %v4237_v12 = vrot.slane %v4235_v62, 5  ;;  %v4239_v59 = vshrl.u32 %v10445_v61, 16  ;;  %v10476_v2 = vld [vmem:[#allocation2 + $0xa8] sm:$0xf] }
 0x316   :  { %v4245_v47 = vshll.u32 %v10452_v49, 16  ;;  %v4250_v16 = vshrl.u32 %v10455_v37, 16  ;;  %7867 = vmatprep.mubr.bf16.mxu1 %v10462_v30  ;;  %v4232_v34 = vor.u32 %v4231_v29, %v4228_v7  ;;  %v4253_v56 = vshll.u32 %v10455_v37, 16  ;;  %v10481_v7 = vld [vmem:[#allocation2 + $0xac] sm:$0xf] }
 0x317   :  { %v4214_v3 = vsel %vm8798_vm5, %v4209_v39, %v4213_v10  ;;  %v4219_v38 = vrot.slane %v4218_v40, 4  ;;  %7898 = vmatpush3.bf16.msra.mxu1 %v8429_v15  ;;  %v4241_v42 = vrot.slane %v4239_v59, 4  ;;  %v4259_v20 = vshll.u32 %v10464_v53, 16 }
 0x318   :  { %v4247_v22 = vrot.slane %v4245_v47, 5  ;;  %v4252_v43 = vrot.slane %v4250_v16, 4  ;;  %7555 = vmatprep.subr.bf16.mxu1 %v8434_v48  ;;  %v4233_v24 = vrot.slane %v4232_v34, 4  ;;  %v4255_v10 = vrot.slane %v4253_v56, 5 }
 0x319   :  { %v4224_v9 = vsel %vm8798_vm5, %v4219_v38, %v4223_v45  ;;  %v4263_v8 = vshrl.u32 %v10464_v53, 16  ;;  %v4242_v15 = vor.u32 %v4241_v42, %v4237_v12  ;;  %v4261_v39 = vrot.slane %v4259_v20, 5  ;;  %v10489_v45 = vld [vmem:[#allocation2 + $0xb0] sm:$0x1] }
 0x31a   :  { %v10483_v62 = vcombine.low %v4214_v3, %v4224_v9  ;;  %v4269_v40 = vshll.u32 %v10472_v41, 16  ;;  %v4238_v29 = vsel %vm8798_vm5, %v4233_v24, %v4237_v12  ;;  %4707 = vmatmul.mubr.bf16.gmra.mrb[180].mxu0 %v10364_v33  ;;  %v4256_v48 = vor.u32 %v4255_v10, %v4252_v43  ;;  %11479 = vst [vmem:[#allocation25_spill] sm:$0xff] %v10489_v45  ;;  %v10497_v43 = vld [vmem:[#allocation2 + $0xb4] sm:$0xf]  ;;  %v10508_v41 = vld [vmem:[#allocation2 + $0xbc] sm:$0x1] }
 0x31b   :  { %v4265_v59 = vrot.slane %v4263_v8, 4  ;;  %v4274_v47 = vshrl.u32 %v10476_v2, 16  ;;  %v4243_v16 = vrot.slane %v4242_v15, 4  ;;  %4714 = vmatprep.mubr.bf16.mxu0 %v10408_v23  ;;  %v4277_v38 = vshll.u32 %v10476_v2, 16  ;;  %v10502_v8 = vld [vmem:[#allocation2 + $0xb8] sm:$0xf] }
 0x31c   :  { %7868 = vmatmul.mubr.bf16.gmra.mrb[112].mxu1 %v10483_v62  ;;  %v4271_v3 = vrot.slane %v4269_v40, 5  ;;  %v4283_v34 = vshll.u32 %v10481_v7, 16  ;;  %v4257_v56 = vrot.slane %v4256_v48, 4  ;;  %v4287_v33 = vshrl.u32 %v10481_v7, 16  ;;  %11480 = vst [vmem:[#allocation27_spill] sm:$0xff] %v10508_v41 }
 0x31d   :  { %v4266_v12 = vor.u32 %v4265_v59, %v4261_v39  ;;  %v4276_v42 = vrot.slane %v4274_v47, 4  ;;  %v4248_v20 = vsel %vm8798_vm5, %v4243_v16, %v4247_v22  ;;  %v4279_v9 = vrot.slane %v4277_v38, 5 }
 0x31e   :  { %v4285_v24 = vrot.slane %v4283_v34, 5  ;;  %v4293_v10 = vshll.u32 %v10489_v45, 16  ;;  %v10504_v15 = vcombine.low %v4238_v29, %v4248_v20  ;;  %v4262_v40 = vsel %vm8798_vm5, %v4257_v56, %v4261_v39  ;;  %v10517_v34 = vld [vmem:[#allocation2 + $0xc0] sm:$0xf]  ;;  %v10521_v20 = vld [vmem:[#allocation2 + $0xc4] sm:$0xf] }
 0x31f   :  { %v4267_v48 = vrot.slane %v4266_v12, 4  ;;  %v4289_v59 = vrot.slane %v4287_v33, 4  ;;  %v4280_v47 = vor.u32 %v4279_v9, %v4276_v42  ;;  %v4298_v49 = vshrl.u32 %v10497_v43, 16 }
 0x320   :  { %v4295_v57 = vrot.slane %v4293_v10, 5  ;;  %v4301_v22 = vshll.u32 %v10497_v43, 16  ;;  %7871 = vmatprep.mubr.bf16.mxu1 %v10504_v15  ;;  %v4307_v38 = vshll.u32 %v10502_v8, 16  ;;  %v4311_v39 = vshrl.u32 %v10502_v8, 16 }
 0x321   :  { %v4272_v16 = vsel %vm8798_vm5, %v4267_v48, %v4271_v3  ;;  %v4290_v29 = vor.u32 %v4289_v59, %v4285_v24  ;;  %v4281_v12 = vrot.slane %v4280_v47, 4  ;;  %v4300_v42 = vrot.slane %v4298_v49, 4 }
 0x322   :  { %v10519_v56 = vcombine.low %v4262_v40, %v4272_v16  ;;  %v4303_v33 = vrot.slane %v4301_v22, 5  ;;  %4715 = vmatmul.mubr.bf16.gmra.mrb[184].mxu0 %v10387_v58  ;;  %v4309_v10 = vrot.slane %v4307_v38, 5  ;;  %v4313_v45 = vrot.slane %v4311_v39, 4  ;;  %v10534_v16 = vld [vmem:[#allocation2 + $0xcc] sm:$0xf] }
 0x323   :  { %v4291_v9 = vrot.slane %v4290_v29, 4  ;;  %v4317_v3 = vshll.u32 %v10508_v41, 16  ;;  %v4286_v48 = vsel %vm8798_vm5, %v4281_v12, %v4285_v24  ;;  %4722 = vmatprep.mubr.bf16.mxu0 %v10425_v25  ;;  %v4322_v49 = vshrl.u32 %v10517_v34, 16  ;;  %11482 = vst [vmem:[#allocation18_spill] sm:$0xff] %v10534_v16  ;;  %v10536_v29 = vld [vmem:[#allocation2 + $0xd0] sm:$0xf] }
 0x324   :  { %11481 = vst [vmem:[#allocation17_spill] sm:$0xff] %v10519_v56  ;;  %7872 = vmatmul.mubr.bf16.gmra.mrb[116].mxu1 %v10519_v56  ;;  %v4304_v59 = vor.u32 %v4303_v33, %v4300_v42  ;;  %v4325_v40 = vshll.u32 %v10517_v34, 16  ;;  %v4314_v58 = vor.u32 %v4313_v45, %v4309_v10  ;;  %v4331_v22 = vshll.u32 %v10521_v20, 16  ;;  %v10540_v39 = vld [vmem:[#allocation2 + $0xc8] sm:$0x1] }
 0x325   :  { %v4296_v47 = vsel %vm8798_vm5, %v4291_v9, %v4295_v57  ;;  %v4324_v12 = vrot.slane %v4322_v49, 4  ;;  %v4319_v41 = vrot.slane %v4317_v3, 5  ;;  %v4335_v14 = vshrl.u32 %v10521_v20, 16  ;;  %v10546_v9 = vld [vmem:[#allocation2 + $0xd4] sm:$0x1] }
 0x326   :  { %v10538_v38 = vcombine.low %v4286_v48, %v4296_v47  ;;  %v4305_v24 = vrot.slane %v4304_v59, 4  ;;  %v4327_v42 = vrot.slane %v4325_v40, 5  ;;  %v4315_v33 = vrot.slane %v4314_v58, 4 }
 0x327   :  { %v4333_v56 = vrot.slane %v4331_v22, 5  ;;  %v4346_v48 = vshrl.u32 %v10534_v16, 16  ;;  %v4349_v59 = vshll.u32 %v10534_v16, 16  ;;  %v4337_v40 = vrot.slane %v4335_v14, 4 }
 0x328   :  { %11483 = vst [vmem:[#allocation14_spill] sm:$0xff] %v10538_v38  ;;  %7875 = vmatprep.mubr.bf16.mxu1 %v10538_v38  ;;  %v4310_v57 = vsel %vm8798_vm5, %v4305_v24, %v4309_v10  ;;  %v4328_v45 = vor.u32 %v4327_v42, %v4324_v12  ;;  %v4320_v49 = vsel %vm8798_vm5, %v4315_v33, %v4319_v41  ;;  %v4341_v3 = vshll.u32 %v10540_v39, 16 }
 0x329   :  { %v4355_v47 = vshll.u32 %v10536_v29, 16  ;;  %v10554_v58 = vcombine.low %v4310_v57, %v4320_v49  ;;  %v4348_v38 = vrot.slane %v4346_v48, 4  ;;  %v4351_v10 = vrot.slane %v4349_v59, 5 }
 0x32a   :  { %v4329_v22 = vrot.slane %v4328_v45, 4  ;;  %v4338_v24 = vor.u32 %v4337_v40, %v4333_v56  ;;  %4723 = vmatmul.mubr.bf16.gmra.mrb[188].mxu0 %v10408_v23  ;;  %v4359_v42 = vshrl.u32 %v10536_v29, 16  ;;  %v4365_v16 = vshll.u32 %v10546_v9, 16 }
 0x32b   :  { %v4357_v12 = vrot.slane %v4355_v47, 5  ;;  %v4352_v14 = vor.u32 %v4351_v10, %v4348_v38  ;;  %4730 = vmatprep.mubr.bf16.mxu0 %v10441_v32  ;;  %v4343_v57 = vrot.slane %v4341_v3, 5  ;;  %v10567_v40 = vcombine.low %v10358_v26, %v10362_v21 }
 0x32c   :  { %7876 = vmatmul.mubr.bf16.gmra.mrb[120].mxu1 %v10554_v58  ;;  %v4334_v41 = vsel %vm8798_vm5, %v4329_v22, %v4333_v56  ;;  %v4339_v33 = vrot.slane %v4338_v24, 4  ;;  %v4361_v45 = vrot.slane %v4359_v42, 4  ;;  %v4367_v49 = vrot.slane %v4365_v16, 5 }
 0x32d   :  { %v4353_v48 = vrot.slane %v4352_v14, 4  ;;  %v10575_v56 = vcombine.low %v10379_v17, %v10385_v27  ;;  %v10579_v3 = vcombine.low %v10401_v54, %v10406_v1  ;;  %v10583_v16 = vcombine.low %v10423_v4, %v10427_v18 }
 0x32e   :  { %v4344_v23 = vsel %vm8798_vm5, %v4339_v33, %v4343_v57  ;;  %v4362_v59 = vor.u32 %v4361_v45, %v4357_v12  ;;  %v10587_v10 = vcombine.low %v10439_v19, %v10445_v61  ;;  %v10591_v24 = vcombine.low %v10455_v37, %v10464_v53  ;;  %v8436_v45 = vld [vmem:[#allocation8 + $0x180] sm:$0xff]  }
 0x32f   :  { %v10569_v47 = vcombine.low %v4334_v41, %v4344_v23  ;;  %v4358_v38 = vsel %vm8798_vm5, %v4353_v48, %v4357_v12  ;;  %v10596_v12 = vcombine.low %v10476_v2, %v10481_v7  ;;  %v10600_v42 = vcombine.low %v10497_v43, %v10502_v8 }
 0x330   :  { %v4363_v22 = vrot.slane %v4362_v59, 4  ;;  %v10604_v14 = vcombine.low %v10517_v34, %v10521_v20  ;;  %v10612_v57 = vcombine.low %v10266_v28, %v10276_v46  ;;  %v10618_v48 = vcombine.low %v10281_v51, %v10283_v36  ;;  %v8440_v36 = vld [vmem:[#allocation8 + $0x188] sm:$0xff]  }
 0x331   :  { %7879 = vmatprep.mubr.bf16.mxu1 %v10569_v47  ;;  %v6821_v28 = vrot.slane %v10340_v5, 9  ;;  %v5489_v46 = vrot.slane %v10346_v6, 5  ;;  %v10631_v51 = vcombine.low %v10307_v55, %v10312_v50  ;;  %v5492_v23 = vrot.slane %v10350_v0, 5 }
 0x332   :  { %v4368_v41 = vsel %vm8798_vm5, %v4363_v22, %v4367_v49  ;;  %4731 = vmatmul.mubr.bf16.gmra.mrb[192].mxu0 %v10425_v25  ;;  %v10623_v25 = vcombine.low %v10289_v11, %v10296_v35  ;;  %v8444_v11 = vld [vmem:[#allocation8 + $0x1d0] sm:$0xff]   ;;  %v6822_v59 = vrot.slane %v10358_v26, 9  ;;  %v10641_v49 = vcombine.low %v10340_v5, %v10346_v6 }
 0x333   :  { %v6765_v33 = vcombine.low %v4358_v38, %v4368_v41  ;;  %4738 = vmatprep.mubr.bf16.mxu0 %v10462_v30  ;;  %v5491_v35 = vrot.slane %v5489_v46, 4  ;;  %v5490_v55 = vsel %vm9225_vm8, %v6821_v28, %v5489_v46  ;;  %v5496_v50 = vrot.slane %v10362_v21, 5  ;;  %v8446_v5 = vld [vmem:[#allocation8 + $0x190] sm:$0xff]  }
 0x334   :  { %v6823_v22 = vrot.slane %v10379_v17, 9  ;;  %v5503_v0 = vrot.slane %v10385_v27, 5  ;;  %v5506_v26 = vrot.slane %v10394_v63, 5  ;;  %v6824_v17 = vrot.slane %v10401_v54, 9  ;;  %v11485_v54 = vld [vmem:[#allocation24_spill] sm:$0xff] }
 0x335   :  { %7880 = vmatmul.mubr.bf16.gmra.mrb[124].mxu1 %v6765_v33  ;;  %v5497_v21 = vsel %vm9225_vm8, %v6822_v59, %v5496_v50  ;;  %v5498_v41 = vrot.slane %v5496_v50, 4  ;;  %v5510_v33 = vrot.slane %v10406_v1, 5  ;;  %v5517_v28 = vrot.slane %v10427_v18, 5 }
 0x336   :  { %7899 = vmatprep.mubr.bf16.mxu1 %v10612_v57  ;;  %v5504_v27 = vsel %vm9225_vm8, %v6823_v22, %v5503_v0  ;;  %v5505_v63 = vrot.slane %v5503_v0, 4  ;;  %v5520_v46 = vrot.slane %v11485_v54, 5  ;;  %v6826_v59 = vrot.slane %v10439_v19, 9 }
 0x337   :  { %v5511_v1 = vsel %vm9225_vm8, %v6824_v17, %v5510_v33  ;;  %v5524_v22 = vrot.slane %v10445_v61, 5  ;;  %v6827_v0 = vrot.slane %v10455_v37, 9  ;;  %v6828_v61 = vrot.slane %v10476_v2, 9  ;;  %v8456_v37 = vld [vmem:[#allocation8 + $0x1a0] sm:$0xff]  }
 0x338   :  { %v6829_v2 = vrot.slane %v10497_v43, 9 }
 0x33a   :  { %4739 = vmatmul.mubr.bf16.gmra.mrb[196].mxu0 %v10441_v32  ;;  %v10635_v32 = vcombine.low %v10324_v31, %v10328_v13  ;;  %v5493_v31 = vsel %vm9225_vm8, %v5491_v35, %v5492_v23  ;;  %v5499_v13 = vrot.slane %v10374_v44, 5  ;;  %v8448_v44 = vld [vmem:[#allocation8 + $0x1d8] sm:$0xff]   ;;  %v5519_v23 = vrot.slane %v5517_v28, 4 }
 0x33b   :  { %4746 = vmatprep.mubr.bf16.mxu0 %v10483_v62  ;;  %v10653_v6 = vcombine.low %v5490_v55, %v5493_v31  ;;  %v8450_v35 = vld [vmem:[#allocation8 + $0x198] sm:$0xff]   ;;  %v8454_v55 = vld [vmem:[#allocation8 + $0x1e0] sm:$0xff]  }
 0x33c   :  { %v11486_v31 = vld [vmem:[#allocation20_spill] sm:$0xff] }
 0x33d   :  { %7900 = vmatmul.mubr.bf16.vlgmr.msra.gmra.mrb[96].mxu1 %v10618_v48 }
 0x33e   :  { %7903 = vmatprep.mubr.bf16.mxu1 %v10623_v25  ;;  %7556 = vmatpush3.bf16.msra.mxu1 %v8436_v45  ;;  %v5500_v45 = vsel %vm9225_vm8, %v5498_v41, %v5499_v13  ;;  %v5527_v13 = vrot.slane %v11486_v31, 5  ;;  %v11487_v41 = vld [vmem:[#allocation28_spill] sm:$0xff] }
 0x33f   :  { %7557 = vmatprep.subr.bf16.mxu1 %v8438_v52  ;;  %v6825_v52 = vrot.slane %v10423_v4, 9  ;;  %v5534_v19 = vrot.slane %v11487_v41, 5  ;;  %v8468_v41 = vld [vmem:[#allocation8 + $0x1b0] sm:$0xff]  }
 0x341   :  { %v5518_v18 = vsel %vm9225_vm8, %v6825_v52, %v5517_v28  ;;  %v11489_v52 = vld [vmem:[#allocation17_spill] sm:$0xff]  ;;  %v8458_v28 = vld [vmem:[#allocation8 + $0x1e8] sm:$0xff]  }
 0x342   :  { %7558 = vmatpush3.bf16.msra.mxu1 %v8440_v36  ;;  %4747 = vmatmul.mubr.bf16.gmra.mrb[200].mxu0 %v10462_v30  ;;  %v5513_v30 = vrot.slane %v10413_v60, 5  ;;  %v10669_v36 = vcombine.low %v5497_v21, %v5500_v45  ;;  %v5512_v60 = vrot.slane %v5510_v33, 4  ;;  %v5531_v21 = vrot.slane %v10464_v53, 5 }
 0x343   :  { %7559 = vmatprep.subr.bf16.mxu1 %v8444_v11  ;;  %4754 = vmatprep.mubr.bf16.mxu0 %v10504_v15  ;;  %v5507_v11 = vsel %vm9225_vm8, %v5505_v63, %v5506_v26  ;;  %v5538_v53 = vrot.slane %v10481_v7, 5 }
 0x344   :  { %v10676_v4 = vcombine.low %v5504_v27, %v5507_v11  ;;  %v5514_v50 = vsel %vm9225_vm8, %v5512_v60, %v5513_v30  ;;  %v5526_v27 = vrot.slane %v5524_v22, 4  ;;  %v5532_v63 = vsel %vm9225_vm8, %v6827_v0, %v5531_v21  ;;  %v11488_v30 = vld [vmem:[#allocation25_spill] sm:$0xff] }
 0x345   :  { %7904 = vmatmul.mubr.bf16.gmra.mrb[100].mxu1 %v10631_v51  ;;  %v10686_v26 = vcombine.low %v5511_v1, %v5514_v50  ;;  %v5533_v33 = vrot.slane %v5531_v21, 4  ;;  %v5541_v45 = vrot.slane %v11488_v30, 5  ;;  %v5539_v60 = vsel %vm9225_vm8, %v6828_v61, %v5538_v53  ;;  %v8476_v61 = vld [vmem:[#allocation8 + $0x1b8] sm:$0xff]   ;;  %v8535_v30 = vld [vmem:[#allocation2] sm:$0xf] }
 0x346   :  { %7907 = vmatprep.mubr.bf16.mxu1 %v10635_v32  ;;  %7560 = vmatpush3.bf16.msra.mxu1 %v8446_v5  ;;  %v5521_v5 = vsel %vm9225_vm8, %v5519_v23, %v5520_v46  ;;  %v5528_v54 = vsel %vm9225_vm8, %v5526_v27, %v5527_v13  ;;  %v11490_v46 = vld [vmem:[#allocation27_spill] sm:$0xff]  ;;  %v5553_v50 = vrot.slane %v10521_v20, 5  ;;  %v5556_v21 = vrot.slane %v10540_v39, 5  ;;  %v8480_v39 = vld [vmem:[#allocation8 + $0x200] sm:$0xff]  }
 0x347   :  { %7561 = vmatprep.subr.bf16.mxu1 %v8448_v44  ;;  %v10692_v17 = vcombine.low %v5518_v18, %v5521_v5  ;;  %v5525_v44 = vsel %vm9225_vm8, %v6826_v59, %v5524_v22  ;;  %v5548_v11 = vrot.slane %v11490_v46, 5  ;;  %v5535_v7 = vsel %vm9225_vm8, %v5533_v33, %v5534_v19  ;;  %v8460_v59 = vld [vmem:[#allocation8 + $0x1a8] sm:$0xff]   ;;  %v8465_v22 = vld [vmem:[#allocation8 + $0x1f0] sm:$0xff]  }
 0x348   :  { %v10708_v1 = vcombine.low %v5525_v44, %v5528_v54  ;;  %v10715_v18 = vcombine.low %v5532_v63, %v5535_v7  ;;  %v5555_v5 = vrot.slane %v5553_v50, 4  ;;  %v11491_v19 = vld [vmem:[#allocation14_spill] sm:$0xff]  ;;  %v8473_v44 = vld [vmem:[#allocation8 + $0x1f8] sm:$0xff]  }
 0x349   :  { %v8537_v54 = vld [vmem:[#allocation2 + $0x14] sm:$0x1] }
 0x34a   :  { %4755 = vmatmul.mubr.bf16.gmra.mrb[204].mxu0 %v10483_v62  ;;  %7562 = vmatpush3.bf16.msra.mxu1 %v8450_v35  ;;  %v5545_v62 = vrot.slane %v10502_v8, 5  ;;  %v5540_v35 = vrot.slane %v5538_v53, 4  ;;  %v6830_v8 = vrot.slane %v10517_v34, 9  ;;  %v5557_v20 = vsel %vm9225_vm8, %v5555_v5, %v5556_v21  ;;  %v8541_v5 = vld [vmem:[#allocation2 + $0x20] sm:$0x1] }
 0x34b   :  { %4762 = vmatprep.mubr.bf16.mxu0 %v11489_v52  ;;  %7563 = vmatprep.subr.bf16.mxu1 %v8454_v55  ;;  %v5457_v21 = vrot.slane %v8541_v5, 5  ;;  %v8550_v5 = vld [vmem:[#allocation2 + $0x44] sm:$0x1] }
 0x34c   :  { %v5546_v43 = vsel %vm9225_vm8, %v6829_v2, %v5545_v62  ;;  %v5547_v23 = vrot.slane %v5545_v62, 4  ;;  %v5542_v55 = vsel %vm9225_vm8, %v5540_v35, %v5541_v45  ;;  %v5554_v34 = vsel %vm9225_vm8, %v6830_v8, %v5553_v50  ;;  %v8536_v45 = vld [vmem:[#allocation2 + $0x4] sm:$0xf] }
 0x34d   :  { %7908 = vmatmul.mubr.bf16.gmra.mrb[104].mxu1 %v10641_v49  ;;  %v10724_v31 = vcombine.low %v5539_v60, %v5542_v55  ;;  %v10737_v27 = vcombine.low %v5554_v34, %v5557_v20  ;;  %v5450_v2 = vrot.slane %v8537_v54, 5  ;;  %v11492_v62 = vld [vmem:[#allocation18_spill] sm:$0xff]  ;;  %v6814_v60 = vrot.slane %v8535_v30, 9 }
 0x34e   :  { %7911 = vmatprep.mubr.bf16.mxu1 %v10567_v40  ;;  %7564 = vmatpush3.bf16.msra.mxu1 %v8456_v37  ;;  %v5549_v13 = vsel %vm9225_vm8, %v5547_v23, %v5548_v11  ;;  %v8534_v37 = vld [vmem:[#allocation2 + $0x10] sm:$0xf]  ;;  %v6747_v46 = vcombine.low %v11492_v62, %v10536_v29 }
 0x34f   :  { %7565 = vmatprep.subr.bf16.mxu1 %v8458_v28  ;;  %v10728_v0 = vcombine.low %v5546_v43, %v5549_v13  ;;  %v5447_v33 = vrot.slane %v8534_v37, 5  ;;  %v8539_v43 = vld [vmem:[#allocation2 + $0x8] sm:$0x1]  ;;  %v8540_v13 = vld [vmem:[#allocation2 + $0x18] sm:$0xf] }
 0x350   :  { %v5443_v23 = vrot.slane %v8539_v43, 5  ;;  %v6816_v34 = vrot.slane %v8540_v13, 9  ;;  %v8549_v13 = vld [vmem:[#allocation2 + $0x3c] sm:$0xf] }
 0x351   :  { %v5449_v53 = vrot.slane %v5447_v33, 4 }
 0x352   :  { %4763 = vmatmul.mubr.bf16.gmra.mrb[208].mxu0 %v10504_v15  ;;  %7566 = vmatpush3.bf16.msra.mxu1 %v8460_v59  ;;  %v8533_v15 = vld [vmem:[#allocation2 + $0xc] sm:$0xf] }
 0x353   :  { %4770 = vmatprep.mubr.bf16.mxu0 %v11491_v19  ;;  %7567 = vmatprep.subr.bf16.mxu1 %v8465_v22  ;;  %v6731_v63 = vcombine.low %v8533_v15, %v8534_v37  ;;  %v6815_v28 = vrot.slane %v8533_v15, 9  ;;  %v5451_v11 = vsel %vm9225_vm8, %v5449_v53, %v5450_v2  ;;  %v8481_v15 = vld [vmem:[#allocation8 + $0x208] sm:$0xff]  }
 0x354   :  { %v8543_v53 = vld [vmem:[#allocation2 + $0x24] sm:$0xf] }
 0x355   :  { %7912 = vmatmul.mubr.bf16.gmra.mrb[108].mxu1 %v10575_v56  ;;  %v5448_v8 = vsel %vm9225_vm8, %v6815_v28, %v5447_v33  ;;  %v8545_v28 = vld [vmem:[#allocation2 + $0x34] sm:$0xf] }
 0x356   :  { %7915 = vmatprep.mubr.bf16.mxu1 %v10579_v3  ;;  %7568 = vmatpush3.bf16.msra.mxu1 %v8468_v41  ;;  %v6833_v59 = vcombine.low %v5448_v8, %v5451_v11  ;;  %v5468_v54 = vrot.slane %v8545_v28, 5 }
 0x357   :  { %7569 = vmatprep.subr.bf16.mxu1 %v8473_v44 }
 0x358   :  { %v5470_v11 = vrot.slane %v5468_v54, 4 }
 0x35a   :  { %4771 = vmatmul.mubr.bf16.gmra.mrb[212].mxu0 %v11489_v52  ;;  %7570 = vmatpush3.bf16.msra.mxu1 %v8476_v61  ;;  %v6730_v52 = vcombine.low %v8535_v30, %v8536_v45  ;;  %v6817_v30 = vrot.slane %v8543_v53, 9  ;;  %v8552_v53 = vld [vmem:[#allocation2 + $0x48] sm:$0xf] }
 0x35b   :  { %4778 = vmatprep.mubr.bf16.mxu0 %v10554_v58  ;;  %7931 = vmatprep.subr.bf16.mxu1 %v8480_v39 }
 0x35d   :  { %7916 = vmatmul.mubr.bf16.gmra.mrb[112].mxu1 %v10583_v16 }
 0x35e   :  { %7919 = vmatprep.mubr.bf16.mxu1 %v10587_v10 }
 0x362   :  { %4779 = vmatmul.mubr.bf16.gmra.mrb[216].mxu0 %v11491_v19  ;;  %v8542_v19 = vld [vmem:[#allocation2 + $0x28] sm:$0xf] }
 0x363   :  { %4786 = vmatprep.mubr.bf16.mxu0 %v10569_v47  ;;  %v5440_v47 = vrot.slane %v8536_v45, 5  ;;  %v5461_v44 = vrot.slane %v8542_v19, 5  ;;  %v8544_v45 = vld [vmem:[#allocation2 + $0x2c] sm:$0x1] }
 0x365   :  { %7920 = vmatmul.mubr.bf16.gmra.mrb[116].mxu1 %v10591_v24  ;;  %v5442_v35 = vrot.slane %v5440_v47, 4  ;;  %v5441_v50 = vsel %vm9225_vm8, %v6814_v60, %v5440_v47  ;;  %v5463_v33 = vrot.slane %v5461_v44, 4  ;;  %v8482_v47 = vld [vmem:[#allocation8 + $0x210] sm:$0xff]   ;;  %v5462_v2 = vsel %vm9225_vm8, %v6817_v30, %v5461_v44  ;;  %v8547_v60 = vld [vmem:[#allocation2 + $0x38] sm:$0x1] }
 0x366   :  { %7923 = vmatprep.mubr.bf16.mxu1 %v10596_v12  ;;  %v6820_v30 = vrot.slane %v8552_v53, 9 }
 0x367   :  { %v5444_v22 = vsel %vm9225_vm8, %v5442_v35, %v5443_v23  ;;  %v5471_v35 = vrot.slane %v8547_v60, 5  ;;  %v8548_v23 = vld [vmem:[#allocation2 + $0x40] sm:$0xf] }
 0x368   :  { %v6832_v41 = vcombine.low %v5441_v50, %v5444_v22  ;;  %v5475_v8 = vrot.slane %v8548_v23, 5 }
 0x369   :  { %v5472_v43 = vsel %vm9225_vm8, %v5470_v11, %v5471_v35 }
 0x36a   :  { %4787 = vmatmul.mubr.bf16.gmra.mrb[220].mxu0 %v10554_v58  ;;  %v8538_v58 = vld [vmem:[#allocation2 + $0x1c] sm:$0xf]  ;;  %v5477_v22 = vrot.slane %v5475_v8, 4 }
 0x36b   :  { %5132 = vmatprep.mubr.bf16.mxu0 %v6731_v63  ;;  %v5454_v7 = vrot.slane %v8538_v58, 5  ;;  %v8546_v58 = vld [vmem:[#allocation2 + $0x30] sm:$0xf] }
 0x36d   :  { %7924 = vmatmul.mubr.bf16.gmra.mrb[120].mxu1 %v10600_v42  ;;  %v5456_v55 = vrot.slane %v5454_v7, 4  ;;  %v5455_v61 = vsel %vm9225_vm8, %v6816_v34, %v5454_v7  ;;  %v6818_v7 = vrot.slane %v8546_v58, 9  ;;  %v6819_v34 = vrot.slane %v8549_v13, 9 }
 0x36e   :  { %7927 = vmatprep.mubr.bf16.mxu1 %v10604_v14 }
 0x36f   :  { %v5458_v20 = vsel %vm9225_vm8, %v5456_v55, %v5457_v21  ;;  %v8485_v55 = vld [vmem:[#allocation8 + $0x228] sm:$0xff]   ;;  %v8486_v21 = vld [vmem:[#allocation8 + $0x230] sm:$0xff]   ;;  %v5476_v44 = vsel %vm9225_vm8, %v6819_v34, %v5475_v8 }
 0x370   :  { %v10768_v37 = vcombine.low %v5455_v61, %v5458_v20  ;;  %v8551_v20 = vld [vmem:[#allocation2 + $0x4c] sm:$0xf]  ;;  %v8487_v61 = vld [vmem:[#allocation8 + $0x238] sm:$0xff]  }
 0x371   :  { %v5482_v19 = vrot.slane %v8551_v20, 5 }
 0x372   :  { %5133 = vmatmul.mubr.bf16.vlgmr.msra.gmra.mrb[224].mxu0 %v6730_v52  ;;  %v5464_v52 = vrot.slane %v8544_v45, 5  ;;  %v8553_v45 = vld [vmem:[#allocation2 + $0x50] sm:$0x1] }
 0x373   :  { %5140 = vmatprep.mubr.bf16.mxu0 %v10612_v57 }
 0x375   :  { %7928 = vmatmul.mubr.bf16.gmra.mrb[124].mxu1 %v6747_v46 }
 0x376   :  { %5863 = vmatprep.mubr.bf16.mxu1 %v6833_v59 }
 0x37a   :  { %5141 = vmatmul.mubr.bf16.gmra.mrb[228].mxu0 %v6731_v63  ;;  %v5465_v63 = vsel %vm9225_vm8, %v5463_v33, %v5464_v52  ;;  %v5484_v33 = vrot.slane %v5482_v19, 4 }
 0x37b   :  { %5148 = vmatprep.mubr.bf16.mxu0 %v10618_v48  ;;  %v10777_v46 = vcombine.low %v5462_v2, %v5465_v63 }
 0x37d   :  { %5864 = vmatmul.mubr.bf16.vlgmr.msra.gmra.mrb[128].mxu1 %v6832_v41 }
 0x37e   :  { %5871 = vmatprep.mubr.bf16.mxu1 %v10768_v37  ;;  %7932 = vmatpush3.bf16.msra.mxu1 %v8480_v39  ;;  %v8483_v39 = vld [vmem:[#allocation8 + $0x218] sm:$0xff]  }
 0x37f   :  { %7933 = vmatprep.subr.bf16.mxu1 %v8481_v15 }
 0x382   :  { %5149 = vmatmul.mubr.bf16.gmra.mrb[232].mxu0 %v10612_v57  ;;  %7934 = vmatpush3.bf16.msra.mxu1 %v8481_v15  ;;  %v8484_v57 = vld [vmem:[#allocation8 + $0x220] sm:$0xff]  }
 0x383   :  { %5156 = vmatprep.mubr.bf16.mxu0 %v10623_v25  ;;  %7935 = vmatprep.subr.bf16.mxu1 %v8482_v47 }
 0x385   :  { %5872 = vmatmul.mubr.bf16.gmra.mrb[132].mxu1 %v6833_v59  ;;  %v5469_v59 = vsel %vm9225_vm8, %v6818_v7, %v5468_v54 }
 0x386   :  { %5879 = vmatprep.mubr.bf16.mxu1 %v10777_v46  ;;  %7936 = vmatpush3.bf16.msra.mxu1 %v8482_v47  ;;  %v10786_v50 = vcombine.low %v5469_v59, %v5472_v43  ;;  %v5483_v47 = vsel %vm9225_vm8, %v6820_v30, %v5482_v19 }
 0x387   :  { %7937 = vmatprep.subr.bf16.mxu1 %v8483_v39 }
 0x38a   :  { %5157 = vmatmul.mubr.bf16.gmra.mrb[236].mxu0 %v10618_v48  ;;  %7938 = vmatpush3.bf16.msra.mxu1 %v8483_v39  ;;  %v5478_v48 = vrot.slane %v8550_v5, 5 }
 0x38b   :  { %5164 = vmatprep.mubr.bf16.mxu0 %v10631_v51  ;;  %7939 = vmatprep.subr.bf16.mxu1 %v8484_v57 }
 0x38c   :  { %v5479_v41 = vsel %vm9225_vm8, %v5477_v22, %v5478_v48 }
 0x38d   :  { %5880 = vmatmul.mubr.bf16.gmra.mrb[136].mxu1 %v10768_v37  ;;  %v10796_v15 = vcombine.low %v5476_v44, %v5479_v41 }
 0x38e   :  { %5887 = vmatprep.mubr.bf16.mxu1 %v10786_v50  ;;  %7940 = vmatpush3.bf16.msra.mxu1 %v8484_v57 }
 0x38f   :  { %7941 = vmatprep.subr.bf16.mxu1 %v8485_v55 }
 0x392   :  { %5165 = vmatmul.mubr.bf16.gmra.mrb[240].mxu0 %v10623_v25  ;;  %7942 = vmatpush3.bf16.msra.mxu1 %v8485_v55  ;;  %v5485_v25 = vrot.slane %v8553_v45, 5 }
 0x393   :  { %5172 = vmatprep.mubr.bf16.mxu0 %v10635_v32  ;;  %7943 = vmatprep.subr.bf16.mxu1 %v8486_v21 }
 0x394   :  { %v5486_v52 = vsel %vm9225_vm8, %v5484_v33, %v5485_v25 }
 0x395   :  { %5888 = vmatmul.mubr.bf16.gmra.mrb[140].mxu1 %v10777_v46  ;;  %v10806_v63 = vcombine.low %v5483_v47, %v5486_v52 }
 0x396   :  { %5895 = vmatprep.mubr.bf16.mxu1 %v10796_v15  ;;  %7944 = vmatpush3.bf16.msra.mxu1 %v8486_v21 }
 0x397   :  { %7945 = vmatprep.subr.bf16.mxu1 %v8487_v61 }
 0x39a   :  { %5173 = vmatmul.mubr.bf16.gmra.mrb[244].mxu0 %v10631_v51  ;;  %7946 = vmatpush3.bf16.msra.mxu1 %v8487_v61 }
 0x39b   :  { %5180 = vmatprep.mubr.bf16.mxu0 %v10641_v49 }
 0x39d   :  { %5896 = vmatmul.mubr.bf16.gmra.mrb[144].mxu1 %v10786_v50 }
 0x39e   :  { %5903 = vmatprep.mubr.bf16.mxu1 %v10806_v63 }
 0x3a2   :  { %5181 = vmatmul.mubr.bf16.gmra.mrb[248].mxu0 %v10635_v32 }
 0x3a3   :  { %5188 = vmatprep.mubr.bf16.mxu0 %v10567_v40 }
 0x3a5   :  { %5904 = vmatmul.mubr.bf16.gmra.mrb[148].mxu1 %v10796_v15 }
 0x3a6   :  { %5911 = vmatprep.mubr.bf16.mxu1 %v10653_v6 }
 0x3aa   :  { %5189 = vmatmul.mubr.bf16.gmra.mrb[252].mxu0 %v10641_v49 }
 0x3ab   :  { %5196 = vmatprep.mubr.bf16.mxu0 %v10575_v56 }
 0x3ad   :  { %5912 = vmatmul.mubr.bf16.gmra.mrb[152].mxu1 %v10806_v63 }
 0x3ae   :  { %5919 = vmatprep.mubr.bf16.mxu1 %v10669_v36 }
 0x3b2   :  { %5197 = vmatmul.mubr.bf16.gmra.mrb[0].mxu0 %v10567_v40 }
 0x3b3   :  { %5204 = vmatprep.mubr.bf16.mxu0 %v10579_v3 }
 0x3b5   :  { %5920 = vmatmul.mubr.bf16.gmra.mrb[156].mxu1 %v10653_v6 }
 0x3b6   :  { %5927 = vmatprep.mubr.bf16.mxu1 %v10676_v4 }
 0x3ba   :  { %5205 = vmatmul.mubr.bf16.gmra.mrb[4].mxu0 %v10575_v56 }
 0x3bb   :  { %5212 = vmatprep.mubr.bf16.mxu0 %v10583_v16 }
 0x3bd   :  { %5928 = vmatmul.mubr.bf16.gmra.mrb[160].mxu1 %v10669_v36 }
 0x3be   :  { %5935 = vmatprep.mubr.bf16.mxu1 %v10686_v26 }
 0x3c2   :  { %5213 = vmatmul.mubr.bf16.gmra.mrb[8].mxu0 %v10579_v3 }
 0x3c3   :  { %5220 = vmatprep.mubr.bf16.mxu0 %v10587_v10 }
 0x3c5   :  { %5936 = vmatmul.mubr.bf16.gmra.mrb[164].mxu1 %v10676_v4  ;;  %v7299_v40 = vpop.f32.mrb[160].mxu0 }
 0x3c6   :  { %5943 = vmatprep.mubr.bf16.mxu1 %v10692_v17  ;;  %v7300_v51 = vpop.f32.mrb[161].mxu0 }
 0x3c7   :  { %v10830_v32 = vadd.f32 %v7300_v51, %v7299_v40  ;;  %v7302_v49 = vpop.f32.mrb[162].mxu0 }
 0x3c8   :  { %v7303_v56 = vpop.f32.mrb[163].mxu0 }
 0x3c9   :  { %v10832_v28 = vadd.f32 %v7303_v56, %v7302_v49 }
 0x3ca   :  { %5221 = vmatmul.mubr.bf16.gmra.mrb[12].mxu0 %v10583_v16 }
 0x3cb   :  { %5228 = vmatprep.mubr.bf16.mxu0 %v10591_v24 }
 0x3cd   :  { %5944 = vmatmul.mubr.bf16.gmra.mrb[168].mxu1 %v10686_v26  ;;  %v7305_v3 = vpop.f32.mrb[164].mxu0 }
 0x3ce   :  { %5951 = vmatprep.mubr.bf16.mxu1 %v10708_v1  ;;  %v7306_v54 = vpop.f32.mrb[165].mxu0 }
 0x3cf   :  { %v10838_v2 = vadd.f32 %v7306_v54, %v7305_v3  ;;  %v7308_v39 = vpop.f32.mrb[166].mxu0 }
 0x3d0   :  { %v7309_v11 = vpop.f32.mrb[167].mxu0 }
 0x3d1   :  { %v10840_v58 = vadd.f32 %v7309_v11, %v7308_v39 }
 0x3d2   :  { %5229 = vmatmul.mubr.bf16.gmra.mrb[16].mxu0 %v10587_v10 }
 0x3d3   :  { %5236 = vmatprep.mubr.bf16.mxu0 %v10596_v12 }
 0x3d5   :  { %5952 = vmatmul.mubr.bf16.gmra.mrb[172].mxu1 %v10692_v17  ;;  %v7311_v16 = vpop.f32.mrb[168].mxu0 }
 0x3d6   :  { %5959 = vmatprep.mubr.bf16.mxu1 %v10715_v18  ;;  %v7312_v7 = vpop.f32.mrb[169].mxu0 }
 0x3d7   :  { %v10846_v60 = vadd.f32 %v7312_v7, %v7311_v16  ;;  %v7314_v35 = vpop.f32.mrb[170].mxu0 }
 0x3d8   :  { %v7315_v57 = vpop.f32.mrb[171].mxu0 }
 0x3d9   :  { %v10848_v43 = vadd.f32 %v7315_v57, %v7314_v35 }
 0x3da   :  { %5237 = vmatmul.mubr.bf16.gmra.mrb[20].mxu0 %v10591_v24 }
 0x3db   :  { %5244 = vmatprep.mubr.bf16.mxu0 %v10600_v42 }
 0x3dd   :  { %5960 = vmatmul.mubr.bf16.gmra.mrb[176].mxu1 %v10708_v1  ;;  %v7317_v10 = vpop.f32.mrb[172].mxu0 }
 0x3de   :  { %5967 = vmatprep.mubr.bf16.mxu1 %v10724_v31  ;;  %v7318_v23 = vpop.f32.mrb[173].mxu0 }
 0x3df   :  { %v10854_v8 = vadd.f32 %v7318_v23, %v7317_v10  ;;  %v7320_v59 = vpop.f32.mrb[174].mxu0 }
 0x3e0   :  { %v7321_v55 = vpop.f32.mrb[175].mxu0 }
 0x3e1   :  { %v10856_v22 = vadd.f32 %v7321_v55, %v7320_v59 }
 0x3e2   :  { %5245 = vmatmul.mubr.bf16.gmra.mrb[24].mxu0 %v10596_v12 }
 0x3e3   :  { %5252 = vmatprep.mubr.bf16.mxu0 %v10604_v14 }
 0x3e5   :  { %5968 = vmatmul.mubr.bf16.gmra.mrb[180].mxu1 %v10715_v18  ;;  %v7323_v24 = vpop.f32.mrb[176].mxu0 }
 0x3e6   :  { %5975 = vmatprep.mubr.bf16.mxu1 %v10728_v0  ;;  %v7324_v13 = vpop.f32.mrb[177].mxu0 }
 0x3e7   :  { %v10862_v34 = vadd.f32 %v7324_v13, %v7323_v24  ;;  %v7326_v5 = vpop.f32.mrb[178].mxu0 }
 0x3e8   :  { %v7327_v48 = vpop.f32.mrb[179].mxu0 }
 0x3e9   :  { %v10864_v21 = vadd.f32 %v7327_v48, %v7326_v5 }
 0x3ea   :  { %5253 = vmatmul.mubr.bf16.gmra.mrb[28].mxu0 %v10600_v42 }
 0x3ed   :  { %5976 = vmatmul.mubr.bf16.gmra.mrb[184].mxu1 %v10724_v31  ;;  %v7329_v41 = vpop.f32.mrb[180].mxu0 }
 0x3ee   :  { %5983 = vmatprep.mubr.bf16.mxu1 %v10737_v27  ;;  %v7330_v12 = vpop.f32.mrb[181].mxu0 }
 0x3ef   :  { %v10869_v14 = vadd.f32 %v7330_v12, %v7329_v41  ;;  %v7332_v20 = vpop.f32.mrb[182].mxu0  ;;  %v5561_v41 = vrot.slane %v10536_v29, 5 }
 0x3f0   :  { %v7333_v19 = vpop.f32.mrb[183].mxu0 }
 0x3f1   :  { %v10871_v44 = vadd.f32 %v7333_v19, %v7332_v20  ;;  %v6831_v19 = vrot.slane %v11492_v62, 9 }
 0x3f5   :  { %5984 = vmatmul.mubr.bf16.gmra.mrb[188].mxu1 %v10728_v0  ;;  %v7335_v61 = vpop.f32.mrb[184].mxu0 }
 0x3f6   :  { %7947 = vmatprep.mubr.bf16.mxu1 %v10768_v37  ;;  %v7336_v33 = vpop.f32.mrb[185].mxu0 }
 0x3f7   :  { %v10875_v53 = vadd.f32 %v7336_v33, %v7335_v61  ;;  %v7338_v42 = vpop.f32.mrb[186].mxu0  ;;  %v5563_v61 = vrot.slane %v5561_v41, 4  ;;  %v5564_v33 = vrot.slane %v10546_v9, 5 }
 0x3f8   :  { %v7339_v30 = vpop.f32.mrb[187].mxu0 }
 0x3f9   :  { %v10877_v45 = vadd.f32 %v7339_v30, %v7338_v42  ;;  %v5565_v29 = vsel %vm9225_vm8, %v5563_v61, %v5564_v33 }
 0x3fd   :  { %7948 = vmatmul.mubr.bf16.vlgmr.msra.gmra.mrb[96].mxu1 %v10777_v46  ;;  %v7341_v25 = vpop.f32.mrb[188].mxu0 }
 0x3fe   :  { %7951 = vmatprep.mubr.bf16.mxu1 %v10786_v50  ;;  %v7342_v52 = vpop.f32.mrb[189].mxu0 }
 0x3ff   :  { %v10881_v47 = vadd.f32 %v7342_v52, %v7341_v25  ;;  %v7344_v40 = vpop.f32.mrb[190].mxu0 }
 0x400   :  { %v7345_v51 = vpop.f32.mrb[191].mxu0 }
 0x401   :  { %v10883_v49 = vadd.f32 %v7345_v51, %v7344_v40 }
 0x405   :  { %7952 = vmatmul.mubr.bf16.gmra.mrb[100].mxu1 %v10796_v15  ;;  %v7347_v37 = vpop.f32.mrb[192].mxu0 }
 0x406   :  { %7955 = vmatprep.mubr.bf16.mxu1 %v10806_v63  ;;  %v7348_v56 = vpop.f32.mrb[193].mxu0 }
 0x407   :  { %v10887_v3 = vadd.f32 %v7348_v56, %v7347_v37  ;;  %v7350_v54 = vpop.f32.mrb[194].mxu0 }
 0x408   :  { %v7351_v46 = vpop.f32.mrb[195].mxu0 }
 0x409   :  { %v10889_v39 = vadd.f32 %v7351_v46, %v7350_v54 }
 0x40d   :  { %7956 = vmatmul.mubr.bf16.gmra.mrb[104].mxu1 %v10653_v6  ;;  %v7353_v50 = vpop.f32.mrb[196].mxu0 }
 0x40e   :  { %7959 = vmatprep.mubr.bf16.mxu1 %v10669_v36  ;;  %v7354_v11 = vpop.f32.mrb[197].mxu0 }
 0x40f   :  { %v10893_v16 = vadd.f32 %v7354_v11, %v7353_v50  ;;  %v7356_v7 = vpop.f32.mrb[198].mxu0 }
 0x410   :  { %v7357_v15 = vpop.f32.mrb[199].mxu0 }
 0x411   :  { %v10895_v35 = vadd.f32 %v7357_v15, %v7356_v7 }
 0x415   :  { %7960 = vmatmul.mubr.bf16.gmra.mrb[108].mxu1 %v10676_v4  ;;  %v7359_v63 = vpop.f32.mrb[200].mxu0 }
 0x416   :  { %7963 = vmatprep.mubr.bf16.mxu1 %v10686_v26  ;;  %v7360_v57 = vpop.f32.mrb[201].mxu0 }
 0x417   :  { %v10899_v10 = vadd.f32 %v7360_v57, %v7359_v63  ;;  %v7362_v23 = vpop.f32.mrb[202].mxu0 }
 0x418   :  { %v7363_v6 = vpop.f32.mrb[203].mxu0 }
 0x419   :  { %v10901_v59 = vadd.f32 %v7363_v6, %v7362_v23 }
 0x41d   :  { %7964 = vmatmul.mubr.bf16.gmra.mrb[112].mxu1 %v10692_v17  ;;  %v7365_v36 = vpop.f32.mrb[204].mxu0 }
 0x41e   :  { %7967 = vmatprep.mubr.bf16.mxu1 %v10708_v1  ;;  %v7366_v55 = vpop.f32.mrb[205].mxu0 }
 0x41f   :  { %v10905_v24 = vadd.f32 %v7366_v55, %v7365_v36  ;;  %v7368_v13 = vpop.f32.mrb[206].mxu0 }
 0x420   :  { %v7369_v4 = vpop.f32.mrb[207].mxu0 }
 0x421   :  { %v10907_v5 = vadd.f32 %v7369_v4, %v7368_v13 }
 0x425   :  { %7968 = vmatmul.mubr.bf16.gmra.mrb[116].mxu1 %v10715_v18  ;;  %v7371_v26 = vpop.f32.mrb[208].mxu0 }
 0x426   :  { %7971 = vmatprep.mubr.bf16.mxu1 %v10724_v31  ;;  %v7372_v48 = vpop.f32.mrb[209].mxu0  ;;  %v5562_v31 = vsel %vm9225_vm8, %v6831_v19, %v5561_v41 }
 0x427   :  { %v10912_v12 = vadd.f32 %v7372_v48, %v7371_v26  ;;  %v7374_v17 = vpop.f32.mrb[210].mxu0  ;;  %v6849_v62 = vcombine.low %v5562_v31, %v5565_v29 }
 0x428   :  { %v7375_v20 = vpop.f32.mrb[211].mxu0 }
 0x429   :  { %v10914_v1 = vadd.f32 %v7375_v20, %v7374_v17 }
 0x42d   :  { %7972 = vmatmul.mubr.bf16.gmra.mrb[120].mxu1 %v10728_v0  ;;  %v7377_v18 = vpop.f32.mrb[212].mxu0 }
 0x42e   :  { %7975 = vmatprep.mubr.bf16.mxu1 %v10737_v27  ;;  %v7378_v42 = vpop.f32.mrb[213].mxu0 }
 0x42f   :  { %v10924_v30 = vadd.f32 %v7378_v42, %v7377_v18  ;;  %v7380_v25 = vpop.f32.mrb[214].mxu0 }
 0x430   :  { %v7381_v52 = vpop.f32.mrb[215].mxu0 }
 0x431   :  { %v10926_v40 = vadd.f32 %v7381_v52, %v7380_v25 }
 0x435   :  { %7976 = vmatmul.mubr.bf16.gmra.mrb[124].mxu1 %v6849_v62  ;;  %v7383_v9 = vpop.f32.mrb[216].mxu0 }
 0x436   :  { %v7384_v0 = vpop.f32.mrb[217].mxu0 }
 0x437   :  { %v10928_v51 = vadd.f32 %v7384_v0, %v7383_v9  ;;  %v7386_v27 = vpop.f32.mrb[218].mxu0 }
 0x438   :  { %v7387_v37 = vpop.f32.mrb[219].mxu0 }
 0x439   :  { %v10930_v56 = vadd.f32 %v7387_v37, %v7386_v27 }
 0x43d   :  { %v7389_v54 = vpop.f32.mrb[220].mxu0 }
 0x43e   :  { %v7390_v38 = vpop.f32.mrb[221].mxu0 }
 0x43f   :  { %v10932_v46 = vadd.f32 %v7390_v38, %v7389_v54  ;;  %v7392_v50 = vpop.f32.mrb[222].mxu0 }
 0x440   :  { %v7393_v11 = vpop.f32.mrb[223].mxu0 }
 0x441   :  { %v10934_v7 = vadd.f32 %v7393_v11, %v7392_v50 }
 0x445   :  { %v7435_v15 = vpop.f32.mrb[224].mxu0 }
 0x446   :  { %v7436_v63 = vpop.f32.mrb[225].mxu0 }
 0x447   :  { %v7437_v57 = vadd.f32 %v7436_v63, %v7435_v15  ;;  %v7438_v23 = vpop.f32.mrb[226].mxu0 }
 0x448   :  { %v7439_v6 = vpop.f32.mrb[227].mxu0 }
 0x449   :  { %v8110_v36 = vadd.f32 %v7437_v57, %v10830_v32  ;;  %v7440_v55 = vadd.f32 %v7439_v6, %v7438_v23 }
 0x44b   :  { %v8116_v13 = vadd.f32 %v7440_v55, %v10832_v28 }
 0x44d   :  { %v7441_v4 = vpop.f32.mrb[228].mxu0 }
 0x44e   :  { %v7442_v26 = vpop.f32.mrb[229].mxu0 }
 0x44f   :  { %v7443_v48 = vadd.f32 %v7442_v26, %v7441_v4  ;;  %v7444_v41 = vpop.f32.mrb[230].mxu0 }
 0x450   :  { %v7571_v17 = vpop.f32.mrb[128].mxu1  ;;  %v7445_v20 = vpop.f32.mrb[231].mxu0 }
 0x451   :  { %v7572_v19 = vpop.f32.mrb[129].mxu1  ;;  %v8107_v61 = vadd.f32 %v7443_v48, %v10838_v2  ;;  %v7446_v33 = vadd.f32 %v7445_v20, %v7444_v41 }
 0x452   :  { %v7573_v18 = vadd.f32 %v7572_v19, %v7571_v17  ;;  %v7574_v31 = vpop.f32.mrb[130].mxu1 }
 0x453   :  { %v7575_v29 = vpop.f32.mrb[131].mxu1  ;;  %v8113_v42 = vadd.f32 %v7446_v33, %v10840_v58 }
 0x454   :  { %v7576_v25 = vadd.f32 %v7575_v29, %v7574_v31  ;;  %v10940_v32 = vadd.f32 %v8110_v36, %v7573_v18 }
 0x455   :  { %v7447_v52 = vpop.f32.mrb[232].mxu0 }
 0x456   :  { %v7448_v28 = vpop.f32.mrb[233].mxu0  ;;  %v10942_v62 = vadd.f32 %v8116_v13, %v7576_v25 }
 0x457   :  { %v7449_v9 = vadd.f32 %v7448_v28, %v7447_v52  ;;  %v7450_v0 = vpop.f32.mrb[234].mxu0 }
 0x458   :  { %v7577_v27 = vpop.f32.mrb[132].mxu1  ;;  %v7451_v37 = vpop.f32.mrb[235].mxu0 }
 0x459   :  { %v7578_v54 = vpop.f32.mrb[133].mxu1  ;;  %v8122_v2 = vadd.f32 %v7449_v9, %v10846_v60  ;;  %v7452_v38 = vadd.f32 %v7451_v37, %v7450_v0 }
 0x45a   :  { %v7579_v50 = vadd.f32 %v7578_v54, %v7577_v27  ;;  %v7580_v11 = vpop.f32.mrb[134].mxu1 }
 0x45b   :  { %v7581_v15 = vpop.f32.mrb[135].mxu1  ;;  %v8128_v58 = vadd.f32 %v7452_v38, %v10848_v43 }
 0x45c   :  { %v7582_v63 = vadd.f32 %v7581_v15, %v7580_v11  ;;  %v10946_v57 = vadd.f32 %v8107_v61, %v7579_v50 }
 0x45d   :  { %v7453_v23 = vpop.f32.mrb[236].mxu0 }
 0x45e   :  { %v7454_v6 = vpop.f32.mrb[237].mxu0  ;;  %v10948_v36 = vadd.f32 %v8113_v42, %v7582_v63 }
 0x45f   :  { %v7455_v55 = vadd.f32 %v7454_v6, %v7453_v23  ;;  %v7456_v13 = vpop.f32.mrb[238].mxu0 }
 0x460   :  { %v7583_v4 = vpop.f32.mrb[136].mxu1  ;;  %v7457_v26 = vpop.f32.mrb[239].mxu0 }
 0x461   :  { %v7584_v48 = vpop.f32.mrb[137].mxu1  ;;  %v8119_v60 = vadd.f32 %v7455_v55, %v10854_v8  ;;  %v7458_v41 = vadd.f32 %v7457_v26, %v7456_v13 }
 0x462   :  { %v7585_v17 = vadd.f32 %v7584_v48, %v7583_v4  ;;  %v7586_v20 = vpop.f32.mrb[138].mxu1 }
 0x463   :  { %v7587_v19 = vpop.f32.mrb[139].mxu1  ;;  %v8125_v43 = vadd.f32 %v7458_v41, %v10856_v22 }
 0x464   :  { %v7588_v33 = vadd.f32 %v7587_v19, %v7586_v20  ;;  %v10952_v61 = vadd.f32 %v8122_v2, %v7585_v17 }
 0x465   :  { %v7459_v18 = vpop.f32.mrb[240].mxu0 }
 0x466   :  { %v7460_v31 = vpop.f32.mrb[241].mxu0  ;;  %v10954_v29 = vadd.f32 %v8128_v58, %v7588_v33 }
 0x467   :  { %v7461_v42 = vadd.f32 %v7460_v31, %v7459_v18  ;;  %v7462_v25 = vpop.f32.mrb[242].mxu0 }
 0x468   :  { %v7589_v52 = vpop.f32.mrb[140].mxu1  ;;  %v7463_v28 = vpop.f32.mrb[243].mxu0 }
 0x469   :  { %v7590_v9 = vpop.f32.mrb[141].mxu1  ;;  %v8134_v8 = vadd.f32 %v7461_v42, %v10862_v34  ;;  %v7464_v0 = vadd.f32 %v7463_v28, %v7462_v25 }
 0x46a   :  { %v7591_v27 = vadd.f32 %v7590_v9, %v7589_v52  ;;  %v7592_v37 = vpop.f32.mrb[142].mxu1 }
 0x46b   :  { %v7593_v54 = vpop.f32.mrb[143].mxu1  ;;  %v8140_v22 = vadd.f32 %v7464_v0, %v10864_v21 }
 0x46c   :  { %v7594_v38 = vadd.f32 %v7593_v54, %v7592_v37  ;;  %v10958_v2 = vadd.f32 %v8119_v60, %v7591_v27 }
 0x46d   :  { %v7465_v50 = vpop.f32.mrb[244].mxu0 }
 0x46e   :  { %v7466_v11 = vpop.f32.mrb[245].mxu0  ;;  %v10960_v15 = vadd.f32 %v8125_v43, %v7594_v38 }
 0x46f   :  { %v7467_v58 = vadd.f32 %v7466_v11, %v7465_v50  ;;  %v7468_v63 = vpop.f32.mrb[246].mxu0 }
 0x470   :  { %v7595_v23 = vpop.f32.mrb[144].mxu1  ;;  %v7469_v6 = vpop.f32.mrb[247].mxu0 }
 0x471   :  { %v7596_v55 = vpop.f32.mrb[145].mxu1  ;;  %v8131_v34 = vadd.f32 %v7467_v58, %v10869_v14  ;;  %v7470_v13 = vadd.f32 %v7469_v6, %v7468_v63 }
 0x472   :  { %v7597_v4 = vadd.f32 %v7596_v55, %v7595_v23  ;;  %v7598_v26 = vpop.f32.mrb[146].mxu1 }
 0x473   :  { %v7599_v48 = vpop.f32.mrb[147].mxu1  ;;  %v8137_v21 = vadd.f32 %v7470_v13, %v10871_v44 }
 0x474   :  { %v7600_v41 = vadd.f32 %v7599_v48, %v7598_v26  ;;  %v10964_v60 = vadd.f32 %v8134_v8, %v7597_v4 }
 0x475   :  { %v7471_v17 = vpop.f32.mrb[248].mxu0 }
 0x476   :  { %v7472_v20 = vpop.f32.mrb[249].mxu0  ;;  %v10966_v19 = vadd.f32 %v8140_v22, %v7600_v41 }
 0x477   :  { %v7473_v43 = vadd.f32 %v7472_v20, %v7471_v17  ;;  %v7474_v33 = vpop.f32.mrb[250].mxu0 }
 0x478   :  { %v7601_v18 = vpop.f32.mrb[148].mxu1  ;;  %v7475_v31 = vpop.f32.mrb[251].mxu0 }
 0x479   :  { %v7602_v42 = vpop.f32.mrb[149].mxu1  ;;  %v8146_v14 = vadd.f32 %v7473_v43, %v10875_v53  ;;  %v7476_v25 = vadd.f32 %v7475_v31, %v7474_v33 }
 0x47a   :  { %v7603_v52 = vadd.f32 %v7602_v42, %v7601_v18  ;;  %v7604_v28 = vpop.f32.mrb[150].mxu1 }
 0x47b   :  { %v7605_v9 = vpop.f32.mrb[151].mxu1  ;;  %v8152_v44 = vadd.f32 %v7476_v25, %v10877_v45 }
 0x47c   :  { %v7606_v0 = vadd.f32 %v7605_v9, %v7604_v28  ;;  %v10970_v8 = vadd.f32 %v8131_v34, %v7603_v52 }
 0x47d   :  { %v7477_v27 = vpop.f32.mrb[252].mxu0 }
 0x47e   :  { %v7478_v37 = vpop.f32.mrb[253].mxu0  ;;  %v10972_v54 = vadd.f32 %v8137_v21, %v7606_v0 }
 0x47f   :  { %v7479_v22 = vadd.f32 %v7478_v37, %v7477_v27  ;;  %v7480_v38 = vpop.f32.mrb[254].mxu0 }
 0x480   :  { %v7607_v50 = vpop.f32.mrb[152].mxu1  ;;  %v7481_v11 = vpop.f32.mrb[255].mxu0 }
 0x481   :  { %v7608_v58 = vpop.f32.mrb[153].mxu1  ;;  %v8143_v53 = vadd.f32 %v7479_v22, %v10881_v47  ;;  %v7482_v63 = vadd.f32 %v7481_v11, %v7480_v38 }
 0x482   :  { %v7609_v23 = vadd.f32 %v7608_v58, %v7607_v50  ;;  %v7610_v6 = vpop.f32.mrb[154].mxu1 }
 0x483   :  { %v7611_v55 = vpop.f32.mrb[155].mxu1  ;;  %v8149_v45 = vadd.f32 %v7482_v63, %v10883_v49 }
 0x484   :  { %v7612_v13 = vadd.f32 %v7611_v55, %v7610_v6  ;;  %v10976_v34 = vadd.f32 %v8146_v14, %v7609_v23 }
 0x485   :  { %v7483_v4 = vpop.f32.mrb[0].mxu0 }
 0x486   :  { %v7484_v26 = vpop.f32.mrb[1].mxu0  ;;  %v10978_v48 = vadd.f32 %v8152_v44, %v7612_v13 }
 0x487   :  { %v7485_v21 = vadd.f32 %v7484_v26, %v7483_v4  ;;  %v7486_v41 = vpop.f32.mrb[2].mxu0 }
 0x488   :  { %v7613_v17 = vpop.f32.mrb[156].mxu1  ;;  %v7487_v20 = vpop.f32.mrb[3].mxu0 }
 0x489   :  { %v7614_v43 = vpop.f32.mrb[157].mxu1  ;;  %v8158_v47 = vadd.f32 %v7485_v21, %v10887_v3  ;;  %v7488_v33 = vadd.f32 %v7487_v20, %v7486_v41 }
 0x48a   :  { %v7615_v18 = vadd.f32 %v7614_v43, %v7613_v17  ;;  %v7616_v31 = vpop.f32.mrb[158].mxu1 }
 0x48b   :  { %v7617_v42 = vpop.f32.mrb[159].mxu1  ;;  %v8164_v49 = vadd.f32 %v7488_v33, %v10889_v39 }
 0x48c   :  { %v7618_v25 = vadd.f32 %v7617_v42, %v7616_v31  ;;  %v10982_v14 = vadd.f32 %v8143_v53, %v7615_v18 }
 0x48d   :  { %v7489_v52 = vpop.f32.mrb[4].mxu0 }
 0x48e   :  { %v7490_v28 = vpop.f32.mrb[5].mxu0  ;;  %v10984_v9 = vadd.f32 %v8149_v45, %v7618_v25 }
 0x48f   :  { %v7491_v44 = vadd.f32 %v7490_v28, %v7489_v52  ;;  %v7492_v0 = vpop.f32.mrb[6].mxu0 }
 0x490   :  { %v7619_v27 = vpop.f32.mrb[160].mxu1  ;;  %v7493_v37 = vpop.f32.mrb[7].mxu0 }
 0x491   :  { %v7620_v22 = vpop.f32.mrb[161].mxu1  ;;  %v8155_v3 = vadd.f32 %v7491_v44, %v10893_v16  ;;  %v7494_v38 = vadd.f32 %v7493_v37, %v7492_v0 }
 0x492   :  { %v7621_v50 = vadd.f32 %v7620_v22, %v7619_v27  ;;  %v7622_v11 = vpop.f32.mrb[162].mxu1 }
 0x493   :  { %v7623_v58 = vpop.f32.mrb[163].mxu1  ;;  %v8161_v39 = vadd.f32 %v7494_v38, %v10895_v35 }
 0x494   :  { %v7624_v63 = vadd.f32 %v7623_v58, %v7622_v11  ;;  %v10988_v53 = vadd.f32 %v8158_v47, %v7621_v50 }
 0x495   :  { %v7495_v23 = vpop.f32.mrb[8].mxu0 }
 0x496   :  { %v7496_v6 = vpop.f32.mrb[9].mxu0  ;;  %v10990_v55 = vadd.f32 %v8164_v49, %v7624_v63 }
 0x497   :  { %v7497_v45 = vadd.f32 %v7496_v6, %v7495_v23  ;;  %v7498_v13 = vpop.f32.mrb[10].mxu0 }
 0x498   :  { %v7625_v4 = vpop.f32.mrb[164].mxu1  ;;  %v7499_v26 = vpop.f32.mrb[11].mxu0 }
 0x499   :  { %v7626_v21 = vpop.f32.mrb[165].mxu1  ;;  %v8170_v16 = vadd.f32 %v7497_v45, %v10899_v10  ;;  %v7500_v41 = vadd.f32 %v7499_v26, %v7498_v13 }
 0x49a   :  { %v7627_v17 = vadd.f32 %v7626_v21, %v7625_v4  ;;  %v7628_v20 = vpop.f32.mrb[166].mxu1 }
 0x49b   :  { %v7629_v43 = vpop.f32.mrb[167].mxu1  ;;  %v8176_v35 = vadd.f32 %v7500_v41, %v10901_v59 }
 0x49c   :  { %v7630_v33 = vadd.f32 %v7629_v43, %v7628_v20  ;;  %v10994_v47 = vadd.f32 %v8155_v3, %v7627_v17 }
 0x49d   :  { %v7501_v18 = vpop.f32.mrb[12].mxu0 }
 0x49e   :  { %v7502_v31 = vpop.f32.mrb[13].mxu0  ;;  %v10996_v42 = vadd.f32 %v8161_v39, %v7630_v33 }
 0x49f   :  { %v7503_v49 = vadd.f32 %v7502_v31, %v7501_v18  ;;  %v7504_v25 = vpop.f32.mrb[14].mxu0 }
 0x4a0   :  { %v7631_v52 = vpop.f32.mrb[168].mxu1  ;;  %v7505_v28 = vpop.f32.mrb[15].mxu0 }
 0x4a1   :  { %v7632_v44 = vpop.f32.mrb[169].mxu1  ;;  %v8167_v10 = vadd.f32 %v7503_v49, %v10905_v24  ;;  %v7506_v0 = vadd.f32 %v7505_v28, %v7504_v25 }
 0x4a2   :  { %v7633_v27 = vadd.f32 %v7632_v44, %v7631_v52  ;;  %v7634_v37 = vpop.f32.mrb[170].mxu1 }
 0x4a3   :  { %v7635_v22 = vpop.f32.mrb[171].mxu1  ;;  %v8173_v59 = vadd.f32 %v7506_v0, %v10907_v5 }
 0x4a4   :  { %v7636_v38 = vadd.f32 %v7635_v22, %v7634_v37  ;;  %v11000_v3 = vadd.f32 %v8170_v16, %v7633_v27 }
 0x4a5   :  { %v7507_v50 = vpop.f32.mrb[16].mxu0 }
 0x4a6   :  { %v7508_v11 = vpop.f32.mrb[17].mxu0  ;;  %v11002_v58 = vadd.f32 %v8176_v35, %v7636_v38 }
 0x4a7   :  { %v7509_v39 = vadd.f32 %v7508_v11, %v7507_v50  ;;  %v7510_v63 = vpop.f32.mrb[18].mxu0 }
 0x4a8   :  { %v7637_v23 = vpop.f32.mrb[172].mxu1  ;;  %v7511_v6 = vpop.f32.mrb[19].mxu0 }
 0x4a9   :  { %v7638_v45 = vpop.f32.mrb[173].mxu1  ;;  %v8182_v24 = vadd.f32 %v7509_v39, %v10912_v12  ;;  %v7512_v13 = vadd.f32 %v7511_v6, %v7510_v63 }
 0x4aa   :  { %v7639_v4 = vadd.f32 %v7638_v45, %v7637_v23  ;;  %v7640_v26 = vpop.f32.mrb[174].mxu1 }
 0x4ab   :  { %v7641_v21 = vpop.f32.mrb[175].mxu1  ;;  %v8188_v5 = vadd.f32 %v7512_v13, %v10914_v1 }
 0x4ac   :  { %v7642_v41 = vadd.f32 %v7641_v21, %v7640_v26  ;;  %v11006_v16 = vadd.f32 %v8167_v10, %v7639_v4 }
 0x4ad   :  { %v7513_v17 = vpop.f32.mrb[20].mxu0 }
 0x4ae   :  { %v7514_v20 = vpop.f32.mrb[21].mxu0  ;;  %v11008_v43 = vadd.f32 %v8173_v59, %v7642_v41 }
 0x4af   :  { %v7515_v35 = vadd.f32 %v7514_v20, %v7513_v17  ;;  %v7516_v33 = vpop.f32.mrb[22].mxu0 }
 0x4b0   :  { %v7643_v18 = vpop.f32.mrb[176].mxu1  ;;  %v7517_v31 = vpop.f32.mrb[23].mxu0 }
 0x4b1   :  { %v7644_v49 = vpop.f32.mrb[177].mxu1  ;;  %v8179_v12 = vadd.f32 %v7515_v35, %v10924_v30  ;;  %v7518_v25 = vadd.f32 %v7517_v31, %v7516_v33 }
 0x4b2   :  { %v7645_v52 = vadd.f32 %v7644_v49, %v7643_v18  ;;  %v7646_v28 = vpop.f32.mrb[178].mxu1 }
 0x4b3   :  { %v7647_v44 = vpop.f32.mrb[179].mxu1  ;;  %v8185_v1 = vadd.f32 %v7518_v25, %v10926_v40 }
 0x4b4   :  { %v7648_v0 = vadd.f32 %v7647_v44, %v7646_v28  ;;  %v11012_v10 = vadd.f32 %v8182_v24, %v7645_v52 }
 0x4b5   :  { %v7519_v27 = vpop.f32.mrb[24].mxu0 }
 0x4b6   :  { %v7520_v37 = vpop.f32.mrb[25].mxu0  ;;  %v11014_v22 = vadd.f32 %v8188_v5, %v7648_v0 }
 0x4b7   :  { %v7521_v59 = vadd.f32 %v7520_v37, %v7519_v27  ;;  %v7522_v38 = vpop.f32.mrb[26].mxu0 }
 0x4b8   :  { %v7649_v50 = vpop.f32.mrb[180].mxu1  ;;  %v7523_v11 = vpop.f32.mrb[27].mxu0 }
 0x4b9   :  { %v7650_v39 = vpop.f32.mrb[181].mxu1  ;;  %v8194_v30 = vadd.f32 %v7521_v59, %v10928_v51  ;;  %v7524_v63 = vadd.f32 %v7523_v11, %v7522_v38 }
 0x4ba   :  { %v7651_v23 = vadd.f32 %v7650_v39, %v7649_v50  ;;  %v7652_v6 = vpop.f32.mrb[182].mxu1 }
 0x4bb   :  { %v7653_v45 = vpop.f32.mrb[183].mxu1  ;;  %v8200_v40 = vadd.f32 %v7524_v63, %v10930_v56 }
 0x4bc   :  { %v7654_v13 = vadd.f32 %v7653_v45, %v7652_v6  ;;  %v11018_v24 = vadd.f32 %v8179_v12, %v7651_v23 }
 0x4bd   :  { %v7525_v4 = vpop.f32.mrb[28].mxu0 }
 0x4be   :  { %v7526_v26 = vpop.f32.mrb[29].mxu0  ;;  %v11020_v21 = vadd.f32 %v8185_v1, %v7654_v13 }
 0x4bf   :  { %v7527_v5 = vadd.f32 %v7526_v26, %v7525_v4  ;;  %v7528_v41 = vpop.f32.mrb[30].mxu0 }
 0x4c0   :  { %v7655_v17 = vpop.f32.mrb[184].mxu1  ;;  %v7529_v20 = vpop.f32.mrb[31].mxu0 }
 0x4c1   :  { %v7656_v35 = vpop.f32.mrb[185].mxu1  ;;  %v8191_v51 = vadd.f32 %v7527_v5, %v10932_v46  ;;  %v7530_v33 = vadd.f32 %v7529_v20, %v7528_v41 }
 0x4c2   :  { %v7657_v18 = vadd.f32 %v7656_v35, %v7655_v17  ;;  %v7658_v31 = vpop.f32.mrb[186].mxu1 }
 0x4c3   :  { %v7659_v49 = vpop.f32.mrb[187].mxu1  ;;  %v8197_v56 = vadd.f32 %v7530_v33, %v10934_v7 }
 0x4c4   :  { %v7660_v25 = vadd.f32 %v7659_v49, %v7658_v31  ;;  %v11024_v12 = vadd.f32 %v8194_v30, %v7657_v18 }
 0x4c6   :  { %v11026_v52 = vadd.f32 %v8200_v40, %v7660_v25 }
 0x4c8   :  { %v7661_v28 = vpop.f32.mrb[188].mxu1 }
 0x4c9   :  { %v7662_v44 = vpop.f32.mrb[189].mxu1 }
 0x4ca   :  { %v7663_v1 = vadd.f32 %v7662_v44, %v7661_v28  ;;  %v7664_v0 = vpop.f32.mrb[190].mxu1 }
 0x4cb   :  { %v7665_v27 = vpop.f32.mrb[191].mxu1 }
 0x4cc   :  { %v7666_v37 = vadd.f32 %v7665_v27, %v7664_v0  ;;  %v11028_v59 = vadd.f32 %v8191_v51, %v7663_v1 }
 0x4ce   :  { %v11030_v46 = vadd.f32 %v8197_v56, %v7666_v37 }
 0x4d0   :  { %v7949_v38 = vpop.f32.mrb[96].mxu1 }
 0x4d1   :  { %v11033_v50 = vadd.f32 %v10946_v57, %v7949_v38  ;;  %v6026_v7 = vpop.f32.mrb[97].mxu1 }
 0x4d2   :  { %v11036_v11 = vadd.f32 %v10940_v32, %v6026_v7  ;;  %v7950_v39 = vpop.f32.mrb[98].mxu1 }
 0x4d3   :  { %v11039_v30 = vadd.f32 %v10948_v36, %v7950_v39  ;;  %v6029_v63 = vpop.f32.mrb[99].mxu1  ;;  %v6225_v32 = vmul.f32 %v11033_v50, %v11033_v50 }
 0x4d4   :  { %v11042_v23 = vadd.f32 %v10942_v62, %v6029_v63  ;;  %v6223_v6 = vmul.f32 %v11036_v11, %v11036_v11 }
 0x4d5   :  { %v6226_v26 = vmul.f32 %v11039_v30, %v11039_v30 }
 0x4d6   :  { %v6185_v45 = vadd.f32 %v11042_v23, %v11036_v11  ;;  %v6224_v57 = vmul.f32 %v11042_v23, %v11042_v23 }
 0x4d8   :  { %v6186_v40 = vadd.f32 %v11033_v50, %v6185_v45  ;;  %v6255_v36 = vadd.f32 %v6224_v57, %v6223_v6  ;;  %v7953_v13 = vpop.f32.mrb[100].mxu1 }
 0x4d9   :  { %v11054_v4 = vadd.f32 %v10958_v2, %v7953_v13  ;;  %v6042_v62 = vpop.f32.mrb[101].mxu1 }
 0x4da   :  { %v6256_v5 = vadd.f32 %v6255_v36, %v6225_v32  ;;  %v11059_v41 = vadd.f32 %v10952_v61, %v6042_v62  ;;  %v6187_v17 = vadd.f32 %v11039_v30, %v6186_v40  ;;  %v7954_v20 = vpop.f32.mrb[102].mxu1 }
 0x4db   :  { %v11063_v35 = vadd.f32 %v10960_v15, %v7954_v20  ;;  %v6045_v51 = vpop.f32.mrb[103].mxu1  ;;  %v6229_v15 = vmul.f32 %v11054_v4, %v11054_v4 }
 0x4dc   :  { %v6188_v33 = vadd.f32 %v11059_v41, %v6187_v17  ;;  %v6227_v2 = vmul.f32 %v11059_v41, %v11059_v41  ;;  %v6257_v18 = vadd.f32 %v6256_v5, %v6226_v26  ;;  %v11069_v31 = vadd.f32 %v10954_v29, %v6045_v51 }
 0x4dd   :  { %v6230_v29 = vmul.f32 %v11063_v35, %v11063_v35 }
 0x4de   :  { %v6258_v49 = vadd.f32 %v6257_v18, %v6227_v2  ;;  %v6189_v61 = vadd.f32 %v11069_v31, %v6188_v33  ;;  %v6228_v56 = vmul.f32 %v11069_v31, %v11069_v31 }
 0x4e0   :  { %v6190_v25 = vadd.f32 %v11054_v4, %v6189_v61  ;;  %v6259_v28 = vadd.f32 %v6258_v49, %v6228_v56  ;;  %v7957_v44 = vpop.f32.mrb[104].mxu1 }
 0x4e1   :  { %v11078_v1 = vadd.f32 %v10970_v8, %v7957_v44  ;;  %v6058_v0 = vpop.f32.mrb[105].mxu1 }
 0x4e2   :  { %v6260_v27 = vadd.f32 %v6259_v28, %v6229_v15  ;;  %v11083_v37 = vadd.f32 %v10964_v60, %v6058_v0  ;;  %v6191_v38 = vadd.f32 %v11063_v35, %v6190_v25  ;;  %v7958_v7 = vpop.f32.mrb[106].mxu1 }
 0x4e3   :  { %v11087_v39 = vadd.f32 %v10972_v54, %v7958_v7  ;;  %v6061_v63 = vpop.f32.mrb[107].mxu1  ;;  %v6233_v54 = vmul.f32 %v11078_v1, %v11078_v1 }
 0x4e4   :  { %v6192_v6 = vadd.f32 %v11083_v37, %v6191_v38  ;;  %v6231_v8 = vmul.f32 %v11083_v37, %v11083_v37  ;;  %v6261_v45 = vadd.f32 %v6260_v27, %v6230_v29  ;;  %v11093_v57 = vadd.f32 %v10966_v19, %v6061_v63 }
 0x4e5   :  { %v6234_v19 = vmul.f32 %v11087_v39, %v11087_v39 }
 0x4e6   :  { %v6262_v32 = vadd.f32 %v6261_v45, %v6231_v8  ;;  %v6193_v60 = vadd.f32 %v11093_v57, %v6192_v6  ;;  %v6232_v40 = vmul.f32 %v11093_v57, %v11093_v57 }
 0x4e8   :  { %v6194_v36 = vadd.f32 %v11078_v1, %v6193_v60  ;;  %v6263_v13 = vadd.f32 %v6262_v32, %v6232_v40  ;;  %v7961_v62 = vpop.f32.mrb[108].mxu1 }
 0x4e9   :  { %v11102_v26 = vadd.f32 %v10982_v14, %v7961_v62  ;;  %v6074_v5 = vpop.f32.mrb[109].mxu1 }
 0x4ea   :  { %v6264_v17 = vadd.f32 %v6263_v13, %v6233_v54  ;;  %v11107_v20 = vadd.f32 %v10976_v34, %v6074_v5  ;;  %v6195_v51 = vadd.f32 %v11087_v39, %v6194_v36  ;;  %v7962_v33 = vpop.f32.mrb[110].mxu1 }
 0x4eb   :  { %v11111_v2 = vadd.f32 %v10984_v9, %v7962_v33  ;;  %v6077_v18 = vpop.f32.mrb[111].mxu1  ;;  %v6237_v9 = vmul.f32 %v11102_v26, %v11102_v26 }
 0x4ec   :  { %v6196_v49 = vadd.f32 %v11107_v20, %v6195_v51  ;;  %v6235_v14 = vmul.f32 %v11107_v20, %v11107_v20  ;;  %v6265_v61 = vadd.f32 %v6264_v17, %v6234_v19  ;;  %v11117_v56 = vadd.f32 %v10978_v48, %v6077_v18 }
 0x4ed   :  { %v6238_v48 = vmul.f32 %v11111_v2, %v11111_v2 }
 0x4ee   :  { %v6266_v15 = vadd.f32 %v6265_v61, %v6235_v14  ;;  %v6197_v34 = vadd.f32 %v11117_v56, %v6196_v49  ;;  %v6236_v25 = vmul.f32 %v11117_v56, %v11117_v56 }
 0x4f0   :  { %v6198_v28 = vadd.f32 %v11102_v26, %v6197_v34  ;;  %v6267_v44 = vadd.f32 %v6266_v15, %v6236_v25  ;;  %v7965_v0 = vpop.f32.mrb[112].mxu1 }
 0x4f1   :  { %v11126_v29 = vadd.f32 %v10994_v47, %v7965_v0  ;;  %v6090_v27 = vpop.f32.mrb[113].mxu1 }
 0x4f2   :  { %v6268_v38 = vadd.f32 %v6267_v44, %v6237_v9  ;;  %v11131_v7 = vadd.f32 %v10988_v53, %v6090_v27  ;;  %v6199_v63 = vadd.f32 %v11111_v2, %v6198_v28  ;;  %v7966_v6 = vpop.f32.mrb[114].mxu1 }
 0x4f3   :  { %v11135_v8 = vadd.f32 %v10996_v42, %v7966_v6  ;;  %v6093_v45 = vpop.f32.mrb[115].mxu1  ;;  %v6241_v42 = vmul.f32 %v11126_v29, %v11126_v29 }
 0x4f4   :  { %v6200_v32 = vadd.f32 %v11131_v7, %v6199_v63  ;;  %v6239_v47 = vmul.f32 %v11131_v7, %v11131_v7  ;;  %v6269_v60 = vadd.f32 %v6268_v38, %v6238_v48  ;;  %v11141_v40 = vadd.f32 %v10990_v55, %v6093_v45 }
 0x4f5   :  { %v6242_v55 = vmul.f32 %v11135_v8, %v11135_v8 }
 0x4f6   :  { %v6270_v54 = vadd.f32 %v6269_v60, %v6239_v47  ;;  %v6201_v53 = vadd.f32 %v11141_v40, %v6200_v32  ;;  %v6240_v36 = vmul.f32 %v11141_v40, %v11141_v40 }
 0x4f8   :  { %v6202_v13 = vadd.f32 %v11126_v29, %v6201_v53  ;;  %v6271_v62 = vadd.f32 %v6270_v54, %v6240_v36  ;;  %v7969_v5 = vpop.f32.mrb[116].mxu1 }
 0x4f9   :  { %v11150_v19 = vadd.f32 %v11006_v16, %v7969_v5  ;;  %v6106_v17 = vpop.f32.mrb[117].mxu1 }
 0x4fa   :  { %v6272_v51 = vadd.f32 %v6271_v62, %v6241_v42  ;;  %v11155_v33 = vadd.f32 %v11000_v3, %v6106_v17  ;;  %v6203_v18 = vadd.f32 %v11135_v8, %v6202_v13  ;;  %v7970_v49 = vpop.f32.mrb[118].mxu1 }
 0x4fb   :  { %v11159_v14 = vadd.f32 %v11008_v43, %v7970_v49  ;;  %v6109_v61 = vpop.f32.mrb[119].mxu1  ;;  %v6245_v43 = vmul.f32 %v11150_v19, %v11150_v19 }
 0x4fc   :  { %v6204_v15 = vadd.f32 %v11155_v33, %v6203_v18  ;;  %v6243_v16 = vmul.f32 %v11155_v33, %v11155_v33  ;;  %v6273_v34 = vadd.f32 %v6272_v51, %v6242_v55  ;;  %v11165_v25 = vadd.f32 %v11002_v58, %v6109_v61 }
 0x4fd   :  { %v6246_v58 = vmul.f32 %v11159_v14, %v11159_v14 }
 0x4fe   :  { %v6274_v9 = vadd.f32 %v6273_v34, %v6243_v16  ;;  %v6205_v3 = vadd.f32 %v11165_v25, %v6204_v15  ;;  %v6244_v28 = vmul.f32 %v11165_v25, %v11165_v25 }
 0x500   :  { %v6206_v44 = vadd.f32 %v11150_v19, %v6205_v3  ;;  %v6275_v0 = vadd.f32 %v6274_v9, %v6244_v28  ;;  %v7973_v27 = vpop.f32.mrb[120].mxu1 }
 0x501   :  { %v11174_v48 = vadd.f32 %v11018_v24, %v7973_v27  ;;  %v6122_v38 = vpop.f32.mrb[121].mxu1 }
 0x502   :  { %v6276_v63 = vadd.f32 %v6275_v0, %v6245_v43  ;;  %v11179_v6 = vadd.f32 %v11012_v10, %v6122_v38  ;;  %v6207_v45 = vadd.f32 %v11159_v14, %v6206_v44  ;;  %v7974_v32 = vpop.f32.mrb[122].mxu1 }
 0x503   :  { %v11183_v47 = vadd.f32 %v11020_v21, %v7974_v32  ;;  %v6125_v60 = vpop.f32.mrb[123].mxu1  ;;  %v6249_v21 = vmul.f32 %v11174_v48, %v11174_v48 }
 0x504   :  { %v6208_v54 = vadd.f32 %v11179_v6, %v6207_v45  ;;  %v6247_v24 = vmul.f32 %v11179_v6, %v11179_v6  ;;  %v6277_v53 = vadd.f32 %v6276_v63, %v6246_v58  ;;  %v11189_v36 = vadd.f32 %v11014_v22, %v6125_v60 }
 0x505   :  { %v6250_v22 = vmul.f32 %v11183_v47, %v11183_v47 }
 0x506   :  { %v6278_v42 = vadd.f32 %v6277_v53, %v6247_v24  ;;  %v6209_v10 = vadd.f32 %v11189_v36, %v6208_v54  ;;  %v6248_v13 = vmul.f32 %v11189_v36, %v11189_v36 }
 0x508   :  { %v6210_v62 = vadd.f32 %v11174_v48, %v6209_v10  ;;  %v6279_v5 = vadd.f32 %v6278_v42, %v6248_v13  ;;  %v7977_v17 = vpop.f32.mrb[124].mxu1 }
 0x509   :  { %v11198_v55 = vadd.f32 %v11028_v59, %v7977_v17  ;;  %v6138_v51 = vpop.f32.mrb[125].mxu1 }
 0x50a   :  { %v6280_v18 = vadd.f32 %v6279_v5, %v6249_v21  ;;  %v11203_v49 = vadd.f32 %v11024_v12, %v6138_v51  ;;  %v6211_v61 = vadd.f32 %v11183_v47, %v6210_v62  ;;  %v7978_v15 = vpop.f32.mrb[126].mxu1 }
 0x50b   :  { %v11207_v16 = vadd.f32 %v11030_v46, %v7978_v15  ;;  %v6141_v34 = vpop.f32.mrb[127].mxu1  ;;  %v6253_v46 = vmul.f32 %v11198_v55, %v11198_v55 }
 0x50c   :  { %v6212_v9 = vadd.f32 %v11203_v49, %v6211_v61  ;;  %v6251_v59 = vmul.f32 %v11203_v49, %v11203_v49  ;;  %v6281_v3 = vadd.f32 %v6280_v18, %v6250_v22  ;;  %v11213_v28 = vadd.f32 %v11026_v52, %v6141_v34 }
 0x50d   :  { %v6254_v38 = vmul.f32 %v11207_v16, %v11207_v16 }
 0x50e   :  { %v6282_v43 = vadd.f32 %v6281_v3, %v6251_v59  ;;  %v6213_v12 = vadd.f32 %v11213_v28, %v6212_v9  ;;  %v6252_v44 = vmul.f32 %v11213_v28, %v11213_v28 }
 0x510   :  { %v6214_v0 = vadd.f32 %v11198_v55, %v6213_v12  ;;  %v6283_v27 = vadd.f32 %v6282_v43, %v6252_v44 }
 0x512   :  { %v6215_v58 = vadd.f32 %v11207_v16, %v6214_v0  ;;  %v6284_v63 = vadd.f32 %v6283_v27, %v6253_v46  ;;  %v11493_v0 = vld [vmem:[#allocation23_spill] sm:$0xff] }
 0x514   :  { %v6216_v52 = vrot.slane %v6215_v58, 4  ;;  %v6285_v45 = vadd.f32 %v6284_v63, %v6254_v38 }
 0x516   :  { %v6217_v32 = vadd.f32 %v6216_v52, %v6215_v58  ;;  %v6286_v60 = vrot.slane %v6285_v45, 4 }
 0x518   :  { %v6218_v54 = vrot.slane %v6217_v32, 2  ;;  %v6287_v24 = vadd.f32 %v6286_v60, %v6285_v45 }
 0x51a   :  { %v6219_v53 = vadd.f32 %v6218_v54, %v6217_v32  ;;  %v6288_v42 = vrot.slane %v6287_v24, 2 }
 0x51c   :  { %v6220_v10 = vrot.slane %v6219_v53, 1  ;;  %v6289_v13 = vadd.f32 %v6288_v42, %v6287_v24 }
 0x51e   :  { %v6221_v21 = vadd.f32 %v6220_v10, %v6219_v53  ;;  %v6290_v62 = vrot.slane %v6289_v13, 1 }
 0x520   :  { %v11224_v5 = vmul.f32 0.00390625, %v6221_v21  ;;  %v6291_v17 = vadd.f32 %v6290_v62, %v6289_v13  ;;  %v8554_v62 = vld [vmem:[#allocation3 + $0xe8] sm:$0xff] }
 0x522   :  { %v6292_v51 = vmul.f32 0.00390625, %v6291_v17  ;;  %v6293_v22 = vmul.f32 %v11224_v5, %v11224_v5  ;;  %v6325_v18 = vsub.f32 %v11213_v28, %v11224_v5  ;;  %v6305_v15 = vsub.f32 %v11093_v57, %v11224_v5 }
 0x523   :  { %v6307_v34 = vsub.f32 %v11087_v39, %v11224_v5  ;;  %v6308_v59 = vsub.f32 %v11107_v20, %v11224_v5  ;;  %v6309_v3 = vsub.f32 %v11117_v56, %v11224_v5  ;;  %v6310_v43 = vsub.f32 %v11102_v26, %v11224_v5 }
 0x524   :  { %v6294_v61 = vsub.f32 %v6292_v51, %v6293_v22  ;;  %v6311_v28 = vsub.f32 %v11111_v2, %v11224_v5  ;;  %v6312_v12 = vsub.f32 %v11131_v7, %v11224_v5  ;;  %v6313_v57 = vsub.f32 %v11141_v40, %v11224_v5 }
 0x525   :  { %v6314_v39 = vsub.f32 %v11126_v29, %v11224_v5  ;;  %v6315_v20 = vsub.f32 %v11135_v8, %v11224_v5  ;;  %v6316_v56 = vsub.f32 %v11155_v33, %v11224_v5  ;;  %v6317_v26 = vsub.f32 %v11165_v25, %v11224_v5 }
 0x526   :  { %v6295_v9 = vmax.f32 %v6294_v61, 0.0  ;;  %v6318_v2 = vsub.f32 %v11150_v19, %v11224_v5  ;;  %v6319_v7 = vsub.f32 %v11159_v14, %v11224_v5  ;;  %v6320_v40 = vsub.f32 %v11179_v6, %v11224_v5  ;;  %v6330_v6 = vld [vmem:[%s11393_s5] sm:$0x1] }
 0x527   :  { %v6321_v29 = vsub.f32 %v11189_v36, %v11224_v5  ;;  %v6322_v8 = vsub.f32 %v11174_v48, %v11224_v5  ;;  %v6323_v33 = vsub.f32 %v11183_v47, %v11224_v5  ;;  %v6324_v25 = vsub.f32 %v11203_v49, %v11224_v5 }
 0x528   :  { %v6328_v44 = vadd.f32 1e-05, %v6295_v9  ;;  %v6326_v19 = vsub.f32 %v11198_v55, %v11224_v5  ;;  %v6327_v14 = vsub.f32 %v11207_v16, %v11224_v5  ;;  %v6296_v48 = vsub.f32 %v11036_v11, %v11224_v5  ;;  %v11292_v11 = vld [vmem:[%s11394_s6] ss:$0 sm:$0xff]  ;;  %s8688_s6 = smov [#allocation9]  }
 0x529   :  { %v6297_v47 = vsub.f32 %v11042_v23, %v11224_v5  ;;  %v6298_v49 = vsub.f32 %v11033_v50, %v11224_v5  ;;  %v11494_v55 = vsub.s32 0, %v11493_v0  ;;  %v6299_v16 = vsub.f32 %v11039_v30, %v11224_v5  ;;  %s11358_s20 = sshll.u32 %s8688_s6, 4  ;;  %s6477_s20 = int_to_ptr.vmem [resolvable:$true] %s11358_s20 }
 0x52a   :  { %8490 = vrsqrt.f32 %v6328_v44  ;;  %v6300_v38 = vsub.f32 %v11059_v41, %v11224_v5  ;;  %v6301_v58 = vsub.f32 %v11069_v31, %v11224_v5  ;;  %v6302_v50 = vsub.f32 %v11054_v4, %v11224_v5  ;;  %s8652_s21 = scalar_lea.vmem %s6477_s20, 4096  ;;  %p8657_p11 = scmp.lt.s32.totalorder %s6477_s20, %s6477_s20 }
 0x52b   :  { %v6303_v23 = vsub.f32 %v11063_v35, %v11224_v5  ;;  %v6304_v30 = vsub.f32 %v11083_v37, %v11224_v5  ;;  %v6306_v41 = vsub.f32 %v11078_v1, %v11224_v5  ;;  %p8653_p10 = scmp.ne.s32.totalorder %s6477_s20, %s8652_s21  ;;  %p8658_p12 = scmp.lt.s32.totalorder %s8652_s21, %s8652_s21 }
 0x52d   :  { %p8659_p13 = por %p8658_p12, %p8657_p11 }
 0x52f   :  { %p8660_p0 = pnand %p8659_p13, %p8653_p10 }
 0x534   :  { %v8491_v36 = vpop.eup %8490 }
 0x535   :  { %v6331_v46 = vmul.f32 %v8491_v36, %v6330_v6 }
 0x537   :  { %v6335_v27 = vrot.slane %v6331_v46, %v11494_v55 }
 0x539   :  { %v6365_v63 = vmul.f32 %v6335_v27, %v6325_v18  ;;  %v6336_v52 = vmul.f32 %v6335_v27, %v6296_v48  ;;  %v6337_v31 = vmul.f32 %v6335_v27, %v6297_v47  ;;  %v6338_v45 = vmul.f32 %v6335_v27, %v6298_v49 }
 0x53a   :  { %v6339_v32 = vmul.f32 %v6335_v27, %v6299_v16  ;;  %v6340_v60 = vmul.f32 %v6335_v27, %v6300_v38  ;;  %v6341_v54 = vmul.f32 %v6335_v27, %v6301_v58  ;;  %v6342_v24 = vmul.f32 %v6335_v27, %v6302_v50 }
 0x53b   :  { %v6404_v53 = vadd.f32 %v11292_v11, %v6365_v63  ;;  %v6343_v4 = vmul.f32 %v6335_v27, %v6303_v23  ;;  %v6344_v42 = vmul.f32 %v6335_v27, %v6304_v30  ;;  %v6345_v10 = vmul.f32 %v6335_v27, %v6305_v15 }
 0x53c   :  { %v6346_v35 = vmul.f32 %v6335_v27, %v6306_v41  ;;  %v6347_v13 = vmul.f32 %v6335_v27, %v6307_v34  ;;  %v6348_v21 = vmul.f32 %v6335_v27, %v6308_v59  ;;  %v6349_v37 = vmul.f32 %v6335_v27, %v6309_v3 }
 0x53d   :  { %v6436_v17 = vadd.f32 %v8554_v62, %v6404_v53  ;;  %v6350_v1 = vmul.f32 %v6335_v27, %v6310_v43  ;;  %v6351_v5 = vmul.f32 %v6335_v27, %v6311_v28  ;;  %v6352_v51 = vmul.f32 %v6335_v27, %v6312_v12 }
 0x53e   :  { %v6353_v22 = vmul.f32 %v6335_v27, %v6313_v57  ;;  %v6354_v18 = vmul.f32 %v6335_v27, %v6314_v39  ;;  %v6355_v61 = vmul.f32 %v6335_v27, %v6315_v20  ;;  %v6356_v9 = vmul.f32 %v6335_v27, %v6316_v56 }
 0x53f   :  { %6468 = vst [vmem:[#allocation9 + $0xe8] sm:$0xff] %v6436_v17  ;;  %v6357_v44 = vmul.f32 %v6335_v27, %v6317_v26  ;;  %v6358_v6 = vmul.f32 %v6335_v27, %v6318_v2  ;;  %v6359_v36 = vmul.f32 %v6335_v27, %v6319_v7  ;;  %v6360_v46 = vmul.f32 %v6335_v27, %v6320_v40  ;;  %v8562_v17 = vld [vmem:[#allocation3 + $0x38] sm:$0xff] }
 0x540   :  { %v6361_v48 = vmul.f32 %v6335_v27, %v6321_v29  ;;  %v6362_v15 = vmul.f32 %v6335_v27, %v6322_v8  ;;  %v6363_v47 = vmul.f32 %v6335_v27, %v6323_v33  ;;  %v6364_v34 = vmul.f32 %v6335_v27, %v6324_v25 }
 0x541   :  { %v6366_v59 = vmul.f32 %v6335_v27, %v6326_v19  ;;  %v6367_v3 = vmul.f32 %v6335_v27, %v6327_v14  ;;  %v6375_v49 = vadd.f32 %v11292_v11, %v6336_v52  ;;  %v6376_v43 = vadd.f32 %v11292_v11, %v6337_v31 }
 0x542   :  { %v6377_v28 = vadd.f32 %v11292_v11, %v6338_v45  ;;  %v6378_v12 = vadd.f32 %v11292_v11, %v6339_v32  ;;  %v6379_v57 = vadd.f32 %v11292_v11, %v6340_v60  ;;  %v6380_v39 = vadd.f32 %v11292_v11, %v6341_v54  ;;  %v8555_v45 = vld [vmem:[#allocation3] sm:$0xff]  ;;  %v8556_v60 = vld [vmem:[#allocation3 + $0x8] sm:$0xff] }
 0x543   :  { %v6381_v20 = vadd.f32 %v11292_v11, %v6342_v24  ;;  %v6382_v56 = vadd.f32 %v11292_v11, %v6343_v4  ;;  %v6383_v26 = vadd.f32 %v11292_v11, %v6344_v42  ;;  %v6384_v2 = vadd.f32 %v11292_v11, %v6345_v10  ;;  %v8557_v24 = vld [vmem:[#allocation3 + $0x10] sm:$0xff]  ;;  %v8558_v4 = vld [vmem:[#allocation3 + $0x18] sm:$0xff]  ;;  %v8559_v10 = vld [vmem:[#allocation3 + $0x20] sm:$0xff] }
 0x544   :  { %v6385_v7 = vadd.f32 %v11292_v11, %v6346_v35  ;;  %v6386_v40 = vadd.f32 %v11292_v11, %v6347_v13  ;;  %v6387_v29 = vadd.f32 %v11292_v11, %v6348_v21  ;;  %v6388_v8 = vadd.f32 %v11292_v11, %v6349_v37  ;;  %v8560_v13 = vld [vmem:[#allocation3 + $0x28] sm:$0xff]  ;;  %v8561_v37 = vld [vmem:[#allocation3 + $0x30] sm:$0xff] }
 0x545   :  { %v6389_v33 = vadd.f32 %v11292_v11, %v6350_v1  ;;  %v6390_v25 = vadd.f32 %v11292_v11, %v6351_v5  ;;  %v6391_v19 = vadd.f32 %v11292_v11, %v6352_v51  ;;  %v6392_v14 = vadd.f32 %v11292_v11, %v6353_v22  ;;  %v8563_v5 = vld [vmem:[#allocation3 + $0x40] sm:$0xff] }
 0x546   :  { %v6393_v0 = vadd.f32 %v11292_v11, %v6354_v18  ;;  %v11323_v55 = vadd.f32 %v11292_v11, %v6355_v61  ;;  %v11326_v27 = vadd.f32 %v11292_v11, %v6356_v9  ;;  %v11329_v16 = vadd.f32 %v11292_v11, %v6357_v44  ;;  %v8565_v18 = vld [vmem:[#allocation3 + $0x50] sm:$0xff]  ;;  %v8566_v9 = vld [vmem:[#allocation3 + $0x58] sm:$0xff] }
 0x547   :  { %v11332_v38 = vadd.f32 %v11292_v11, %v6358_v6  ;;  %v11335_v58 = vadd.f32 %v11292_v11, %v6359_v36  ;;  %v11338_v50 = vadd.f32 %v11292_v11, %v6360_v46  ;;  %v11341_v23 = vadd.f32 %v11292_v11, %v6361_v48  ;;  %v8567_v6 = vld [vmem:[#allocation3 + $0x60] sm:$0xff]  ;;  %v8568_v46 = vld [vmem:[#allocation3 + $0x68] sm:$0xff] }
 0x548   :  { %v11344_v30 = vadd.f32 %v11292_v11, %v6362_v15  ;;  %v11347_v41 = vadd.f32 %v11292_v11, %v6363_v47  ;;  %v11350_v63 = vadd.f32 %v11292_v11, %v6364_v34  ;;  %v11353_v52 = vadd.f32 %v11292_v11, %v6366_v59  ;;  %v8569_v15 = vld [vmem:[#allocation3 + $0x70] sm:$0xff]  ;;  %v8570_v34 = vld [vmem:[#allocation3 + $0x78] sm:$0xff] }
 0x549   :  { %v11356_v31 = vadd.f32 %v11292_v11, %v6367_v3  ;;  %v6407_v32 = vadd.f32 %v8555_v45, %v6375_v49  ;;  %v6408_v54 = vadd.f32 %v8556_v60, %v6376_v43  ;;  %v6409_v53 = vadd.f32 %v8557_v24, %v6377_v28  ;;  %v8564_v11 = vld [vmem:[#allocation3 + $0x48] sm:$0xff]  ;;  %v8571_v3 = vld [vmem:[#allocation3 + $0x80] sm:$0xff]  ;;  %v8585_v60 = vld [vmem:[#allocation3 + $0xf8] sm:$0xff] }
 0x54a   :  { %v6410_v42 = vadd.f32 %v8558_v4, %v6378_v12  ;;  %v6411_v35 = vadd.f32 %v8559_v10, %v6379_v57  ;;  %v6412_v21 = vadd.f32 %v8560_v13, %v6380_v39  ;;  %v6413_v62 = vadd.f32 %v8561_v37, %v6381_v20  ;;  %v8572_v43 = vld [vmem:[#allocation3 + $0x88] sm:$0xff]  ;;  %v8573_v12 = vld [vmem:[#allocation3 + $0x90] sm:$0xff]  ;;  %v8574_v39 = vld [vmem:[#allocation3 + $0x98] sm:$0xff] }
 0x54b   :  { %v6414_v1 = vadd.f32 %v8562_v17, %v6382_v56  ;;  %v6415_v51 = vadd.f32 %v8563_v5, %v6383_v26  ;;  %v6416_v22 = vadd.f32 %v8564_v11, %v6384_v2  ;;  %v6417_v61 = vadd.f32 %v8565_v18, %v6385_v7  ;;  %6439 = vst [vmem:[#allocation9] sm:$0xff] %v6407_v32  ;;  %v8575_v56 = vld [vmem:[#allocation3 + $0xa0] sm:$0xff]  ;;  %v8576_v2 = vld [vmem:[#allocation3 + $0xa8] sm:$0xff]  ;;  %v8584_v32 = vld [vmem:[#allocation3 + $0xf0] sm:$0xff] }
 0x54c   :  { %6440 = vst [vmem:[#allocation9 + $0x8] sm:$0xff] %v6408_v54  ;;  %6441 = vst [vmem:[#allocation9 + $0x10] sm:$0xff] %v6409_v53  ;;  %v6418_v44 = vadd.f32 %v8566_v9, %v6386_v40  ;;  %v6419_v36 = vadd.f32 %v8567_v6, %v6387_v29  ;;  %v6420_v48 = vadd.f32 %v8568_v46, %v6388_v8  ;;  %v8577_v40 = vld [vmem:[#allocation3 + $0xb0] sm:$0xff]  ;;  %v8578_v8 = vld [vmem:[#allocation3 + $0xb8] sm:$0xff] }
 0x54d   :  { %v6421_v47 = vadd.f32 %v8569_v15, %v6389_v33  ;;  %6442 = vst [vmem:[#allocation9 + $0x18] sm:$0xff] %v6410_v42  ;;  %6443 = vst [vmem:[#allocation9 + $0x20] sm:$0xff] %v6411_v35  ;;  %v6422_v59 = vadd.f32 %v8570_v34, %v6390_v25  ;;  %v6423_v49 = vadd.f32 %v8571_v3, %v6391_v19  ;;  %v8579_v25 = vld [vmem:[#allocation3 + $0xc0] sm:$0xff] }
 0x54e   :  { %6444 = vst [vmem:[#allocation9 + $0x28] sm:$0xff] %v6412_v21  ;;  %6445 = vst [vmem:[#allocation9 + $0x30] sm:$0xff] %v6413_v62  ;;  %v6424_v28 = vadd.f32 %v8572_v43, %v6392_v14  ;;  %v6425_v57 = vadd.f32 %v8573_v12, %v6393_v0  ;;  %v6426_v20 = vadd.f32 %v8574_v39, %v11323_v55  ;;  %v8580_v14 = vld [vmem:[#allocation3 + $0xc8] sm:$0xff]  ;;  %v8581_v55 = vld [vmem:[#allocation3 + $0xd0] sm:$0xff] }
 0x54f   :  { %6446 = vst [vmem:[#allocation9 + $0x38] sm:$0xff] %v6414_v1  ;;  %6447 = vst [vmem:[#allocation9 + $0x40] sm:$0xff] %v6415_v51  ;;  %v6427_v26 = vadd.f32 %v8575_v56, %v11326_v27  ;;  %v6428_v7 = vadd.f32 %v8576_v2, %v11329_v16  ;;  %v6429_v29 = vadd.f32 %v8577_v40, %v11332_v38  ;;  %v8582_v16 = vld [vmem:[#allocation3 + $0xd8] sm:$0xff]  ;;  %v8583_v45 = vld [vmem:[#allocation3 + $0xe0] sm:$0xff] }
 0x550   :  { %6448 = vst [vmem:[#allocation9 + $0x48] sm:$0xff] %v6416_v22  ;;  %6449 = vst [vmem:[#allocation9 + $0x50] sm:$0xff] %v6417_v61  ;;  %v6430_v33 = vadd.f32 %v8578_v8, %v11335_v58  ;;  %v6431_v19 = vadd.f32 %v8579_v25, %v11338_v50  ;;  %v6432_v0 = vadd.f32 %v8580_v14, %v11341_v23 }
 0x551   :  { %6450 = vst [vmem:[#allocation9 + $0x58] sm:$0xff] %v6418_v44  ;;  %6451 = vst [vmem:[#allocation9 + $0x60] sm:$0xff] %v6419_v36  ;;  %v6433_v27 = vadd.f32 %v8581_v55, %v11344_v30  ;;  %v6434_v38 = vadd.f32 %v8582_v16, %v11347_v41  ;;  %v6435_v58 = vadd.f32 %v8583_v45, %v11350_v63 }
 0x552   :  { %6452 = vst [vmem:[#allocation9 + $0x68] sm:$0xff] %v6420_v48  ;;  %6453 = vst [vmem:[#allocation9 + $0x70] sm:$0xff] %v6421_v47  ;;  %v6437_v50 = vadd.f32 %v8584_v32, %v11353_v52  ;;  %v6438_v23 = vadd.f32 %v8585_v60, %v11356_v31 }
 0x553   :  { %6454 = vst [vmem:[#allocation9 + $0x78] sm:$0xff] %v6422_v59  ;;  %6455 = vst [vmem:[#allocation9 + $0x80] sm:$0xff] %v6423_v49 }
 0x554   :  { %6456 = vst [vmem:[#allocation9 + $0x88] sm:$0xff] %v6424_v28  ;;  %6457 = vst [vmem:[#allocation9 + $0x90] sm:$0xff] %v6425_v57 }
 0x555   :  { %6458 = vst [vmem:[#allocation9 + $0x98] sm:$0xff] %v6426_v20  ;;  %6459 = vst [vmem:[#allocation9 + $0xa0] sm:$0xff] %v6427_v26 }
 0x556   :  { %6460 = vst [vmem:[#allocation9 + $0xa8] sm:$0xff] %v6428_v7  ;;  %6461 = vst [vmem:[#allocation9 + $0xb0] sm:$0xff] %v6429_v29 }
 0x557   :  { %6462 = vst [vmem:[#allocation9 + $0xb8] sm:$0xff] %v6430_v33  ;;  %6463 = vst [vmem:[#allocation9 + $0xc0] sm:$0xff] %v6431_v19 }
 0x558   :  { %6464 = vst [vmem:[#allocation9 + $0xc8] sm:$0xff] %v6432_v0  ;;  %6465 = vst [vmem:[#allocation9 + $0xd0] sm:$0xff] %v6433_v27 }
 0x559   :  { %6466 = vst [vmem:[#allocation9 + $0xd8] sm:$0xff] %v6434_v38  ;;  %6467 = vst [vmem:[#allocation9 + $0xe0] sm:$0xff] %v6435_v58 }
 0x55a   :  { %6469 = vst [vmem:[#allocation9 + $0xf0] sm:$0xff] %v6437_v50  ;;  %6470 = vst [vmem:[#allocation9 + $0xf8] sm:$0xff] %v6438_v23 }
 0x55b   :  { %8663 = shalt.err (!%p8660_p0)
}
 0x55c   :  { %s8664_s24 = scalar_lea.hbm %s11395_s7, 4096 }
 0x55d   :  { %p8665_p1 = scmp.ne.s32.totalorder %s11395_s7, %s8664_s24  ;;  %p8668_p2 = scmp.lt.u32.totalorder %s8664_s24, %s11395_s7 }
 0x55f   :  { %p8670_p3 = pnand %p8668_p2, %p8665_p1 }
 0x561   :  { %8673 = shalt.err (!%p8670_p3)
}
 0x562   :  { %6482 = dma.vmem_to_hbm [thread:$0]  %s6477_s20, 4096, %s11395_s7, [#allocation5], %s8684_s1, %s8684_s1, %s8685_s25  }
 0x563   :  { %8678 = dma.done.wait [#allocation5], 4096  }
 0x564   :  { %8679 = vsyncadd [#allocation5], 4294963200 }
 0x565   :  { %6486 = vsyncpa [#allocation4], 1 }
 0x566   :  { %6487 = vsyncpa [#allocation7], 1 }
 0x567   :  { %6488 = vsyncpa [#allocation5], 1 }

</bundles_post_ra>
